<compile_context>
chip_gen: v7x
topology: tpu7x:2x2x1
jax: 0.10.0
libtpu: 0.0.40
codegen_flags: <defaults>
</compile_context>

<pallas_src>
import functools

import jax
import jax.numpy as jnp
from jax.experimental import pallas as pl
from jax.experimental.pallas import tpu as pltpu


# ----------------------------------------------------------------------------
# Kernel
# ----------------------------------------------------------------------------
def _layernorm_over_channels(x, gamma_col, beta_col, eps=1e-5):
    """LayerNorm over the channel (sublane) axis of a (C, N) slab."""
    mu = jnp.mean(x, axis=0, keepdims=True)              # (1, N)
    xc = x - mu
    var = jnp.mean(xc * xc, axis=0, keepdims=True)       # biased, like torch LayerNorm
    return xc * jax.lax.rsqrt(var + eps) * gamma_col + beta_col


def _s2block_kernel(x_ref, vec_ref, w_ref, o_ref, *, C, H, W):
    Bt = x_ref.shape[0]                                   # images in this block
    HW = H * W
    N = Bt * HW
    G = C // 4                                            # spatial-shift channel-group size

    # ---- unpack the parameter banks (static sublane slices, all 8-aligned) ----
    vec = vec_ref[...]                                    # (8C, 1)
    g1, be1 = vec[0:C], vec[C:2 * C]                      # pre-norm gamma / beta
    b1 = vec[2 * C:5 * C]                                 # mlp1 bias (3C, 1)
    b2 = vec[5 * C:6 * C]                                 # mlp2 bias (C, 1)
    g2, be2 = vec[6 * C:7 * C], vec[7 * C:8 * C]          # final norm gamma / beta

    wall = w_ref[...]                                     # (8C, C)
    w1 = wall[0:3 * C]                                    # mlp1 (3C, C)
    wa = wall[3 * C:4 * C]                                # split-attn mlp1 (C, C)
    wb = wall[4 * C:7 * C]                                # split-attn mlp2 (3C, C)
    w2 = wall[7 * C:8 * C]                                # mlp2 (C, C)

    # ---- assemble Bt images into one lane-dense (C, Bt*HW) slab ---------------
    # Each image occupies a 128-aligned lane window [i*HW, (i+1)*HW).
    x = jnp.concatenate([x_ref[i] for i in range(Bt)], axis=1)        # (C, N)

    # ---- PreNormResidual: LayerNorm over channels, per spatial position -------
    xn = _layernorm_over_channels(x, g1, be1)

    # ---- S2Attention.mlp1: Linear(C -> 3C), transposed layout -----------------
    y = jnp.dot(w1, xn, preferred_element_type=jnp.float32) + b1      # (3C, N)

    # ---- spatial_shift1 / spatial_shift2 via lane rotations (XLU) -------------
    # out[:, q] = in[:, q - shift] where the destination is interior, else
    # keep the original value (the roll's wrap-around only lands on masked-out
    # boundary positions, including across image boundaries).
    lane = jax.lax.broadcasted_iota(jnp.int32, (G, N), 1)
    q_hw = lane % HW                                      # position within the image
    q_w = lane % W                                        # position within the row
    m_hp = q_hw >= W                                      # out[h,w] = in[h-1,w] valid
    m_hm = q_hw < HW - W                                  # out[h,w] = in[h+1,w] valid
    m_wp = q_w >= 1                                       # out[h,w] = in[h,w-1] valid
    m_wm = q_w < W - 1                                    # out[h,w] = in[h,w+1] valid

    def shift(t, amt, valid):
        rolled = pltpu.roll(t, shift=amt % N, axis=1)     # cyclic lane rotation
        return jnp.where(valid, rolled, t)

    def shift_groups(t, spec):
        return jnp.concatenate(
            [shift(t[i * G:(i + 1) * G], amt, m) for i, (amt, m) in enumerate(spec)],
            axis=0)                                        # (C, N)

    s1_spec = ((W, m_hp), (-W, m_hm), (1, m_wp), (-1, m_wm))     # spatial_shift1
    s2_spec = ((1, m_wp), (-1, m_wm), (W, m_hp), (-W, m_hm))     # spatial_shift2
    x1 = shift_groups(y[0:C], s1_spec)
    x2 = shift_groups(y[C:2 * C], s2_spec)
    x3 = y[2 * C:3 * C]

    # ---- SplitAttention --------------------------------------------------------
    # Per-image global pool (sum over branches and space) -> (C, Bt); the tiny
    # 2-layer MLP then runs once for all Bt images in this block.
    s = x1 + x2 + x3
    a_mat = jnp.concatenate(
        [jnp.sum(s[:, i * HW:(i + 1) * HW], axis=1, keepdims=True) for i in range(Bt)],
        axis=1)                                            # (C, Bt)
    h = jax.nn.gelu(jnp.dot(wa, a_mat, preferred_element_type=jnp.float32),
                    approximate=True)                      # (C, Bt)
    hat = jnp.dot(wb, h, preferred_element_type=jnp.float32)          # (3C, Bt)

    h1, h2, h3 = hat[0:C], hat[C:2 * C], hat[2 * C:3 * C]  # softmax over k = 3
    mx = jnp.maximum(jnp.maximum(h1, h2), h3)
    e1, e2, e3 = jnp.exp(h1 - mx), jnp.exp(h2 - mx), jnp.exp(h3 - mx)
    inv = 1.0 / (e1 + e2 + e3)
    a1, a2, a3 = e1 * inv, e2 * inv, e3 * inv              # (C, Bt) branch weights

    att = jnp.concatenate(
        [a1[:, i:i + 1] * x1[:, i * HW:(i + 1) * HW]
         + a2[:, i:i + 1] * x2[:, i * HW:(i + 1) * HW]
         + a3[:, i:i + 1] * x3[:, i * HW:(i + 1) * HW]
         for i in range(Bt)], axis=1)                      # (C, N)

    # ---- S2Attention.mlp2 + residual + final LayerNorm -------------------------
    z = jnp.dot(w2, att, preferred_element_type=jnp.float32) + b2
    out = _layernorm_over_channels(z + x, g2, be2)
    for i in range(Bt):                                    # lane-dense (C, HW) stores
        o_ref[i] = out[:, i * HW:(i + 1) * HW]


# ----------------------------------------------------------------------------
# Wrapper
# ----------------------------------------------------------------------------
def s2block_forward(x_nchw, g1, be1, w1, b1, wa, wb, w2, b2, g2, be2, *, block_b=8):
    """S2Block forward (depth=1, dropout=0).  x_nchw: (B, C, H, W) float32."""
    B, C, H, W = x_nchw.shape
    HW = H * W
    assert C % 4 == 0 and (C // 4) % 8 == 0, "channel groups must be sublane aligned"
    assert HW % 128 == 0, "flattened spatial axis must fill whole lanes"

    # NCHW is already channels-major: (B, C, H, W) -> (B, C, H*W) is a pure
    # reshape — no transpose round trip through HBM on either side.
    x3d = x_nchw.reshape(B, C, HW).astype(jnp.float32)

    # Batch tiling: Bt images per grid step (pad the batch if needed).
    Bt = max(1, min(block_b, B))
    Bp = ((B + Bt - 1) // Bt) * Bt
    if Bp != B:
        x3d = jnp.pad(x3d, ((0, Bp - B), (0, 0), (0, 0)))

    # Packed parameter banks: one (8C, 1) vector bank, one (8C, C) weight bank.
    vecs = jnp.concatenate([
        g1.reshape(C, 1), be1.reshape(C, 1), b1.reshape(3 * C, 1),
        b2.reshape(C, 1), g2.reshape(C, 1), be2.reshape(C, 1)], axis=0)      # (8C, 1)
    weights = jnp.concatenate([w1.T, wa.T, wb.T, w2.T], axis=0)              # (8C, C)

    kernel = functools.partial(_s2block_kernel, C=C, H=H, W=W)

    out3d = pl.pallas_call(
        kernel,
        out_shape=jax.ShapeDtypeStruct((Bp, C, HW), jnp.float32),
        grid_spec=pltpu.PrefetchScalarGridSpec(
            num_scalar_prefetch=0,
            grid=(Bp // Bt,),                              # Bt images per step
            in_specs=[
                pl.BlockSpec((Bt, C, HW), lambda b: (b, 0, 0)),   # activations
                pl.BlockSpec((8 * C, 1), lambda b: (0, 0)),       # vector bank
                pl.BlockSpec((8 * C, C), lambda b: (0, 0)),       # weight bank
            ],
            out_specs=pl.BlockSpec((Bt, C, HW), lambda b: (b, 0, 0)),
        ),
        compiler_params=pltpu.CompilerParams(
            dimension_semantics=("parallel",),             # batch tiles shard across TCs
        ),
    )(x3d, vecs, weights)

    return out3d[:B].reshape(B, C, H, W)


# ----------------------------------------------------------------------------
# Pure-JAX reference (mirrors the PyTorch module, NHWC internally)
# ----------------------------------------------------------------------------
def _reference(x_nchw, g1, be1, w1, b1, wa, wb, w2, b2, g2, be2):
    P = jax.lax.Precision.HIGHEST
    x = jnp.transpose(x_nchw, (0, 2, 3, 1))               # (B, H, W, C)

    def layernorm(t, g, b, eps=1e-5):
        mu = jnp.mean(t, axis=-1, keepdims=True)
        d = t - mu
        var = jnp.mean(d * d, axis=-1, keepdims=True)
        return d * jax.lax.rsqrt(var + eps) * g + b

    def shift(t, axis, d):
        n = t.shape[axis]
        if d > 0:                                          # out[i] = t[i-1], out[0] = t[0]
            keep = jax.lax.slice_in_dim(t, 0, 1, axis=axis)
            body = jax.lax.slice_in_dim(t, 0, n - 1, axis=axis)
            return jnp.concatenate([keep, body], axis=axis)
        body = jax.lax.slice_in_dim(t, 1, n, axis=axis)    # out[i] = t[i+1], out[n-1] = t[n-1]
        keep = jax.lax.slice_in_dim(t, n - 1, n, axis=axis)
        return jnp.concatenate([body, keep], axis=axis)

    def spatial_shift1(t):
        c = t.shape[-1]; qc = c // 4
        return jnp.concatenate([
            shift(t[..., 0 * qc:1 * qc], 1, +1), shift(t[..., 1 * qc:2 * qc], 1, -1),
            shift(t[..., 2 * qc:3 * qc], 2, +1), shift(t[..., 3 * qc:4 * qc], 2, -1)], axis=-1)

    def spatial_shift2(t):
        c = t.shape[-1]; qc = c // 4
        return jnp.concatenate([
            shift(t[..., 0 * qc:1 * qc], 2, +1), shift(t[..., 1 * qc:2 * qc], 2, -1),
            shift(t[..., 2 * qc:3 * qc], 1, +1), shift(t[..., 3 * qc:4 * qc], 1, -1)], axis=-1)

    def s2_attention(t):
        B_, H_, W_, C_ = t.shape
        y = jnp.einsum('bhwc,cd->bhwd', t, w1, precision=P) + b1
        x1 = spatial_shift1(y[..., :C_])
        x2 = spatial_shift2(y[..., C_:2 * C_])
        x3 = y[..., 2 * C_:]
        xs = jnp.stack([x1, x2, x3], axis=1).reshape(B_, 3, H_ * W_, C_)
        a = jnp.sum(xs, axis=(1, 2))                                         # (B, C)
        hat = jnp.dot(jax.nn.gelu(jnp.dot(a, wa, precision=P), approximate=True),
                      wb, precision=P)                                        # (B, 3C)
        bar = jax.nn.softmax(hat.reshape(B_, 3, C_), axis=1)                  # (B, 3, C)
        out = jnp.sum(bar[:, :, None, :] * xs, axis=1).reshape(B_, H_, W_, C_)
        return jnp.einsum('bhwc,cd->bhwd', out, w2, precision=P) + b2

    y = s2_attention(layernorm(x, g1, be1)) + x            # PreNormResidual (depth=1)
    y = layernorm(y, g2, be2)
    return jnp.transpose(y, (0, 3, 1, 2))                  # back to NCHW


if __name__ == "__main__":
    key = jax.random.PRNGKey(0)
    ks = jax.random.split(key, 11)

    B, C, H, W = 8, 32, 16, 16                             # d_model = 32, 16x16 feature map

    x = jax.random.normal(ks[0], (B, C, H, W), dtype=jnp.float32)

    scale = 1.0 / jnp.sqrt(jnp.float32(C))
    g1 = 1.0 + 0.1 * jax.random.normal(ks[1], (C,), dtype=jnp.float32)
    be1 = 0.1 * jax.random.normal(ks[2], (C,), dtype=jnp.float32)
    w1 = scale * jax.random.normal(ks[3], (C, 3 * C), dtype=jnp.float32)     # mlp1 (C -> 3C)
    b1 = 0.1 * jax.random.normal(ks[4], (3 * C,), dtype=jnp.float32)
    wa = 0.01 * jax.random.normal(ks[5], (C, C), dtype=jnp.float32)          # split-attn mlp1
    wb = 0.05 * jax.random.normal(ks[6], (C, 3 * C), dtype=jnp.float32)      # split-attn mlp2
    w2 = scale * jax.random.normal(ks[7], (C, C), dtype=jnp.float32)         # mlp2 (C -> C)
    b2 = 0.1 * jax.random.normal(ks[8], (C,), dtype=jnp.float32)
    g2 = 1.0 + 0.1 * jax.random.normal(ks[9], (C,), dtype=jnp.float32)
    be2 = 0.1 * jax.random.normal(ks[10], (C,), dtype=jnp.float32)

    fwd = jax.jit(functools.partial(s2block_forward, block_b=4))   # grid length 2
    out = fwd(x, g1, be1, w1, b1, wa, wb, w2, b2, g2, be2)
    out = jax.block_until_ready(out)

    ref = _reference(x, g1, be1, w1, b1, wa, wb, w2, b2, g2, be2)
    assert out.shape == (B, C, H, W)
    assert bool(jnp.all(jnp.isfinite(out)))
    assert jnp.allclose(out, ref, atol=5e-3, rtol=5e-3), (
        f"mismatch vs reference: max abs err = {jnp.max(jnp.abs(out - ref))}")

    print("KERNEL_OK")
</pallas_src>

<mosaic_0001>
module attributes {stable_mosaic.version = 11 : i64} {
  func.func @_s2block_kernel(%arg0: i32, %arg1: memref<4x32x256xf32, #tpu.memory_space<vmem>>, %arg2: memref<256x1xf32, #tpu.memory_space<vmem>>, %arg3: memref<256x32xf32, #tpu.memory_space<vmem>>, %arg4: memref<4x32x256xf32, #tpu.memory_space<vmem>>) attributes {dimension_semantics = [#tpu.dimension_semantics<parallel>], iteration_bounds = array<i64: 2>, scalar_prefetch = 0 : i64, scratch_operands = 0 : i64, tpu.core_type = #tpu.core_type<tc>, window_params = [{transform_indices = @transform_0, window_bounds = array<i64: 4, 32, 256>}, {pipeline_mode = #tpu.pipeline_mode<synchronous>, transform_indices = @transform_1, window_bounds = array<i64: 256, 1>}, {pipeline_mode = #tpu.pipeline_mode<synchronous>, transform_indices = @transform_2, window_bounds = array<i64: 256, 32>}, {transform_indices = @transform_3, window_bounds = array<i64: 4, 32, 256>}]} {
    %c0 = arith.constant 0 : index
    %c0_0 = arith.constant 0 : index
    %0 = vector.load %arg2[%c0, %c0_0] : memref<256x1xf32, #tpu.memory_space<vmem>>, vector<256x1xf32>
    %1 = vector.extract_strided_slice %0 {offsets = [0, 0], sizes = [32, 1], strides = [1, 1]} : vector<256x1xf32> to vector<32x1xf32>
    %2 = vector.extract_strided_slice %0 {offsets = [32, 0], sizes = [32, 1], strides = [1, 1]} : vector<256x1xf32> to vector<32x1xf32>
    %3 = vector.extract_strided_slice %0 {offsets = [64, 0], sizes = [96, 1], strides = [1, 1]} : vector<256x1xf32> to vector<96x1xf32>
    %4 = vector.extract_strided_slice %0 {offsets = [160, 0], sizes = [32, 1], strides = [1, 1]} : vector<256x1xf32> to vector<32x1xf32>
    %5 = vector.extract_strided_slice %0 {offsets = [192, 0], sizes = [32, 1], strides = [1, 1]} : vector<256x1xf32> to vector<32x1xf32>
    %6 = vector.extract_strided_slice %0 {offsets = [224, 0], sizes = [32, 1], strides = [1, 1]} : vector<256x1xf32> to vector<32x1xf32>
    %c0_1 = arith.constant 0 : index
    %c0_2 = arith.constant 0 : index
    %7 = vector.load %arg3[%c0_1, %c0_2] : memref<256x32xf32, #tpu.memory_space<vmem>>, vector<256x32xf32>
    %8 = vector.extract_strided_slice %7 {offsets = [0, 0], sizes = [96, 32], strides = [1, 1]} : vector<256x32xf32> to vector<96x32xf32>
    %9 = vector.extract_strided_slice %7 {offsets = [96, 0], sizes = [32, 32], strides = [1, 1]} : vector<256x32xf32> to vector<32x32xf32>
    %10 = vector.extract_strided_slice %7 {offsets = [128, 0], sizes = [96, 32], strides = [1, 1]} : vector<256x32xf32> to vector<96x32xf32>
    %11 = vector.extract_strided_slice %7 {offsets = [224, 0], sizes = [32, 32], strides = [1, 1]} : vector<256x32xf32> to vector<32x32xf32>
    %c0_3 = arith.constant 0 : index
    %c0_4 = arith.constant 0 : index
    %c0_5 = arith.constant 0 : index
    %12 = vector.load %arg1[%c0_3, %c0_4, %c0_5] : memref<4x32x256xf32, #tpu.memory_space<vmem>>, vector<1x32x256xf32>
    %13 = vector.shape_cast %12 : vector<1x32x256xf32> to vector<32x256xf32>
    %c1 = arith.constant 1 : index
    %c0_6 = arith.constant 0 : index
    %c0_7 = arith.constant 0 : index
    %14 = vector.load %arg1[%c1, %c0_6, %c0_7] : memref<4x32x256xf32, #tpu.memory_space<vmem>>, vector<1x32x256xf32>
    %15 = vector.shape_cast %14 : vector<1x32x256xf32> to vector<32x256xf32>
    %c2 = arith.constant 2 : index
    %c0_8 = arith.constant 0 : index
    %c0_9 = arith.constant 0 : index
    %16 = vector.load %arg1[%c2, %c0_8, %c0_9] : memref<4x32x256xf32, #tpu.memory_space<vmem>>, vector<1x32x256xf32>
    %17 = vector.shape_cast %16 : vector<1x32x256xf32> to vector<32x256xf32>
    %c3 = arith.constant 3 : index
    %c0_10 = arith.constant 0 : index
    %c0_11 = arith.constant 0 : index
    %18 = vector.load %arg1[%c3, %c0_10, %c0_11] : memref<4x32x256xf32, #tpu.memory_space<vmem>>, vector<1x32x256xf32>
    %19 = vector.shape_cast %18 : vector<1x32x256xf32> to vector<32x256xf32>
    %20 = tpu.concatenate %13, %15, %17, %19 in 1 : vector<32x256xf32>, vector<32x256xf32>, vector<32x256xf32>, vector<32x256xf32> -> vector<32x1024xf32>
    %cst = arith.constant dense<0.000000e+00> : vector<1024xf32>
    %21 = vector.multi_reduction <add>, %20, %cst [0] : vector<32x1024xf32> to vector<1024xf32>
    %22 = vector.shape_cast %21 : vector<1024xf32> to vector<1x1024xf32>
    %cst_12 = arith.constant 3.200000e+01 : f32
    %23 = vector.broadcast %cst_12 : f32 to vector<1x1024xf32>
    %24 = arith.divf %22, %23 : vector<1x1024xf32>
    %25 = vector.broadcast %24 : vector<1x1024xf32> to vector<32x1024xf32>
    %26 = arith.subf %20, %25 : vector<32x1024xf32>
    %27 = arith.mulf %26, %26 : vector<32x1024xf32>
    %cst_13 = arith.constant dense<0.000000e+00> : vector<1024xf32>
    %28 = vector.multi_reduction <add>, %27, %cst_13 [0] : vector<32x1024xf32> to vector<1024xf32>
    %29 = vector.shape_cast %28 : vector<1024xf32> to vector<1x1024xf32>
    %cst_14 = arith.constant 3.200000e+01 : f32
    %30 = vector.broadcast %cst_14 : f32 to vector<1x1024xf32>
    %31 = arith.divf %29, %30 : vector<1x1024xf32>
    %cst_15 = arith.constant 9.99999974E-6 : f32
    %32 = vector.broadcast %cst_15 : f32 to vector<1x1024xf32>
    %33 = arith.addf %31, %32 : vector<1x1024xf32>
    %34 = math.rsqrt %33 : vector<1x1024xf32>
    %35 = vector.broadcast %34 : vector<1x1024xf32> to vector<32x1024xf32>
    %36 = arith.mulf %26, %35 : vector<32x1024xf32>
    %37 = vector.broadcast %1 : vector<32x1xf32> to vector<32x1024xf32>
    %38 = arith.mulf %36, %37 : vector<32x1024xf32>
    %39 = vector.broadcast %2 : vector<32x1xf32> to vector<32x1024xf32>
    %40 = arith.addf %38, %39 : vector<32x1024xf32>
    %cst_16 = arith.constant dense<0.000000e+00> : vector<96x1024xf32>
    %41 = tpu.matmul %8, %40, %cst_16 {dimension_numbers = #tpu.dot_dimension_numbers<[1], [0], [0], [1], [0, 0, 1, 1], [], []>} : vector<96x32xf32>, vector<32x1024xf32>, vector<96x1024xf32> -> vector<96x1024xf32>
    %42 = vector.broadcast %3 : vector<96x1xf32> to vector<96x1024xf32>
    %43 = arith.addf %41, %42 : vector<96x1024xf32>
    %44 = tpu.iota {dimensions = array<i32: 1>} : vector<8x1024xi32>
    %c256_i32 = arith.constant 256 : i32
    %c0_i32 = arith.constant 0 : i32
    %45 = arith.cmpi eq, %c256_i32, %c0_i32 : i32
    %c1_i32 = arith.constant 1 : i32
    %46 = arith.select %45, %c1_i32, %c256_i32 : i32
    %47 = vector.broadcast %46 : i32 to vector<8x1024xi32>
    %48 = arith.remsi %44, %47 : vector<8x1024xi32>
    %c0_i32_17 = arith.constant 0 : i32
    %49 = vector.broadcast %c0_i32_17 : i32 to vector<8x1024xi32>
    %50 = arith.cmpi ne, %48, %49 : vector<8x1024xi32>
    %c0_i32_18 = arith.constant 0 : i32
    %51 = vector.broadcast %c0_i32_18 : i32 to vector<8x1024xi32>
    %52 = arith.cmpi slt, %48, %51 : vector<8x1024xi32>
    %c0_i32_19 = arith.constant 0 : i32
    %53 = arith.cmpi slt, %46, %c0_i32_19 : i32
    %54 = vector.broadcast %53 : i1 to vector<8x1024xi1>
    %55 = vector.broadcast %54 : vector<8x1024xi1> to vector<8x1024xi1>
    %56 = arith.xori %52, %55 : vector<8x1024xi1>
    %57 = arith.andi %56, %50 : vector<8x1024xi1>
    %58 = vector.broadcast %46 : i32 to vector<8x1024xi32>
    %59 = arith.addi %48, %58 : vector<8x1024xi32>
    %60 = arith.select %57, %59, %48 : vector<8x1024xi1>, vector<8x1024xi32>
    %c16_i32 = arith.constant 16 : i32
    %c0_i32_20 = arith.constant 0 : i32
    %61 = arith.cmpi eq, %c16_i32, %c0_i32_20 : i32
    %c1_i32_21 = arith.constant 1 : i32
    %62 = arith.select %61, %c1_i32_21, %c16_i32 : i32
    %63 = vector.broadcast %62 : i32 to vector<8x1024xi32>
    %64 = arith.remsi %44, %63 : vector<8x1024xi32>
    %c0_i32_22 = arith.constant 0 : i32
    %65 = vector.broadcast %c0_i32_22 : i32 to vector<8x1024xi32>
    %66 = arith.cmpi ne, %64, %65 : vector<8x1024xi32>
    %c0_i32_23 = arith.constant 0 : i32
    %67 = vector.broadcast %c0_i32_23 : i32 to vector<8x1024xi32>
    %68 = arith.cmpi slt, %64, %67 : vector<8x1024xi32>
    %c0_i32_24 = arith.constant 0 : i32
    %69 = arith.cmpi slt, %62, %c0_i32_24 : i32
    %70 = vector.broadcast %69 : i1 to vector<8x1024xi1>
    %71 = vector.broadcast %70 : vector<8x1024xi1> to vector<8x1024xi1>
    %72 = arith.xori %68, %71 : vector<8x1024xi1>
    %73 = arith.andi %72, %66 : vector<8x1024xi1>
    %74 = vector.broadcast %62 : i32 to vector<8x1024xi32>
    %75 = arith.addi %64, %74 : vector<8x1024xi32>
    %76 = arith.select %73, %75, %64 : vector<8x1024xi1>, vector<8x1024xi32>
    %c16_i32_25 = arith.constant 16 : i32
    %77 = vector.broadcast %c16_i32_25 : i32 to vector<8x1024xi32>
    %78 = arith.cmpi sge, %60, %77 : vector<8x1024xi32>
    %c240_i32 = arith.constant 240 : i32
    %79 = vector.broadcast %c240_i32 : i32 to vector<8x1024xi32>
    %80 = arith.cmpi slt, %60, %79 : vector<8x1024xi32>
    %c1_i32_26 = arith.constant 1 : i32
    %81 = vector.broadcast %c1_i32_26 : i32 to vector<8x1024xi32>
    %82 = arith.cmpi sge, %76, %81 : vector<8x1024xi32>
    %c15_i32 = arith.constant 15 : i32
    %83 = vector.broadcast %c15_i32 : i32 to vector<8x1024xi32>
    %84 = arith.cmpi slt, %76, %83 : vector<8x1024xi32>
    %85 = vector.extract_strided_slice %43 {offsets = [0, 0], sizes = [32, 1024], strides = [1, 1]} : vector<96x1024xf32> to vector<32x1024xf32>
    %86 = vector.extract_strided_slice %85 {offsets = [0, 0], sizes = [8, 1024], strides = [1, 1]} : vector<32x1024xf32> to vector<8x1024xf32>
    %c16_i32_27 = arith.constant 16 : i32
    %87 = tpu.dynamic_rotate %86 by %c16_i32_27 dim 1 : vector<8x1024xf32>, i32 -> vector<8x1024xf32>
    %88 = arith.select %78, %87, %86 : vector<8x1024xi1>, vector<8x1024xf32>
    %89 = vector.extract_strided_slice %85 {offsets = [8, 0], sizes = [8, 1024], strides = [1, 1]} : vector<32x1024xf32> to vector<8x1024xf32>
    %c1008_i32 = arith.constant 1008 : i32
    %90 = tpu.dynamic_rotate %89 by %c1008_i32 dim 1 : vector<8x1024xf32>, i32 -> vector<8x1024xf32>
    %91 = arith.select %80, %90, %89 : vector<8x1024xi1>, vector<8x1024xf32>
    %92 = vector.extract_strided_slice %85 {offsets = [16, 0], sizes = [8, 1024], strides = [1, 1]} : vector<32x1024xf32> to vector<8x1024xf32>
    %c1_i32_28 = arith.constant 1 : i32
    %93 = tpu.dynamic_rotate %92 by %c1_i32_28 dim 1 : vector<8x1024xf32>, i32 -> vector<8x1024xf32>
    %94 = arith.select %82, %93, %92 : vector<8x1024xi1>, vector<8x1024xf32>
    %95 = vector.extract_strided_slice %85 {offsets = [24, 0], sizes = [8, 1024], strides = [1, 1]} : vector<32x1024xf32> to vector<8x1024xf32>
    %c1023_i32 = arith.constant 1023 : i32
    %96 = tpu.dynamic_rotate %95 by %c1023_i32 dim 1 : vector<8x1024xf32>, i32 -> vector<8x1024xf32>
    %97 = arith.select %84, %96, %95 : vector<8x1024xi1>, vector<8x1024xf32>
    %98 = tpu.concatenate %88, %91, %94, %97 in 0 : vector<8x1024xf32>, vector<8x1024xf32>, vector<8x1024xf32>, vector<8x1024xf32> -> vector<32x1024xf32>
    %99 = vector.extract_strided_slice %43 {offsets = [32, 0], sizes = [32, 1024], strides = [1, 1]} : vector<96x1024xf32> to vector<32x1024xf32>
    %100 = vector.extract_strided_slice %99 {offsets = [0, 0], sizes = [8, 1024], strides = [1, 1]} : vector<32x1024xf32> to vector<8x1024xf32>
    %c1_i32_29 = arith.constant 1 : i32
    %101 = tpu.dynamic_rotate %100 by %c1_i32_29 dim 1 : vector<8x1024xf32>, i32 -> vector<8x1024xf32>
    %102 = arith.select %82, %101, %100 : vector<8x1024xi1>, vector<8x1024xf32>
    %103 = vector.extract_strided_slice %99 {offsets = [8, 0], sizes = [8, 1024], strides = [1, 1]} : vector<32x1024xf32> to vector<8x1024xf32>
    %c1023_i32_30 = arith.constant 1023 : i32
    %104 = tpu.dynamic_rotate %103 by %c1023_i32_30 dim 1 : vector<8x1024xf32>, i32 -> vector<8x1024xf32>
    %105 = arith.select %84, %104, %103 : vector<8x1024xi1>, vector<8x1024xf32>
    %106 = vector.extract_strided_slice %99 {offsets = [16, 0], sizes = [8, 1024], strides = [1, 1]} : vector<32x1024xf32> to vector<8x1024xf32>
    %c16_i32_31 = arith.constant 16 : i32
    %107 = tpu.dynamic_rotate %106 by %c16_i32_31 dim 1 : vector<8x1024xf32>, i32 -> vector<8x1024xf32>
    %108 = arith.select %78, %107, %106 : vector<8x1024xi1>, vector<8x1024xf32>
    %109 = vector.extract_strided_slice %99 {offsets = [24, 0], sizes = [8, 1024], strides = [1, 1]} : vector<32x1024xf32> to vector<8x1024xf32>
    %c1008_i32_32 = arith.constant 1008 : i32
    %110 = tpu.dynamic_rotate %109 by %c1008_i32_32 dim 1 : vector<8x1024xf32>, i32 -> vector<8x1024xf32>
    %111 = arith.select %80, %110, %109 : vector<8x1024xi1>, vector<8x1024xf32>
    %112 = tpu.concatenate %102, %105, %108, %111 in 0 : vector<8x1024xf32>, vector<8x1024xf32>, vector<8x1024xf32>, vector<8x1024xf32> -> vector<32x1024xf32>
    %113 = vector.extract_strided_slice %43 {offsets = [64, 0], sizes = [32, 1024], strides = [1, 1]} : vector<96x1024xf32> to vector<32x1024xf32>
    %114 = arith.addf %98, %112 : vector<32x1024xf32>
    %115 = arith.addf %114, %113 : vector<32x1024xf32>
    %116 = vector.extract_strided_slice %115 {offsets = [0, 0], sizes = [32, 256], strides = [1, 1]} : vector<32x1024xf32> to vector<32x256xf32>
    %cst_33 = arith.constant dense<0.000000e+00> : vector<32xf32>
    %117 = vector.multi_reduction <add>, %116, %cst_33 [1] : vector<32x256xf32> to vector<32xf32>
    %118 = vector.shape_cast %117 : vector<32xf32> to vector<32x1xf32>
    %119 = vector.extract_strided_slice %115 {offsets = [0, 256], sizes = [32, 256], strides = [1, 1]} : vector<32x1024xf32> to vector<32x256xf32>
    %cst_34 = arith.constant dense<0.000000e+00> : vector<32xf32>
    %120 = vector.multi_reduction <add>, %119, %cst_34 [1] : vector<32x256xf32> to vector<32xf32>
    %121 = vector.shape_cast %120 : vector<32xf32> to vector<32x1xf32>
    %122 = vector.extract_strided_slice %115 {offsets = [0, 512], sizes = [32, 256], strides = [1, 1]} : vector<32x1024xf32> to vector<32x256xf32>
    %cst_35 = arith.constant dense<0.000000e+00> : vector<32xf32>
    %123 = vector.multi_reduction <add>, %122, %cst_35 [1] : vector<32x256xf32> to vector<32xf32>
    %124 = vector.shape_cast %123 : vector<32xf32> to vector<32x1xf32>
    %125 = vector.extract_strided_slice %115 {offsets = [0, 768], sizes = [32, 256], strides = [1, 1]} : vector<32x1024xf32> to vector<32x256xf32>
    %cst_36 = arith.constant dense<0.000000e+00> : vector<32xf32>
    %126 = vector.multi_reduction <add>, %125, %cst_36 [1] : vector<32x256xf32> to vector<32xf32>
    %127 = vector.shape_cast %126 : vector<32xf32> to vector<32x1xf32>
    %128 = tpu.concatenate %118, %121, %124, %127 in 1 : vector<32x1xf32>, vector<32x1xf32>, vector<32x1xf32>, vector<32x1xf32> -> vector<32x4xf32>
    %cst_37 = arith.constant dense<0.000000e+00> : vector<32x4xf32>
    %129 = tpu.matmul %9, %128, %cst_37 {dimension_numbers = #tpu.dot_dimension_numbers<[1], [0], [0], [1], [0, 0, 1, 1], [], []>} : vector<32x32xf32>, vector<32x4xf32>, vector<32x4xf32> -> vector<32x4xf32>
    %130 = arith.mulf %129, %129 : vector<32x4xf32>
    %131 = arith.mulf %129, %130 : vector<32x4xf32>
    %cst_38 = arith.constant 4.471500e-02 : f32
    %132 = vector.broadcast %cst_38 : f32 to vector<32x4xf32>
    %133 = arith.mulf %132, %131 : vector<32x4xf32>
    %134 = arith.addf %129, %133 : vector<32x4xf32>
    %cst_39 = arith.constant 0.797884583 : f32
    %135 = vector.broadcast %cst_39 : f32 to vector<32x4xf32>
    %136 = arith.mulf %135, %134 : vector<32x4xf32>
    %137 = math.tanh %136 : vector<32x4xf32>
    %cst_40 = arith.constant 1.000000e+00 : f32
    %138 = vector.broadcast %cst_40 : f32 to vector<32x4xf32>
    %139 = arith.addf %138, %137 : vector<32x4xf32>
    %cst_41 = arith.constant 5.000000e-01 : f32
    %140 = vector.broadcast %cst_41 : f32 to vector<32x4xf32>
    %141 = arith.mulf %140, %139 : vector<32x4xf32>
    %142 = arith.mulf %129, %141 : vector<32x4xf32>
    %cst_42 = arith.constant dense<0.000000e+00> : vector<96x4xf32>
    %143 = tpu.matmul %10, %142, %cst_42 {dimension_numbers = #tpu.dot_dimension_numbers<[1], [0], [0], [1], [0, 0, 1, 1], [], []>} : vector<96x32xf32>, vector<32x4xf32>, vector<96x4xf32> -> vector<96x4xf32>
    %144 = vector.extract_strided_slice %143 {offsets = [0, 0], sizes = [32, 4], strides = [1, 1]} : vector<96x4xf32> to vector<32x4xf32>
    %145 = vector.extract_strided_slice %143 {offsets = [32, 0], sizes = [32, 4], strides = [1, 1]} : vector<96x4xf32> to vector<32x4xf32>
    %146 = vector.extract_strided_slice %143 {offsets = [64, 0], sizes = [32, 4], strides = [1, 1]} : vector<96x4xf32> to vector<32x4xf32>
    %147 = arith.maximumf %144, %145 : vector<32x4xf32>
    %148 = arith.maximumf %147, %146 : vector<32x4xf32>
    %149 = arith.subf %144, %148 : vector<32x4xf32>
    %150 = math.exp %149 : vector<32x4xf32>
    %151 = arith.subf %145, %148 : vector<32x4xf32>
    %152 = math.exp %151 : vector<32x4xf32>
    %153 = arith.subf %146, %148 : vector<32x4xf32>
    %154 = math.exp %153 : vector<32x4xf32>
    %155 = arith.addf %150, %152 : vector<32x4xf32>
    %156 = arith.addf %155, %154 : vector<32x4xf32>
    %cst_43 = arith.constant 1.000000e+00 : f32
    %157 = vector.broadcast %cst_43 : f32 to vector<32x4xf32>
    %158 = arith.divf %157, %156 : vector<32x4xf32>
    %159 = arith.mulf %150, %158 : vector<32x4xf32>
    %160 = arith.mulf %152, %158 : vector<32x4xf32>
    %161 = arith.mulf %154, %158 : vector<32x4xf32>
    %162 = vector.extract_strided_slice %159 {offsets = [0, 0], sizes = [32, 1], strides = [1, 1]} : vector<32x4xf32> to vector<32x1xf32>
    %163 = vector.extract_strided_slice %98 {offsets = [0, 0], sizes = [32, 256], strides = [1, 1]} : vector<32x1024xf32> to vector<32x256xf32>
    %164 = vector.broadcast %162 : vector<32x1xf32> to vector<32x256xf32>
    %165 = arith.mulf %164, %163 : vector<32x256xf32>
    %166 = vector.extract_strided_slice %160 {offsets = [0, 0], sizes = [32, 1], strides = [1, 1]} : vector<32x4xf32> to vector<32x1xf32>
    %167 = vector.extract_strided_slice %112 {offsets = [0, 0], sizes = [32, 256], strides = [1, 1]} : vector<32x1024xf32> to vector<32x256xf32>
    %168 = vector.broadcast %166 : vector<32x1xf32> to vector<32x256xf32>
    %169 = arith.mulf %168, %167 : vector<32x256xf32>
    %170 = arith.addf %165, %169 : vector<32x256xf32>
    %171 = vector.extract_strided_slice %161 {offsets = [0, 0], sizes = [32, 1], strides = [1, 1]} : vector<32x4xf32> to vector<32x1xf32>
    %172 = vector.extract_strided_slice %113 {offsets = [0, 0], sizes = [32, 256], strides = [1, 1]} : vector<32x1024xf32> to vector<32x256xf32>
    %173 = vector.broadcast %171 : vector<32x1xf32> to vector<32x256xf32>
    %174 = arith.mulf %173, %172 : vector<32x256xf32>
    %175 = arith.addf %170, %174 : vector<32x256xf32>
    %176 = vector.extract_strided_slice %159 {offsets = [0, 1], sizes = [32, 1], strides = [1, 1]} : vector<32x4xf32> to vector<32x1xf32>
    %177 = vector.extract_strided_slice %98 {offsets = [0, 256], sizes = [32, 256], strides = [1, 1]} : vector<32x1024xf32> to vector<32x256xf32>
    %178 = vector.broadcast %176 : vector<32x1xf32> to vector<32x256xf32>
    %179 = arith.mulf %178, %177 : vector<32x256xf32>
    %180 = vector.extract_strided_slice %160 {offsets = [0, 1], sizes = [32, 1], strides = [1, 1]} : vector<32x4xf32> to vector<32x1xf32>
    %181 = vector.extract_strided_slice %112 {offsets = [0, 256], sizes = [32, 256], strides = [1, 1]} : vector<32x1024xf32> to vector<32x256xf32>
    %182 = vector.broadcast %180 : vector<32x1xf32> to vector<32x256xf32>
    %183 = arith.mulf %182, %181 : vector<32x256xf32>
    %184 = arith.addf %179, %183 : vector<32x256xf32>
    %185 = vector.extract_strided_slice %161 {offsets = [0, 1], sizes = [32, 1], strides = [1, 1]} : vector<32x4xf32> to vector<32x1xf32>
    %186 = vector.extract_strided_slice %113 {offsets = [0, 256], sizes = [32, 256], strides = [1, 1]} : vector<32x1024xf32> to vector<32x256xf32>
    %187 = vector.broadcast %185 : vector<32x1xf32> to vector<32x256xf32>
    %188 = arith.mulf %187, %186 : vector<32x256xf32>
    %189 = arith.addf %184, %188 : vector<32x256xf32>
    %190 = vector.extract_strided_slice %159 {offsets = [0, 2], sizes = [32, 1], strides = [1, 1]} : vector<32x4xf32> to vector<32x1xf32>
    %191 = vector.extract_strided_slice %98 {offsets = [0, 512], sizes = [32, 256], strides = [1, 1]} : vector<32x1024xf32> to vector<32x256xf32>
    %192 = vector.broadcast %190 : vector<32x1xf32> to vector<32x256xf32>
    %193 = arith.mulf %192, %191 : vector<32x256xf32>
    %194 = vector.extract_strided_slice %160 {offsets = [0, 2], sizes = [32, 1], strides = [1, 1]} : vector<32x4xf32> to vector<32x1xf32>
    %195 = vector.extract_strided_slice %112 {offsets = [0, 512], sizes = [32, 256], strides = [1, 1]} : vector<32x1024xf32> to vector<32x256xf32>
    %196 = vector.broadcast %194 : vector<32x1xf32> to vector<32x256xf32>
    %197 = arith.mulf %196, %195 : vector<32x256xf32>
    %198 = arith.addf %193, %197 : vector<32x256xf32>
    %199 = vector.extract_strided_slice %161 {offsets = [0, 2], sizes = [32, 1], strides = [1, 1]} : vector<32x4xf32> to vector<32x1xf32>
    %200 = vector.extract_strided_slice %113 {offsets = [0, 512], sizes = [32, 256], strides = [1, 1]} : vector<32x1024xf32> to vector<32x256xf32>
    %201 = vector.broadcast %199 : vector<32x1xf32> to vector<32x256xf32>
    %202 = arith.mulf %201, %200 : vector<32x256xf32>
    %203 = arith.addf %198, %202 : vector<32x256xf32>
    %204 = vector.extract_strided_slice %159 {offsets = [0, 3], sizes = [32, 1], strides = [1, 1]} : vector<32x4xf32> to vector<32x1xf32>
    %205 = vector.extract_strided_slice %98 {offsets = [0, 768], sizes = [32, 256], strides = [1, 1]} : vector<32x1024xf32> to vector<32x256xf32>
    %206 = vector.broadcast %204 : vector<32x1xf32> to vector<32x256xf32>
    %207 = arith.mulf %206, %205 : vector<32x256xf32>
    %208 = vector.extract_strided_slice %160 {offsets = [0, 3], sizes = [32, 1], strides = [1, 1]} : vector<32x4xf32> to vector<32x1xf32>
    %209 = vector.extract_strided_slice %112 {offsets = [0, 768], sizes = [32, 256], strides = [1, 1]} : vector<32x1024xf32> to vector<32x256xf32>
    %210 = vector.broadcast %208 : vector<32x1xf32> to vector<32x256xf32>
    %211 = arith.mulf %210, %209 : vector<32x256xf32>
    %212 = arith.addf %207, %211 : vector<32x256xf32>
    %213 = vector.extract_strided_slice %161 {offsets = [0, 3], sizes = [32, 1], strides = [1, 1]} : vector<32x4xf32> to vector<32x1xf32>
    %214 = vector.extract_strided_slice %113 {offsets = [0, 768], sizes = [32, 256], strides = [1, 1]} : vector<32x1024xf32> to vector<32x256xf32>
    %215 = vector.broadcast %213 : vector<32x1xf32> to vector<32x256xf32>
    %216 = arith.mulf %215, %214 : vector<32x256xf32>
    %217 = arith.addf %212, %216 : vector<32x256xf32>
    %218 = tpu.concatenate %175, %189, %203, %217 in 1 : vector<32x256xf32>, vector<32x256xf32>, vector<32x256xf32>, vector<32x256xf32> -> vector<32x1024xf32>
    %cst_44 = arith.constant dense<0.000000e+00> : vector<32x1024xf32>
    %219 = tpu.matmul %11, %218, %cst_44 {dimension_numbers = #tpu.dot_dimension_numbers<[1], [0], [0], [1], [0, 0, 1, 1], [], []>} : vector<32x32xf32>, vector<32x1024xf32>, vector<32x1024xf32> -> vector<32x1024xf32>
    %220 = vector.broadcast %4 : vector<32x1xf32> to vector<32x1024xf32>
    %221 = arith.addf %219, %220 : vector<32x1024xf32>
    %222 = arith.addf %221, %20 : vector<32x1024xf32>
    %cst_45 = arith.constant dense<0.000000e+00> : vector<1024xf32>
    %223 = vector.multi_reduction <add>, %222, %cst_45 [0] : vector<32x1024xf32> to vector<1024xf32>
    %224 = vector.shape_cast %223 : vector<1024xf32> to vector<1x1024xf32>
    %cst_46 = arith.constant 3.200000e+01 : f32
    %225 = vector.broadcast %cst_46 : f32 to vector<1x1024xf32>
    %226 = arith.divf %224, %225 : vector<1x1024xf32>
    %227 = vector.broadcast %226 : vector<1x1024xf32> to vector<32x1024xf32>
    %228 = arith.subf %222, %227 : vector<32x1024xf32>
    %229 = arith.mulf %228, %228 : vector<32x1024xf32>
    %cst_47 = arith.constant dense<0.000000e+00> : vector<1024xf32>
    %230 = vector.multi_reduction <add>, %229, %cst_47 [0] : vector<32x1024xf32> to vector<1024xf32>
    %231 = vector.shape_cast %230 : vector<1024xf32> to vector<1x1024xf32>
    %cst_48 = arith.constant 3.200000e+01 : f32
    %232 = vector.broadcast %cst_48 : f32 to vector<1x1024xf32>
    %233 = arith.divf %231, %232 : vector<1x1024xf32>
    %cst_49 = arith.constant 9.99999974E-6 : f32
    %234 = vector.broadcast %cst_49 : f32 to vector<1x1024xf32>
    %235 = arith.addf %233, %234 : vector<1x1024xf32>
    %236 = math.rsqrt %235 : vector<1x1024xf32>
    %237 = vector.broadcast %236 : vector<1x1024xf32> to vector<32x1024xf32>
    %238 = arith.mulf %228, %237 : vector<32x1024xf32>
    %239 = vector.broadcast %5 : vector<32x1xf32> to vector<32x1024xf32>
    %240 = arith.mulf %238, %239 : vector<32x1024xf32>
    %241 = vector.broadcast %6 : vector<32x1xf32> to vector<32x1024xf32>
    %242 = arith.addf %240, %241 : vector<32x1024xf32>
    %243 = vector.extract_strided_slice %242 {offsets = [0, 0], sizes = [32, 256], strides = [1, 1]} : vector<32x1024xf32> to vector<32x256xf32>
    %c0_50 = arith.constant 0 : index
    %c0_51 = arith.constant 0 : index
    %c0_52 = arith.constant 0 : index
    %244 = vector.load %arg4[%c0_50, %c0_51, %c0_52] : memref<4x32x256xf32, #tpu.memory_space<vmem>>, vector<1x32x256xf32>
    %245 = vector.shape_cast %244 : vector<1x32x256xf32> to vector<32x256xf32>
    %246 = vector.shape_cast %243 : vector<32x256xf32> to vector<1x32x256xf32>
    tpu.vector_store %arg4[%c0_50, %c0_51, %c0_52], %246 {strides = array<i32>} : memref<4x32x256xf32, #tpu.memory_space<vmem>>, vector<1x32x256xf32>,
    %247 = vector.extract_strided_slice %242 {offsets = [0, 256], sizes = [32, 256], strides = [1, 1]} : vector<32x1024xf32> to vector<32x256xf32>
    %c1_53 = arith.constant 1 : index
    %c0_54 = arith.constant 0 : index
    %c0_55 = arith.constant 0 : index
    %248 = vector.load %arg4[%c1_53, %c0_54, %c0_55] : memref<4x32x256xf32, #tpu.memory_space<vmem>>, vector<1x32x256xf32>
    %249 = vector.shape_cast %248 : vector<1x32x256xf32> to vector<32x256xf32>
    %250 = vector.shape_cast %247 : vector<32x256xf32> to vector<1x32x256xf32>
    tpu.vector_store %arg4[%c1_53, %c0_54, %c0_55], %250 {strides = array<i32>} : memref<4x32x256xf32, #tpu.memory_space<vmem>>, vector<1x32x256xf32>,
    %251 = vector.extract_strided_slice %242 {offsets = [0, 512], sizes = [32, 256], strides = [1, 1]} : vector<32x1024xf32> to vector<32x256xf32>
    %c2_56 = arith.constant 2 : index
    %c0_57 = arith.constant 0 : index
    %c0_58 = arith.constant 0 : index
    %252 = vector.load %arg4[%c2_56, %c0_57, %c0_58] : memref<4x32x256xf32, #tpu.memory_space<vmem>>, vector<1x32x256xf32>
    %253 = vector.shape_cast %252 : vector<1x32x256xf32> to vector<32x256xf32>
    %254 = vector.shape_cast %251 : vector<32x256xf32> to vector<1x32x256xf32>
    tpu.vector_store %arg4[%c2_56, %c0_57, %c0_58], %254 {strides = array<i32>} : memref<4x32x256xf32, #tpu.memory_space<vmem>>, vector<1x32x256xf32>,
    %255 = vector.extract_strided_slice %242 {offsets = [0, 768], sizes = [32, 256], strides = [1, 1]} : vector<32x1024xf32> to vector<32x256xf32>
    %c3_59 = arith.constant 3 : index
    %c0_60 = arith.constant 0 : index
    %c0_61 = arith.constant 0 : index
    %256 = vector.load %arg4[%c3_59, %c0_60, %c0_61] : memref<4x32x256xf32, #tpu.memory_space<vmem>>, vector<1x32x256xf32>
    %257 = vector.shape_cast %256 : vector<1x32x256xf32> to vector<32x256xf32>
    %258 = vector.shape_cast %255 : vector<32x256xf32> to vector<1x32x256xf32>
    tpu.vector_store %arg4[%c3_59, %c0_60, %c0_61], %258 {strides = array<i32>} : memref<4x32x256xf32, #tpu.memory_space<vmem>>, vector<1x32x256xf32>,
    return
  }
  func.func @transform_0(%arg0: i32) -> (i32, i32, i32) {
    %c0_i32 = arith.constant 0 : i32
    %c0_i32_0 = arith.constant 0 : i32
    %c0_i32_1 = arith.constant 0 : i32
    return %arg0, %c0_i32, %c0_i32_0 : i32, i32, i32
  }
  func.func @transform_1(%arg0: i32) -> (i32, i32) {
    %c0_i32 = arith.constant 0 : i32
    %c0_i32_0 = arith.constant 0 : i32
    %c0_i32_1 = arith.constant 0 : i32
    return %c0_i32, %c0_i32_0 : i32, i32
  }
  func.func @transform_2(%arg0: i32) -> (i32, i32) {
    %c0_i32 = arith.constant 0 : i32
    %c0_i32_0 = arith.constant 0 : i32
    %c0_i32_1 = arith.constant 0 : i32
    return %c0_i32, %c0_i32_0 : i32, i32
  }
  func.func @transform_3(%arg0: i32) -> (i32, i32, i32) {
    %c0_i32 = arith.constant 0 : i32
    %c0_i32_0 = arith.constant 0 : i32
    %c0_i32_1 = arith.constant 0 : i32
    return %arg0, %c0_i32, %c0_i32_0 : i32, i32, i32
  }
}

</mosaic_0001>

<bundles_post_ra>
// kernel: s2block_forward.1
= control target key start
LH: loop header
LB: loop body
LE: loop exit
PB: predicated region body
PF: predicated region fallthrough
CT: control target
= control target key end

     0   :  { %s4020_s12 = smov 0   ;;  %s6992_s0 = inlined_call_operand.vmem [shape: f32[8,32,256], index: 0, kind: input, shape index: {}]   ;;  %s6993_s1 = inlined_call_operand.vmem [shape: f32[256,1], index: 1, kind: input, shape index: {}]   ;;  %s6994_s2 = inlined_call_operand.vmem [shape: f32[256,32], index: 2, kind: input, shape index: {}]   ;;  %s6995_s3 = inlined_call_operand.vmem [shape: f32[8,32,256], index: 3, kind: output, shape index: {}]  }
   0x1 LB: > { %s3539_s13 = sadd.s32 4294967295, %s3989_s12   ;;  %p3543_p0 = scmp.ge.s32.totalorder %s3989_s12, 1  ;;  %s3989_s12 = sphi %s4020_s12, %s13_s12  }
   0x2   : > { %p139_p1 = scmp.lt.s32.totalorder %s3989_s12, 3 }
   0x4   : > { %p140_p2 = pnand %p3543_p0, %p139_p1 }
   0x6   : > { %143 = sbr.rel (%p140_p2) target bundleno = 1857 (0x741), region = 32 }
   0xd   : > { %v183_v0 = vld [vmem:[%s6993_s1 + $0x20] sm:$0xff]  ;;  %s3544_s18 = sshll.u32 %s3539_s13, 2  ;;  %v6996_v2 = vmov 0   ;;  %v184_v3 = vld [vmem:[%s6993_s1 + $0x28] sm:$0xff]  ;;  %v182_v5 = vld [vmem:[%s6993_s1 + $0x18] sm:$0xff]  ;;  %v6998_v31 = vmov 0.0  }
   0xe   : > { %v179_v1 = vld [vmem:[%s6993_s1] sm:$0xff]  ;;  %3848 = vset.pattern.permute.xlu1 %v6996_v2  ;;  %3847 = vset.pattern.permute.xlu0 %v6996_v2  ;;  %p166_p3 = scmp.lt.s32.totalorder %s3544_s18, 7  ;;  %v180_v4 = vld [vmem:[%s6993_s1 + $0x8] sm:$0xff]  ;;  %v181_v6 = vld [vmem:[%s6993_s1 + $0x10] sm:$0xff]  ;;  %vm7096_vm0 = vcmask 261120   ;;  %s3993_s10 = smov 16  }
   0xf   : > { %605 = vperm.xlu1 %3848, %v183_v0   ;;  %553 = vperm.xlu0 %3847, %v179_v1   ;;  %v186_v9 = vld [vmem:[%s6993_s1 + $0x38] sm:$0xff]  ;;  %v185_v10 = vld [vmem:[%s6993_s1 + $0x30] sm:$0xff]  ;;  %v188_v15 = vld [vmem:[%s6993_s1 + $0x48] sm:$0xff]  ;;  %s3994_s11 = smov 112   ;;  %s3995_s13 = smov 1  }
  0x10   : > { %s7484_s18 = smov (!%p166_p3, %s3544_s18), 7  ;;  %v187_v16 = vld [vmem:[%s6993_s1 + $0x40] sm:$0xff]  ;;  %v192_v20 = vld [vmem:[%s6993_s1 + $0x68] sm:$0xff]  ;;  %v190_v28 = vld [vmem:[%s6993_s1 + $0x58] sm:$0xff]  ;;  %816 = vmatprep.mubr.f32.mxu0 %v6998_v31  ;;  %876 = vmatprep.mubr.f32.mxu1 %v6998_v31  ;;  %s3996_s14 = smov 127  }
  0x11   : > { %s3680_s23 = sshll.u32 %s7484_s18, 6  ;;  %v191_v22 = vld [vmem:[%s6993_s1 + $0x60] sm:$0xff]  ;;  %v189_v32 = vld [vmem:[%s6993_s1 + $0x50] sm:$0xff]  ;;  %v194_v46 = vld [vmem:[%s6993_s1 + $0x78] sm:$0xff] }
  0x12   : > { %s4056_s30 = scalar_lea.vmem %s6992_s0, %s3680_s23  ;;  %v193_v50 = vld [vmem:[%s6993_s1 + $0x70] sm:$0xff]  ;;  %v196_v1 = vld [vmem:[%s6993_s1 + $0x88] sm:$0xff] }
  0x13   : > { %610 = vperm.xlu1 %3848, %v184_v3   ;;  %558 = vperm.xlu0 %3847, %v180_v4   ;;  %v4059_v7 = vld [vmem:[%s4056_s30 + $0x8] sm:$0xff]  ;;  %v4062_v8 = vld [vmem:[%s4056_s30 + $0x18] sm:$0xff]  ;;  %v4073_v12 = vld [vmem:[%s4056_s30] sm:$0xff] }
  0x14   : > { %v287_v11 = vadd.f32 %v4062_v8, %v4059_v7  ;;  %v4076_v13 = vld [vmem:[%s4056_s30 + $0x10] sm:$0xff]  ;;  %v4079_v14 = vld [vmem:[%s4056_s30 + $0x28] sm:$0xff]  ;;  %v4091_v19 = vld [vmem:[%s4056_s30 + $0x20] sm:$0xff] }
  0x15   : > { %v278_v17 = vadd.f32 %v4076_v13, %v4073_v12  ;;  %v4097_v21 = vld [vmem:[%s4056_s30 + $0x38] sm:$0xff]  ;;  %v4103_v23 = vld [vmem:[%s4056_s30 + $0x48] sm:$0xff]  ;;  %v4120_v30 = vld [vmem:[%s4056_s30 + $0x30] sm:$0xff] }
  0x16   : > { %v288_v18 = vadd.f32 %v287_v11, %v4079_v14  ;;  %v4106_v24 = vld [vmem:[%s4056_s30 + $0x58] sm:$0xff]  ;;  %v4110_v26 = vld [vmem:[%s4056_s30 + $0x88] sm:$0xff]  ;;  %v4130_v34 = vld [vmem:[%s4056_s30 + $0x40] sm:$0xff] }
  0x17   : > { %568 = vperm.xlu1 %3848, %v182_v5   ;;  %563 = vperm.xlu0 %3847, %v181_v6   ;;  %v279_v25 = vadd.f32 %v278_v17, %v4091_v19  ;;  %v4113_v27 = vld [vmem:[%s4056_s30 + $0x98] sm:$0xff]  ;;  %v305_v33 = vadd.f32 %v4106_v24, %v4103_v23  ;;  %v4133_v35 = vld [vmem:[%s4056_s30 + $0x50] sm:$0xff]  ;;  %v4136_v36 = vld [vmem:[%s4056_s30 + $0x68] sm:$0xff] }
  0x18   : > { %v289_v29 = vadd.f32 %v288_v18, %v4097_v21  ;;  %v323_v37 = vadd.f32 %v4113_v27, %v4110_v26  ;;  %v4141_v38 = vld [vmem:[%s4056_s30 + $0x80] sm:$0xff]  ;;  %v4144_v39 = vld [vmem:[%s4056_s30 + $0x90] sm:$0xff]  ;;  %v4148_v41 = vld [vmem:[%s4056_s30 + $0xa8] sm:$0xff]  ;;  %v296_v43 = vadd.f32 %v4133_v35, %v4130_v34 }
  0x19   : > { %v280_v40 = vadd.f32 %v279_v25, %v4120_v30  ;;  %v4153_v44 = vld [vmem:[%s4056_s30 + $0xc8] sm:$0xff]  ;;  %v4156_v45 = vld [vmem:[%s4056_s30 + $0xd8] sm:$0xff]  ;;  %v306_v47 = vadd.f32 %v4136_v36, %v305_v33  ;;  %v4163_v48 = vld [vmem:[%s4056_s30 + $0x60] sm:$0xff]  ;;  %v314_v49 = vadd.f32 %v4144_v39, %v4141_v38 }
  0x1a   : > { %v290_v42 = vrot.slane %v289_v29, 4  ;;  %v4171_v51 = vld [vmem:[%s4056_s30 + $0x78] sm:$0xff]  ;;  %v324_v52 = vadd.f32 %v4148_v41, %v323_v37  ;;  %v4175_v53 = vld [vmem:[%s4056_s30 + $0xa0] sm:$0xff]  ;;  %v341_v56 = vadd.f32 %v4156_v45, %v4153_v44  ;;  %v297_v58 = vadd.f32 %v4163_v48, %v296_v43  ;;  %v4184_v59 = vld [vmem:[%s4056_s30 + $0xe8] sm:$0xff] }
  0x1b   : > { %620 = vperm.xlu1 %3848, %v186_v9   ;;  %615 = vperm.xlu0 %3847, %v185_v10   ;;  %v281_v54 = vrot.slane %v280_v40, 4  ;;  %v4178_v55 = vld [vmem:[%s4056_s30 + $0xb8] sm:$0xff]  ;;  %v4187_v60 = vld [vmem:[%s4056_s30 + $0xc0] sm:$0xff]  ;;  %v4190_v61 = vld [vmem:[%s4056_s30 + $0xd0] sm:$0xff]  ;;  %v307_v62 = vadd.f32 %v4171_v51, %v306_v47  ;;  %v315_v0 = vadd.f32 %v4175_v53, %v314_v49 }
  0x1c   : > { %v291_v57 = vadd.f32 %v290_v42, %v289_v29  ;;  %v4194_v63 = vld [vmem:[%s4056_s30 + $0x70] sm:$0xff]  ;;  %v195_v3 = vld [vmem:[%s6993_s1 + $0x80] sm:$0xff]  ;;  %v325_v4 = vadd.f32 %v4178_v55, %v324_v52  ;;  %v342_v9 = vadd.f32 %v4184_v59, %v341_v56  ;;  %v332_v10 = vadd.f32 %v4190_v61, %v4187_v60 }
  0x1d   : > { %v4205_v5 = vld [vmem:[%s4056_s30 + $0xb0] sm:$0xff]  ;;  %v282_v6 = vadd.f32 %v281_v54, %v280_v40  ;;  %v4215_v17 = vld [vmem:[%s4056_s30 + $0xe0] sm:$0xff]  ;;  %v308_v18 = vrot.slane %v307_v62, 4 }
  0x1e   : > { %v292_v11 = vrot.slane %v291_v57, 2  ;;  %v197_v25 = vld [vmem:[%s6993_s1 + $0x90] sm:$0xff]  ;;  %v333_v33 = vadd.f32 %v4215_v17, %v332_v10 }
  0x1f   : > { %662 = vperm.xlu1 %3848, %v188_v15   ;;  %657 = vperm.xlu0 %3847, %v187_v16   ;;  %v298_v15 = vadd.f32 %v4194_v63, %v297_v58  ;;  %v4212_v16 = vld [vmem:[%s4056_s30 + $0xf8] sm:$0xff]  ;;  %v283_v29 = vrot.slane %v282_v6, 2  ;;  %v4227_v42 = vld [vmem:[%s4056_s30 + $0xf0] sm:$0xff]  ;;  %v309_v43 = vadd.f32 %v308_v18, %v307_v62 }
  0x20   : > { %v293_v37 = vadd.f32 %v292_v11, %v291_v57  ;;  %v334_v52 = vadd.f32 %v4227_v42, %v333_v33 }
  0x21   : > { %v299_v40 = vrot.slane %v298_v15, 4  ;;  %v284_v49 = vadd.f32 %v283_v29, %v282_v6  ;;  %v310_v58 = vrot.slane %v309_v43, 2 }
  0x22   : > { %v294_v54 = vrot.slane %v293_v37, 1  ;;  %v335_v57 = vrot.slane %v334_v52, 4 }
  0x23   : > { %682 = vperm.xlu1 %3848, %v192_v20   ;;  %677 = vperm.xlu0 %3847, %v191_v22   ;;  %v316_v20 = vadd.f32 %v4205_v5, %v315_v0  ;;  %v198_v22 = vld [vmem:[%s6993_s1 + $0x98] sm:$0xff]  ;;  %v300_v56 = vadd.f32 %v299_v40, %v298_v15  ;;  %v311_v2 = vadd.f32 %v310_v58, %v309_v43 }
  0x24   : > { %v295_v10 = vadd.f32 %v294_v54, %v293_v37 }
  0x25   : > { %v301_v11 = vrot.slane %v300_v56, 2  ;;  %v312_v29 = vrot.slane %v311_v2, 1 }
  0x26   : > { %v352_v6 = vmul.f32 0.03125, %v295_v10 }
  0x27   : > { %672 = vperm.xlu1 %3848, %v190_v28   ;;  %667 = vperm.xlu0 %3847, %v189_v32   ;;  %v326_v28 = vrot.slane %v325_v4, 4  ;;  %v343_v32 = vadd.f32 %v4212_v16, %v342_v9  ;;  %v313_v43 = vadd.f32 %v312_v29, %v311_v2 }
  0x28   : > { %v4243_v58 = vsub.f32 %v4079_v14, %v352_v6 }
  0x29   : > { %v327_v47 = vadd.f32 %v326_v28, %v325_v4  ;;  %v336_v4 = vadd.f32 %v335_v57, %v334_v52  ;;  %v302_v28 = vadd.f32 %v301_v11, %v300_v56 }
  0x2b   : > { %692 = vperm.xlu1 %3848, %v194_v46   ;;  %687 = vperm.xlu0 %3847, %v193_v50   ;;  %v317_v46 = vrot.slane %v316_v20, 4  ;;  %v344_v50 = vrot.slane %v343_v32, 4  ;;  %v303_v37 = vrot.slane %v302_v28, 1 }
  0x2d   : > { %v318_v0 = vadd.f32 %v317_v46, %v316_v20  ;;  %v345_v9 = vadd.f32 %v344_v50, %v343_v32  ;;  %v337_v20 = vrot.slane %v336_v4, 2  ;;  %v4231_v46 = vsub.f32 %v4059_v7, %v352_v6 }
  0x2e   : > { %v4234_v32 = vsub.f32 %v4062_v8, %v352_v6  ;;  %v304_v2 = vadd.f32 %v303_v37, %v302_v28 }
  0x2f   : > { %702 = vperm.xlu1 %3848, %v196_v1   ;;  %697 = vperm.xlu0 %3847, %v195_v3   ;;  %v328_v1 = vrot.slane %v327_v47, 2  ;;  %v285_v3 = vrot.slane %v284_v49, 1  ;;  %v346_v18 = vrot.slane %v345_v9, 2  ;;  %v338_v56 = vadd.f32 %v337_v20, %v336_v4 }
  0x30   : > { %v392_v7 = vmul.f32 %v4231_v46, %v4231_v46  ;;  %v400_v8 = vmul.f32 %v4234_v32, %v4234_v32 }
  0x31   : > { %v286_v62 = vadd.f32 %v285_v3, %v284_v49  ;;  %v347_v40 = vadd.f32 %v346_v18, %v345_v9  ;;  %v339_v10 = vrot.slane %v338_v56, 1 }
  0x32   : > { %v432_v11 = vadd.f32 %v400_v8, %v392_v7 }
  0x33   : > { %712 = vperm.xlu1 %3848, %v198_v22   ;;  %707 = vperm.xlu0 %3847, %v197_v25   ;;  %v319_v22 = vrot.slane %v318_v0, 2  ;;  %v329_v25 = vadd.f32 %v328_v1, %v327_v47  ;;  %v351_v15 = vmul.f32 0.03125, %v286_v62  ;;  %v348_v54 = vrot.slane %v347_v40, 1 }
  0x34   : > { %v340_v62 = vadd.f32 %v339_v10, %v338_v56 }
  0x35   : > { %v320_v33 = vadd.f32 %v319_v22, %v318_v0  ;;  %v330_v31 = vrot.slane %v329_v25, 1  ;;  %v4237_v50 = vsub.f32 %v4073_v12, %v351_v15  ;;  %v4240_v52 = vsub.f32 %v4076_v13, %v351_v15 }
  0x36   : > { %v354_v12 = vmul.f32 0.03125, %v313_v43  ;;  %v4253_v13 = vsub.f32 %v4091_v19, %v351_v15  ;;  %v4256_v1 = vsub.f32 %v4120_v30, %v351_v15  ;;  %v349_v57 = vadd.f32 %v348_v54, %v347_v40 }
  0x37   : > { %v321_v47 = vrot.slane %v320_v33, 1  ;;  %v331_v49 = vadd.f32 %v330_v31, %v329_v25  ;;  %v4250_v31 = vsub.f32 %v4097_v21, %v352_v6  ;;  %v391_v3 = vmul.f32 %v4237_v50, %v4237_v50 }
  0x38   : > { %v399_v9 = vmul.f32 %v4240_v52, %v4240_v52  ;;  %v408_v21 = vmul.f32 %v4243_v58, %v4243_v58  ;;  %v353_v22 = vmul.f32 0.03125, %v304_v2  ;;  %v4267_v30 = vsub.f32 %v4103_v23, %v354_v12 }
  0x39   : > { %v322_v0 = vadd.f32 %v321_v47, %v320_v33  ;;  %v356_v14 = vmul.f32 0.03125, %v331_v49  ;;  %v416_v19 = vmul.f32 %v4250_v31, %v4250_v31  ;;  %v407_v18 = vmul.f32 %v4253_v13, %v4253_v13 }
  0x3a   : > { %v4272_v4 = vsub.f32 %v4106_v24, %v354_v12  ;;  %v415_v29 = vmul.f32 %v4256_v1, %v4256_v1  ;;  %v423_v33 = vadd.f32 %v399_v9, %v391_v3  ;;  %v4283_v23 = vsub.f32 %v4136_v36, %v354_v12 }
  0x3b   : > { %v355_v25 = vmul.f32 0.03125, %v322_v0  ;;  %v4275_v6 = vsub.f32 %v4110_v26, %v356_v14  ;;  %v4278_v28 = vsub.f32 %v4113_v27, %v356_v14  ;;  %v358_v15 = vmul.f32 0.03125, %v349_v57 }
  0x3c   : > { %v433_v40 = vadd.f32 %v432_v11, %v408_v21  ;;  %v4286_v20 = vsub.f32 %v4171_v51, %v354_v12  ;;  %v4289_v24 = vsub.f32 %v4130_v34, %v353_v22  ;;  %v4292_v26 = vsub.f32 %v4133_v35, %v353_v22 }
  0x3d   : > { %v394_v27 = vmul.f32 %v4267_v30, %v4267_v30  ;;  %v4297_v37 = vsub.f32 %v4141_v38, %v355_v25  ;;  %v4300_v36 = vsub.f32 %v4144_v39, %v355_v25  ;;  %v357_v43 = vmul.f32 0.03125, %v340_v62 }
  0x3e   : > { %v402_v51 = vmul.f32 %v4272_v4, %v4272_v4  ;;  %v4305_v47 = vsub.f32 %v4148_v41, %v356_v14  ;;  %v396_v34 = vmul.f32 %v4275_v6, %v4275_v6  ;;  %v404_v35 = vmul.f32 %v4278_v28, %v4278_v28 }
  0x3f   : > { %v424_v49 = vadd.f32 %v423_v33, %v407_v18  ;;  %v410_v38 = vmul.f32 %v4283_v23, %v4283_v23  ;;  %v4314_v39 = vsub.f32 %v4153_v44, %v358_v15  ;;  %v4317_v54 = vsub.f32 %v4156_v45, %v358_v15 }
  0x40   : > { %v4320_v56 = vsub.f32 %v4163_v48, %v353_v22  ;;  %v393_v41 = vmul.f32 %v4289_v24, %v4289_v24  ;;  %v401_v7 = vmul.f32 %v4292_v26, %v4292_v26  ;;  %v4327_v8 = vsub.f32 %v4175_v53, %v355_v25 }
  0x41   : > { %v395_v2 = vmul.f32 %v4297_v37, %v4297_v37  ;;  %v403_v44 = vmul.f32 %v4300_v36, %v4300_v36  ;;  %v4334_v45 = vsub.f32 %v4187_v60, %v357_v43  ;;  %v4337_v48 = vsub.f32 %v4190_v61, %v357_v43 }
  0x42   : > { %v450_v12 = vadd.f32 %v402_v51, %v394_v27  ;;  %v4340_v0 = vsub.f32 %v4178_v55, %v356_v14  ;;  %v412_v53 = vmul.f32 %v4305_v47, %v4305_v47  ;;  %v468_v3 = vadd.f32 %v404_v35, %v396_v34 }
  0x43   : > { %v4345_v9 = vsub.f32 %v4194_v63, %v353_v22  ;;  %v4348_v57 = vsub.f32 %v4184_v59, %v358_v15  ;;  %v398_v60 = vmul.f32 %v4314_v39, %v4314_v39  ;;  %v406_v61 = vmul.f32 %v4317_v54, %v4317_v54 }
  0x44   : > { %v409_v55 = vmul.f32 %v4320_v56, %v4320_v56  ;;  %v441_v14 = vadd.f32 %v401_v7, %v393_v41  ;;  %v4357_v10 = vsub.f32 %v4205_v5, %v355_v25  ;;  %v411_v63 = vmul.f32 %v4327_v8, %v4327_v8 }
  0x45   : > { %v459_v21 = vadd.f32 %v403_v44, %v395_v2  ;;  %v4362_v59 = vsub.f32 %v4215_v17, %v357_v43  ;;  %v397_v11 = vmul.f32 %v4334_v45, %v4334_v45  ;;  %v405_v22 = vmul.f32 %v4337_v48, %v4337_v48 }
  0x46   : > { %v434_v62 = vadd.f32 %v433_v40, %v416_v19  ;;  %v418_v18 = vmul.f32 %v4286_v20, %v4286_v20  ;;  %v451_v33 = vadd.f32 %v450_v12, %v410_v38  ;;  %v420_v5 = vmul.f32 %v4340_v0, %v4340_v0 }
  0x47   : > { %7117 = vst [vmem:[#allocation2_spill] sm:$0xff] %v4362_v59  ;;  %v469_v25 = vadd.f32 %v468_v3, %v412_v53  ;;  %v4373_v27 = vsub.f32 %v4212_v16, %v358_v15  ;;  %v414_v17 = vmul.f32 %v4348_v57, %v4348_v57  ;;  %v486_v51 = vadd.f32 %v406_v61, %v398_v60 }
  0x48   : > { %v425_v34 = vadd.f32 %v424_v49, %v415_v29  ;;  %v417_v35 = vmul.f32 %v4345_v9, %v4345_v9  ;;  %v442_v19 = vadd.f32 %v441_v14, %v409_v55  ;;  %v419_v40 = vmul.f32 %v4357_v10, %v4357_v10 }
  0x49   : > { %v460_v38 = vadd.f32 %v459_v21, %v411_v63  ;;  %v4382_v41 = vsub.f32 %v4227_v42, %v357_v43  ;;  %v413_v16 = vmul.f32 %v4362_v59, %v4362_v59  ;;  %v477_v15 = vadd.f32 %v405_v22, %v397_v11 }
  0x4a   : > { %v452_v7 = vadd.f32 %v451_v33, %v418_v18  ;;  %v470_v2 = vadd.f32 %v469_v25, %v420_v5  ;;  %v422_v29 = vmul.f32 %v4373_v27, %v4373_v27  ;;  %v487_v49 = vadd.f32 %v486_v51, %v414_v17 }
  0x4b   : > { %7118 = vst [vmem:[#allocation3_spill] sm:$0xff] %v4382_v41  ;;  %v435_v44 = vrot.slane %v434_v62, 4  ;;  %v443_v12 = vadd.f32 %v442_v19, %v417_v35  ;;  %v426_v53 = vrot.slane %v425_v34, 4  ;;  %v461_v3 = vadd.f32 %v460_v38, %v419_v40 }
  0x4c   : > { %v421_v60 = vmul.f32 %v4382_v41, %v4382_v41  ;;  %v478_v61 = vadd.f32 %v477_v15, %v413_v16  ;;  %v453_v42 = vrot.slane %v452_v7, 4  ;;  %v471_v43 = vrot.slane %v470_v2, 4 }
  0x4d   : > { %v488_v55 = vadd.f32 %v487_v49, %v422_v29  ;;  %v436_v14 = vadd.f32 %v435_v44, %v434_v62  ;;  %v444_v63 = vrot.slane %v443_v12, 4  ;;  %v427_v21 = vadd.f32 %v426_v53, %v425_v34 }
  0x4e   : > { %v462_v11 = vrot.slane %v461_v3, 4  ;;  %v479_v22 = vadd.f32 %v478_v61, %v421_v60  ;;  %v454_v18 = vadd.f32 %v453_v42, %v452_v7  ;;  %v472_v33 = vadd.f32 %v471_v43, %v470_v2 }
  0x4f   : > { %v489_v5 = vrot.slane %v488_v55, 4  ;;  %v437_v25 = vrot.slane %v436_v14, 2  ;;  %v445_v17 = vadd.f32 %v444_v63, %v443_v12  ;;  %v428_v51 = vrot.slane %v427_v21, 2 }
  0x50   : > { %v463_v35 = vadd.f32 %v462_v11, %v461_v3  ;;  %v480_v19 = vrot.slane %v479_v22, 4  ;;  %v455_v40 = vrot.slane %v454_v18, 2  ;;  %v473_v38 = vrot.slane %v472_v33, 2 }
  0x51   : > { %v490_v41 = vadd.f32 %v489_v5, %v488_v55  ;;  %v438_v16 = vadd.f32 %v437_v25, %v436_v14  ;;  %v446_v15 = vrot.slane %v445_v17, 2  ;;  %v429_v59 = vadd.f32 %v428_v51, %v427_v21 }
  0x52   : > { %v464_v29 = vrot.slane %v463_v35, 2  ;;  %v481_v62 = vadd.f32 %v480_v19, %v479_v22  ;;  %v456_v49 = vadd.f32 %v455_v40, %v454_v18  ;;  %v474_v34 = vadd.f32 %v473_v38, %v472_v33 }
  0x53   : > { %v491_v44 = vrot.slane %v490_v41, 2  ;;  %v439_v53 = vrot.slane %v438_v16, 1  ;;  %v447_v7 = vadd.f32 %v446_v15, %v445_v17  ;;  %v430_v2 = vrot.slane %v429_v59, 1 }
  0x54   : > { %v465_v60 = vadd.f32 %v464_v29, %v463_v35  ;;  %v482_v61 = vrot.slane %v481_v62, 2  ;;  %v457_v12 = vrot.slane %v456_v49, 1  ;;  %v475_v42 = vrot.slane %v474_v34, 1 }
  0x55   : > { %v492_v3 = vadd.f32 %v491_v44, %v490_v41  ;;  %v440_v43 = vadd.f32 %v439_v53, %v438_v16  ;;  %v448_v63 = vrot.slane %v447_v7, 1  ;;  %v431_v11 = vadd.f32 %v430_v2, %v429_v59 }
  0x56   : > { %v466_v55 = vrot.slane %v465_v60, 1  ;;  %v483_v14 = vadd.f32 %v482_v61, %v481_v62  ;;  %v458_v5 = vadd.f32 %v457_v12, %v456_v49  ;;  %v476_v21 = vadd.f32 %v475_v42, %v474_v34 }
  0x57   : > { %v493_v25 = vrot.slane %v492_v3, 1  ;;  %v496_v22 = vmul.f32 0.03125, %v440_v43  ;;  %v449_v18 = vadd.f32 %v448_v63, %v447_v7  ;;  %v495_v33 = vmul.f32 0.03125, %v431_v11 }
  0x58   : > { %v467_v51 = vadd.f32 %v466_v55, %v465_v60  ;;  %v484_v19 = vrot.slane %v483_v14, 1  ;;  %v498_v17 = vmul.f32 0.03125, %v458_v5  ;;  %v500_v40 = vmul.f32 0.03125, %v476_v21 }
  0x59   : > { %v494_v35 = vadd.f32 %v493_v25, %v492_v3  ;;  %v504_v38 = vadd.f32 1e-05, %v496_v22  ;;  %v497_v15 = vmul.f32 0.03125, %v449_v18  ;;  %v503_v29 = vadd.f32 1e-05, %v495_v33 }
  0x5a   : > { %v499_v41 = vmul.f32 0.03125, %v467_v51  ;;  %v485_v16 = vadd.f32 %v484_v19, %v483_v14  ;;  %v506_v44 = vadd.f32 1e-05, %v498_v17  ;;  %v508_v59 = vadd.f32 1e-05, %v500_v40 }
  0x5b   : > { %v502_v53 = vmul.f32 0.03125, %v494_v35  ;;  %3879 = vrsqrt.f32 %v504_v38  ;;  %v505_v62 = vadd.f32 1e-05, %v497_v15 }
  0x5c   : > { %3881 = vrsqrt.f32 %v503_v29  ;;  %v507_v49 = vadd.f32 1e-05, %v499_v41  ;;  %v501_v34 = vmul.f32 0.03125, %v485_v16 }
  0x5d   : > { %3883 = vrsqrt.f32 %v506_v44  ;;  %v510_v7 = vadd.f32 1e-05, %v502_v53 }
  0x5e   : > { %3885 = vrsqrt.f32 %v508_v59  ;;  %v509_v2 = vadd.f32 1e-05, %v501_v34 }
  0x5f   : > { %3887 = vrsqrt.f32 %v505_v62 }
  0x60   : > { %3889 = vrsqrt.f32 %v507_v49 }
  0x61   : > { %3891 = vrsqrt.f32 %v510_v7 }
  0x62   : > { %3893 = vrsqrt.f32 %v509_v2 }
  0x65   : > { %v3880_v60 = vpop.eup %3879 }
  0x66   : > { %v3882_v61 = vpop.eup %3881  ;;  %v520_v3 = vmul.f32 %v3880_v60, %v4231_v46  ;;  %v528_v43 = vmul.f32 %v3880_v60, %v4234_v32  ;;  %v536_v14 = vmul.f32 %v3880_v60, %v4243_v58  ;;  %v544_v5 = vmul.f32 %v3880_v60, %v4250_v31 }
  0x67   : > { %v3884_v12 = vpop.eup %3883  ;;  %v519_v11 = vmul.f32 %v3882_v61, %v4237_v50  ;;  %v527_v55 = vmul.f32 %v3882_v61, %v4240_v52  ;;  %v535_v25 = vmul.f32 %v3882_v61, %v4253_v13  ;;  %v543_v22 = vmul.f32 %v3882_v61, %v4256_v1 }
  0x68   : > { %v3886_v42 = vpop.eup %3885  ;;  %v522_v18 = vmul.f32 %v3884_v12, %v4267_v30  ;;  %v530_v46 = vmul.f32 %v3884_v12, %v4272_v4  ;;  %v4407_v58 = vmul.f32 %v3884_v12, %v4283_v23  ;;  %v4410_v31 = vmul.f32 %v3884_v12, %v4286_v20 }
  0x69   : > { %v3888_v63 = vpop.eup %3887  ;;  %v524_v50 = vmul.f32 %v3886_v42, %v4275_v6  ;;  %v532_v52 = vmul.f32 %v3886_v42, %v4278_v28  ;;  %v4415_v4 = vmul.f32 %v3886_v42, %v4305_v47  ;;  %v4418_v51 = vmul.f32 %v3886_v42, %v4340_v0 }
  0x6a   : > { %v3890_v21 = vpop.eup %3889  ;;  %v521_v1 = vmul.f32 %v3888_v63, %v4289_v24  ;;  %v529_v30 = vmul.f32 %v3888_v63, %v4292_v26  ;;  %v4423_v23 = vmul.f32 %v3888_v63, %v4320_v56  ;;  %v4426_v20 = vmul.f32 %v3888_v63, %v4345_v9 }
  0x6b   : > { %v3892_v13 = vpop.eup %3891  ;;  %v523_v6 = vmul.f32 %v3890_v21, %v4297_v37  ;;  %v531_v28 = vmul.f32 %v3890_v21, %v4300_v36  ;;  %v4433_v47 = vmul.f32 %v3890_v21, %v4327_v8  ;;  %v4436_v0 = vmul.f32 %v3890_v21, %v4357_v10 }
  0x6c   : > { %v4428_v19 = vpop.eup %3893  ;;  %v526_v9 = vmul.f32 %v3892_v13, %v4314_v39  ;;  %v534_v17 = vmul.f32 %v3892_v13, %v4317_v54  ;;  %v4446_v40 = vmul.f32 %v3892_v13, %v4348_v57  ;;  %v4462_v54 = vmul.f32 %v3892_v13, %v4373_v27 }
  0x6d   : > { %v4455_v29 = vmul.f32 %v4428_v19, %v4334_v45  ;;  %v4459_v39 = vmul.f32 %v4428_v19, %v4337_v48 }
  0x8e   : > { %v4400_v33 = vpop.permute.xlu1 %605  ;;  %v4402_v32 = vpop.permute.xlu0 %553 }
  0x8f   : > { %v572_v24 = vmul.f32 %v4402_v32, %v520_v3  ;;  %v571_v26 = vmul.f32 %v4402_v32, %v519_v11  ;;  %v574_v56 = vmul.f32 %v4402_v32, %v522_v18  ;;  %v576_v10 = vmul.f32 %v4402_v32, %v524_v50 }
  0x90   : > { %v573_v38 = vmul.f32 %v4402_v32, %v521_v1  ;;  %v575_v15 = vmul.f32 %v4402_v32, %v523_v6  ;;  %v4476_v27 = vmul.f32 %v4402_v32, %v526_v9 }
  0x91   : > { %v624_v57 = vadd.f32 %v4400_v33, %v572_v24  ;;  %v623_v16 = vadd.f32 %v4400_v33, %v571_v26  ;;  %v626_v48 = vadd.f32 %v4400_v33, %v574_v56  ;;  %v628_v7 = vadd.f32 %v4400_v33, %v576_v10 }
  0x92   : > { %v4438_v37 = vpop.permute.xlu1 %610  ;;  %v4440_v36 = vpop.permute.xlu0 %558  ;;  %v625_v2 = vadd.f32 %v4400_v33, %v573_v38  ;;  %v627_v42 = vadd.f32 %v4400_v33, %v575_v15 }
  0x93   : > { %v580_v35 = vmul.f32 %v4440_v36, %v528_v43  ;;  %v579_v8 = vmul.f32 %v4440_v36, %v527_v55  ;;  %v582_v45 = vmul.f32 %v4440_v36, %v530_v46  ;;  %v584_v62 = vmul.f32 %v4440_v36, %v532_v52 }
  0x94   : > { %v581_v61 = vmul.f32 %v4440_v36, %v529_v30  ;;  %v583_v12 = vmul.f32 %v4440_v36, %v531_v28  ;;  %v586_v18 = vmul.f32 %v4440_v36, %v534_v17 }
  0x95   : > { %v632_v41 = vadd.f32 %v4438_v37, %v580_v35  ;;  %v631_v44 = vadd.f32 %v4438_v37, %v579_v8  ;;  %v636_v21 = vadd.f32 %v4438_v37, %v584_v62  ;;  %v7119_v62 = vld [vmem:[#allocation2_spill] sm:$0xff] }
  0x96   : > { %v4468_v59 = vpop.permute.xlu1 %568  ;;  %v4470_v53 = vpop.permute.xlu0 %563  ;;  %v633_v50 = vadd.f32 %v4438_v37, %v581_v61  ;;  %v635_v52 = vadd.f32 %v4438_v37, %v583_v12  ;;  %v7121_v12 = vmov 0.0  }
  0x97   : > { %v3746_v49 = vpack.c.bf16 %v632_v41, %v624_v57  ;;  %v3748_v34 = vpack.c.bf16 %v631_v44, %v623_v16  ;;  %v588_v60 = vmul.f32 %v4470_v53, %v536_v14  ;;  %v596_v3 = vmul.f32 %v4468_v59, %v544_v5 }
  0x98   : > { %v587_v43 = vmul.f32 %v4470_v53, %v535_v25  ;;  %v595_v63 = vmul.f32 %v4468_v59, %v543_v22  ;;  %v634_v14 = vadd.f32 %v4438_v37, %v582_v45  ;;  %v590_v13 = vmul.f32 %v4470_v53, %v4407_v58 }
  0x99   : > { %3747 = vmatprep.subr.bf16.mxu0 %v3746_v49  ;;  %3826 = vmatprep.subr.bf16.mxu1 %v3746_v49  ;;  %v598_v1 = vmul.f32 %v4468_v59, %v4410_v31  ;;  %v592_v28 = vmul.f32 %v4470_v53, %v4415_v4  ;;  %v600_v24 = vmul.f32 %v4468_v59, %v4418_v51  ;;  %v4517_v4 = vld [vmem:[%s6994_s2] sm:$0xff]  ;;  %v4522_v51 = vld [vmem:[%s6994_s2 + $0x50] sm:$0xff] }
  0x9a   : > { %v4487_v11 = vpop.permute.xlu1 %620  ;;  %v4489_v55 = vpop.permute.xlu0 %615  ;;  %3749 = vmatpush1.bf16.msra.mxu0 %v3748_v34  ;;  %3828 = vmatpush1.bf16.msra.mxu1 %v3748_v34  ;;  %v3754_v26 = vpack.c.bf16 %v634_v14, %v626_v48  ;;  %v3762_v56 = vpack.c.bf16 %v636_v21, %v628_v7  ;;  %v589_v35 = vmul.f32 %v4470_v53, %v4423_v23  ;;  %v7120_v34 = vld [vmem:[#allocation3_spill] sm:$0xff] }
  0x9b   : > { %v640_v46 = vadd.f32 %v4489_v55, %v588_v60  ;;  %v648_v5 = vadd.f32 %v4487_v11, %v596_v3  ;;  %v639_v25 = vadd.f32 %v4489_v55, %v587_v43  ;;  %v647_v22 = vadd.f32 %v4487_v11, %v595_v63 }
  0x9c   : > { %v642_v9 = vadd.f32 %v4489_v55, %v590_v13  ;;  %v650_v17 = vadd.f32 %v4487_v11, %v598_v1  ;;  %v644_v58 = vadd.f32 %v4489_v55, %v592_v28  ;;  %v652_v31 = vadd.f32 %v4487_v11, %v600_v24 }
  0x9d   : > { %v3750_v30 = vpack.c.bf16 %v648_v5, %v640_v46  ;;  %v3752_v6 = vpack.c.bf16 %v647_v22, %v639_v25  ;;  %v597_v8 = vmul.f32 %v4468_v59, %v4426_v20  ;;  %v591_v10 = vmul.f32 %v4470_v53, %v4433_v47  ;;  %v218_v46 = vld [vmem:[%s6994_s2 + $0x38] sm:$0xff]  ;;  %v219_v5 = vld [vmem:[%s6994_s2 + $0x40] sm:$0xff]  ;;  %v220_v25 = vld [vmem:[%s6994_s2 + $0x48] sm:$0xff] }
  0x9e   : > { %v599_v23 = vmul.f32 %v4468_v59, %v4436_v0  ;;  %v3756_v38 = vpack.c.bf16 %v633_v50, %v625_v2  ;;  %v3764_v15 = vpack.c.bf16 %v635_v52, %v627_v42  ;;  %v585_v57 = vmul.f32 %v4440_v36, %v4459_v39  ;;  %v4544_v36 = vld [vmem:[%s6994_s2 + $0x8] sm:$0xff]  ;;  %v4549_v39 = vld [vmem:[%s6994_s2 + $0x58] sm:$0xff]  ;;  %v4719_v22 = vpop.permute.xlu0 %657  ;;  %v4721_v50 = vpop.permute.xlu1 %662 }
  0x9f   : > { %3751 = vmatprep.subr.bf16.mxu0 %v3750_v30  ;;  %3827 = vmatprep.subr.bf16.mxu1 %v3750_v30  ;;  %v641_v41 = vadd.f32 %v4489_v55, %v589_v35  ;;  %v649_v16 = vadd.f32 %v4487_v11, %v597_v8  ;;  %v643_v44 = vadd.f32 %v4489_v55, %v591_v10 }
  0xa0   : > { %3753 = vmatpush1.bf16.msra.mxu0 %v3752_v6  ;;  %3829 = vmatpush1.bf16.msra.mxu1 %v3752_v6  ;;  %v651_v20 = vadd.f32 %v4487_v11, %v599_v23  ;;  %v3758_v47 = vpack.c.bf16 %v650_v17, %v642_v9  ;;  %v3766_v0 = vpack.c.bf16 %v652_v31, %v644_v58 }
  0xa1   : > { %3755 = vmatprep.subr.bf16.mxu1 %v3754_v26  ;;  %3763 = vmatprep.subr.bf16.mxu0 %v3762_v56  ;;  %v638_v45 = vadd.f32 %v4438_v37, %v586_v18  ;;  %v577_v48 = vmul.f32 %v4402_v32, %v4455_v29  ;;  %v541_v49 = vmul.f32 %v4428_v19, %v7119_v62  ;;  %v217_v18 = vld [vmem:[%s6994_s2 + $0x30] sm:$0xff] }
  0xa2   : > { %v549_v7 = vmul.f32 %v4428_v19, %v7120_v34  ;;  %v630_v2 = vadd.f32 %v4400_v33, %v4476_v27  ;;  %v594_v60 = vmul.f32 %v4470_v53, %v4446_v40  ;;  %v602_v61 = vmul.f32 %v4468_v59, %v4462_v54  ;;  %v4575_v54 = vld [vmem:[%s6994_s2 + $0x10] sm:$0xff]  ;;  %v4723_v52 = vpop.permute.xlu0 %677  ;;  %v4741_v31 = vpop.permute.xlu1 %682 }
  0xa3   : > { %3574 = vmatmul.mubr.msk.f32.vlgmr.msra.gmra.mrb[0].mxu0 %vm7096_vm0, %v4517_v4  ;;  %3584 = vmatmul.mubr.msk.f32.vlgmr.msra.gmra.mrb[0].mxu1 %vm7096_vm0, %v4522_v51  ;;  %v3760_v32 = vpack.c.bf16 %v649_v16, %v641_v41  ;;  %v3768_v29 = vpack.c.bf16 %v651_v20, %v643_v44  ;;  %v637_v42 = vadd.f32 %v4438_v37, %v585_v57 }
  0xa4   : > { %3757 = vmatpush1.bf16.msra.mxu1 %v3756_v38  ;;  %3765 = vmatpush1.bf16.msra.mxu0 %v3764_v15  ;;  %v3770_v19 = vpack.c.bf16 %v638_v45, %v630_v2  ;;  %v646_v40 = vadd.f32 %v4489_v55, %v594_v60  ;;  %v654_v27 = vadd.f32 %v4487_v11, %v602_v61 }
  0xa5   : > { %3759 = vmatprep.subr.bf16.mxu1 %v3758_v47  ;;  %3767 = vmatprep.subr.bf16.mxu0 %v3766_v0  ;;  %v629_v37 = vadd.f32 %v4400_v33, %v577_v48  ;;  %v593_v3 = vmul.f32 %v4470_v53, %v541_v49  ;;  %v601_v43 = vmul.f32 %v4468_v59, %v549_v7  ;;  %v4592_v59 = vld [vmem:[%s6994_s2 + $0x18] sm:$0xff] }
  0xa6   : > { %822 = vmatprep.mubr.f32.mxu0 %v7121_v12  ;;  %882 = vmatprep.mubr.f32.mxu1 %v7121_v12  ;;  %v3774_v33 = vpack.c.bf16 %v654_v27, %v646_v40  ;;  %v4743_v35 = vpop.permute.xlu0 %667  ;;  %v4760_v47 = vpop.permute.xlu1 %672 }
  0xa7   : > { %3575 = vmatmul.mubr.msk.f32.gmra.mrb[2].mxu0 %vm7096_vm0, %v4544_v36  ;;  %3585 = vmatmul.mubr.msk.f32.gmra.mrb[2].mxu1 %vm7096_vm0, %v4549_v39  ;;  %v3772_v63 = vpack.c.bf16 %v637_v42, %v629_v37  ;;  %v645_v14 = vadd.f32 %v4489_v55, %v593_v3  ;;  %v653_v21 = vadd.f32 %v4487_v11, %v601_v43  ;;  %v4603_v11 = vld [vmem:[%s6994_s2 + $0x20] sm:$0xff]  ;;  %v216_v55 = vld [vmem:[%s6994_s2 + $0x28] sm:$0xff] }
  0xa8   : > { %3761 = vmatpush1.bf16.msra.mxu1 %v3760_v32  ;;  %3769 = vmatpush1.bf16.msra.mxu0 %v3768_v29 }
  0xa9   : > { %3771 = vmatprep.subr.bf16.mxu1 %v3770_v19  ;;  %828 = vmatprep.mubr.f32.mxu0 %v7121_v12  ;;  %v3776_v53 = vpack.c.bf16 %v653_v21, %v645_v14 }
  0xaa   : > { %953 = vmatprep.mubr.f32.mxu1 %v7121_v12 }
  0xab   : > { %3576 = vmatmul.mubr.msk.f32.gmra.mrb[4].mxu0 %vm7096_vm0, %v4575_v54  ;;  %3586 = vmatmul.mubr.msk.f32.vlgmr.msra.gmra.mrb[4].mxu1 %vm7096_vm0, %v4517_v4 }
  0xac   : > { %3773 = vmatpush1.bf16.msra.mxu1 %v3772_v63  ;;  %834 = vmatprep.mubr.f32.mxu0 %v7121_v12 }
  0xad   : > { %3775 = vmatprep.subr.bf16.mxu1 %v3774_v33  ;;  %959 = vmatprep.mubr.f32.mxu1 %v7121_v12 }
  0xaf   : > { %3577 = vmatmul.mubr.msk.f32.gmra.mrb[6].mxu0 %vm7096_vm0, %v4592_v59  ;;  %3587 = vmatmul.mubr.msk.f32.gmra.mrb[6].mxu1 %vm7096_vm0, %v4544_v36 }
  0xb0   : > { %3777 = vmatpush1.bf16.msra.mxu1 %v3776_v53  ;;  %840 = vmatprep.mubr.f32.mxu0 %v7121_v12 }
  0xb1   : > { %965 = vmatprep.mubr.f32.mxu1 %v7121_v12 }
  0xb3   : > { %3578 = vmatmul.mubr.msk.f32.gmra.mrb[8].mxu0 %vm7096_vm0, %v4603_v11  ;;  %3588 = vmatmul.mubr.msk.f32.gmra.mrb[8].mxu1 %vm7096_vm0, %v4575_v54 }
  0xb4   : > { %846 = vmatprep.mubr.f32.mxu0 %v7121_v12  ;;  %971 = vmatprep.mubr.f32.mxu1 %v7121_v12 }
  0xb7   : > { %3579 = vmatmul.mubr.msk.f32.gmra.mrb[10].mxu0 %vm7096_vm0, %v216_v55  ;;  %3589 = vmatmul.mubr.msk.f32.gmra.mrb[10].mxu1 %vm7096_vm0, %v4592_v59 }
  0xb8   : > { %852 = vmatprep.mubr.f32.mxu0 %v7121_v12  ;;  %977 = vmatprep.mubr.f32.mxu1 %v7121_v12 }
  0xbb   : > { %3580 = vmatmul.mubr.msk.f32.gmra.mrb[12].mxu0 %vm7096_vm0, %v217_v18  ;;  %3590 = vmatmul.mubr.msk.f32.gmra.mrb[12].mxu1 %vm7096_vm0, %v4603_v11 }
  0xbc   : > { %858 = vmatprep.mubr.f32.mxu0 %v7121_v12  ;;  %983 = vmatprep.mubr.f32.mxu1 %v7121_v12 }
  0xbf   : > { %3581 = vmatmul.mubr.msk.f32.gmra.mrb[14].mxu0 %vm7096_vm0, %v218_v46  ;;  %3591 = vmatmul.mubr.msk.f32.gmra.mrb[14].mxu1 %vm7096_vm0, %v216_v55 }
  0xc0   : > { %864 = vmatprep.mubr.f32.mxu0 %v7121_v12  ;;  %989 = vmatprep.mubr.f32.mxu1 %v7121_v12 }
  0xc3   : > { %3582 = vmatmul.mubr.msk.f32.gmra.mrb[16].mxu0 %vm7096_vm0, %v219_v5  ;;  %3592 = vmatmul.mubr.msk.f32.gmra.mrb[16].mxu1 %vm7096_vm0, %v217_v18 }
  0xc4   : > { %870 = vmatprep.mubr.f32.mxu0 %v7121_v12  ;;  %995 = vmatprep.mubr.f32.mxu1 %v7121_v12 }
  0xc7   : > { %3583 = vmatmul.mubr.msk.f32.gmra.mrb[18].mxu0 %vm7096_vm0, %v220_v25  ;;  %3593 = vmatmul.mubr.msk.f32.gmra.mrb[18].mxu1 %vm7096_vm0, %v218_v46 }
  0xc8   : > { %1001 = vmatprep.mubr.f32.mxu1 %v7121_v12  ;;  %1090 = vmatprep.mubr.f32.mxu0 %v7121_v12 }
  0xcb   : > { %3594 = vmatmul.mubr.msk.f32.gmra.mrb[20].mxu1 %vm7096_vm0, %v219_v5  ;;  %3598 = vmatmul.mubr.msk.f32.vlgmr.msra.gmra.mrb[20].mxu0 %vm7096_vm0, %v4517_v4 }
  0xcc   : > { %1007 = vmatprep.mubr.f32.mxu1 %v7121_v12  ;;  %1096 = vmatprep.mubr.f32.mxu0 %v7121_v12 }
  0xcf   : > { %3595 = vmatmul.mubr.msk.f32.gmra.mrb[22].mxu1 %vm7096_vm0, %v220_v25  ;;  %3599 = vmatmul.mubr.msk.f32.gmra.mrb[22].mxu0 %vm7096_vm0, %v4544_v36 }
  0xd0   : > { %1013 = vmatprep.mubr.f32.mxu1 %v7121_v12  ;;  %1102 = vmatprep.mubr.f32.mxu0 %v7121_v12 }
  0xd3   : > { %3596 = vmatmul.mubr.msk.f32.gmra.mrb[24].mxu1 %vm7096_vm0, %v4522_v51  ;;  %3600 = vmatmul.mubr.msk.f32.gmra.mrb[24].mxu0 %vm7096_vm0, %v4575_v54 }
  0xd4   : > { %1019 = vmatprep.mubr.f32.mxu1 %v7121_v12  ;;  %1108 = vmatprep.mubr.f32.mxu0 %v7121_v12 }
  0xd7   : > { %3597 = vmatmul.mubr.msk.f32.gmra.mrb[26].mxu1 %vm7096_vm0, %v4549_v39  ;;  %3601 = vmatmul.mubr.msk.f32.gmra.mrb[26].mxu0 %vm7096_vm0, %v4592_v59 }
  0xd8   : > { %1114 = vmatprep.mubr.f32.mxu0 %v7121_v12  ;;  %1227 = vmatprep.mubr.f32.mxu1 %v7121_v12 }
  0xdb   : > { %3602 = vmatmul.mubr.msk.f32.gmra.mrb[28].mxu0 %vm7096_vm0, %v4603_v11  ;;  %3610 = vmatmul.mubr.msk.f32.vlgmr.msra.gmra.mrb[28].mxu1 %vm7096_vm0, %v4517_v4 }
  0xdc   : > { %1120 = vmatprep.mubr.f32.mxu0 %v7121_v12  ;;  %1233 = vmatprep.mubr.f32.mxu1 %v7121_v12 }
  0xdf   : > { %3603 = vmatmul.mubr.msk.f32.gmra.mrb[30].mxu0 %vm7096_vm0, %v216_v55  ;;  %3611 = vmatmul.mubr.msk.f32.gmra.mrb[30].mxu1 %vm7096_vm0, %v4544_v36 }
  0xe0   : > { %1126 = vmatprep.mubr.f32.mxu0 %v7121_v12  ;;  %1239 = vmatprep.mubr.f32.mxu1 %v7121_v12 }
  0xe3   : > { %3604 = vmatmul.mubr.msk.f32.gmra.mrb[32].mxu0 %vm7096_vm0, %v217_v18  ;;  %3612 = vmatmul.mubr.msk.f32.gmra.mrb[32].mxu1 %vm7096_vm0, %v4575_v54 }
  0xe4   : > { %1132 = vmatprep.mubr.f32.mxu0 %v7121_v12  ;;  %1245 = vmatprep.mubr.f32.mxu1 %v7121_v12 }
  0xe7   : > { %3605 = vmatmul.mubr.msk.f32.gmra.mrb[34].mxu0 %vm7096_vm0, %v218_v46  ;;  %3613 = vmatmul.mubr.msk.f32.gmra.mrb[34].mxu1 %vm7096_vm0, %v4592_v59 }
  0xe8   : > { %1138 = vmatprep.mubr.f32.mxu0 %v7121_v12  ;;  %1251 = vmatprep.mubr.f32.mxu1 %v7121_v12 }
  0xeb   : > { %3606 = vmatmul.mubr.msk.f32.gmra.mrb[36].mxu0 %vm7096_vm0, %v219_v5  ;;  %3614 = vmatmul.mubr.msk.f32.gmra.mrb[36].mxu1 %vm7096_vm0, %v4603_v11 }
  0xec   : > { %1144 = vmatprep.mubr.f32.mxu0 %v7121_v12  ;;  %1257 = vmatprep.mubr.f32.mxu1 %v7121_v12 }
  0xef   : > { %3607 = vmatmul.mubr.msk.f32.gmra.mrb[38].mxu0 %vm7096_vm0, %v220_v25  ;;  %3615 = vmatmul.mubr.msk.f32.gmra.mrb[38].mxu1 %vm7096_vm0, %v216_v55 }
  0xf0   : > { %1150 = vmatprep.mubr.f32.mxu0 %v7121_v12  ;;  %1263 = vmatprep.mubr.f32.mxu1 %v7121_v12 }
  0xf3   : > { %3608 = vmatmul.mubr.msk.f32.gmra.mrb[40].mxu0 %vm7096_vm0, %v4522_v51  ;;  %3616 = vmatmul.mubr.msk.f32.gmra.mrb[40].mxu1 %vm7096_vm0, %v217_v18 }
  0xf4   : > { %1156 = vmatprep.mubr.f32.mxu0 %v7121_v12  ;;  %1269 = vmatprep.mubr.f32.mxu1 %v7121_v12 }
  0xf7   : > { %3609 = vmatmul.mubr.msk.f32.gmra.mrb[42].mxu0 %vm7096_vm0, %v4549_v39  ;;  %3617 = vmatmul.mubr.msk.f32.gmra.mrb[42].mxu1 %vm7096_vm0, %v218_v46 }
  0xf8   : > { %1275 = vmatprep.mubr.f32.mxu1 %v7121_v12 }
  0xfb   : > { %3618 = vmatmul.mubr.msk.f32.gmra.mrb[44].mxu1 %vm7096_vm0, %v219_v5 }
  0xfc   : > { %1281 = vmatprep.mubr.f32.mxu1 %v7121_v12 }
  0xff   : > { %3619 = vmatmul.mubr.msk.f32.gmra.mrb[46].mxu1 %vm7096_vm0, %v220_v25 }
 0x100   : > { %1287 = vmatprep.mubr.f32.mxu1 %v7121_v12 }
 0x103   : > { %3620 = vmatmul.mubr.msk.f32.gmra.mrb[48].mxu1 %vm7096_vm0, %v4522_v51 }
 0x104   : > { %1293 = vmatprep.mubr.f32.mxu1 %v7121_v12 }
 0x107   : > { %3621 = vmatmul.mubr.msk.f32.gmra.mrb[50].mxu1 %vm7096_vm0, %v4549_v39 }
 0x176   : > { %v818_v13 = vpop.f32.mrb[0].mxu0  ;;  %v4725_v1 = vpop.f32.mrb[0].mxu1 }
 0x177   : > { %7122 = vst [vmem:[#allocation2_spill] sm:$0xff] %v4725_v1  ;;  %v4728_v30 = vadd.f32 %v818_v13, %v4719_v22  ;;  %v820_v6 = vpop.f32.mrb[1].mxu0  ;;  %v4730_v28 = vpop.f32.mrb[1].mxu1 }
 0x178   : > { %7124 = vst [vmem:[#allocation4_spill] sm:$0xff] %v4730_v28  ;;  %v821_v24 = vadd.f32 %v820_v6, %v4719_v22 }
 0x179   : > { %7123 = vst [vmem:[#allocation3_spill] sm:$0xff] %v4728_v30  ;;  %1533 = vrot.lane.b32.xlu0 %v4728_v30, %s3993_s10 }
 0x17a   : > { %v824_v26 = vpop.f32.mrb[2].mxu0  ;;  %v4735_v56 = vpop.f32.mrb[2].mxu1  ;;  %1535 = vrot.lane.b32.xlu1 %v821_v24, %s3993_s10 }
 0x17b   : > { %v825_v9 = vadd.f32 %v824_v26, %v4721_v50  ;;  %v826_v17 = vpop.f32.mrb[3].mxu0  ;;  %v4739_v58 = vpop.f32.mrb[3].mxu1 }
 0x17c   : > { %v4747_v8 = vadd.f32 %v826_v17, %v4721_v50  ;;  %v4836_v24 = vpop.permute.xlu0 %687 }
 0x17d   : > { %1566 = vrot.lane.b32.xlu0 %v825_v9, %s3994_s11 }
 0x17e   : > { %v830_v4 = vpop.f32.mrb[4].mxu0  ;;  %v955_v51 = vpop.f32.mrb[4].mxu1 }
 0x17f   : > { %v832_v10 = vpop.f32.mrb[5].mxu0  ;;  %v957_v23 = vpop.f32.mrb[5].mxu1  ;;  %v4757_v41 = vadd.f32 %v955_v51, %v4719_v22  ;;  %v4766_v36 = vadd.f32 %v830_v4, %v4743_v35 }
 0x180   : > { %v4750_v38 = vadd.f32 %v832_v10, %v4743_v35  ;;  %v958_v7 = vadd.f32 %v957_v23, %v4719_v22 }
 0x181   : > { %1568 = vrot.lane.b32.xlu0 %v4747_v8, %s3994_s11  ;;  %7126 = vst [vmem:[#allocation6_spill] sm:$0xff] %v4766_v36 }
 0x182   : > { %7125 = vst [vmem:[#allocation5_spill] sm:$0xff] %v4750_v38  ;;  %v836_v15 = vpop.f32.mrb[6].mxu0  ;;  %v961_v57 = vpop.f32.mrb[6].mxu1  ;;  %1601 = vrot.lane.b32.xlu1 %v4750_v38, %s3995_s13 }
 0x183   : > { %v962_v16 = vadd.f32 %v961_v57, %v4721_v50  ;;  %v838_v44 = vpop.f32.mrb[7].mxu0  ;;  %v963_v20 = vpop.f32.mrb[7].mxu1  ;;  %v4769_v62 = vadd.f32 %v836_v15, %v4760_v47 }
 0x184   : > { %v4783_v42 = vadd.f32 %v963_v20, %v4721_v50  ;;  %v4793_v3 = vadd.f32 %v838_v44, %v4760_v47 }
 0x185   : > { %1537 = vrot.lane.b32.xlu0 %v4757_v41, %s3993_s10 }
 0x186   : > { %v842_v0 = vpop.f32.mrb[8].mxu0  ;;  %v967_v45 = vpop.f32.mrb[8].mxu1  ;;  %1570 = vrot.lane.b32.xlu1 %v962_v16, %s3994_s11 }
 0x187   : > { %v844_v39 = vpop.f32.mrb[9].mxu0  ;;  %v969_v48 = vpop.f32.mrb[9].mxu1  ;;  %v4811_v59 = vadd.f32 %v842_v0, %v4723_v52  ;;  %v4827_v5 = vadd.f32 %v967_v45, %v4743_v35 }
 0x188   : > { %v4777_v61 = vadd.f32 %v844_v39, %v4723_v52  ;;  %v4786_v27 = vadd.f32 %v969_v48, %v4743_v35  ;;  %v4863_v0 = vpop.permute.xlu1 %692 }
 0x189   : > { %1599 = vrot.lane.b32.xlu0 %v4766_v36, %s3995_s13  ;;  %7129 = vst [vmem:[#allocation9_spill] sm:$0xff] %v4811_v59 }
 0x18a   : > { %v848_v49 = vpop.f32.mrb[10].mxu0  ;;  %v973_v34 = vpop.f32.mrb[10].mxu1  ;;  %1632 = vrot.lane.b32.xlu1 %v4769_v62, %s3996_s14  ;;  %7127 = vst [vmem:[#allocation7_spill] sm:$0xff] %v4777_v61 }
 0x18b   : > { %v850_v2 = vpop.f32.mrb[11].mxu0  ;;  %v975_v60 = vpop.f32.mrb[11].mxu1  ;;  %v4800_v14 = vadd.f32 %v848_v49, %v4741_v31  ;;  %v4818_v55 = vadd.f32 %v973_v34, %v4760_v47 }
 0x18c   : > { %v4845_v17 = vadd.f32 %v850_v2, %v4741_v31  ;;  %v4856_v57 = vadd.f32 %v975_v60, %v4760_v47 }
 0x18d   : > { %1539 = vrot.lane.b32.xlu0 %v958_v7, %s3993_s10  ;;  %7131 = vst [vmem:[#allocation11_spill] sm:$0xff] %v4818_v55 }
 0x18e   : > { %v854_v32 = vpop.f32.mrb[12].mxu0  ;;  %v979_v29 = vpop.f32.mrb[12].mxu1  ;;  %1667 = vrot.lane.b32.xlu1 %v4777_v61, %s3995_s13  ;;  %7132 = vst [vmem:[#allocation12_spill] sm:$0xff] %v4856_v57 }
 0x18f   : > { %v856_v19 = vpop.f32.mrb[13].mxu0  ;;  %v981_v40 = vpop.f32.mrb[13].mxu1  ;;  %v4874_v48 = vadd.f32 %v979_v29, %v4723_v52 }
 0x190   : > { %v4834_v6 = vadd.f32 %v981_v40, %v4723_v52  ;;  %v857_v10 = vadd.f32 %v856_v19, %v4836_v24  ;;  %v4885_v19 = vadd.f32 %v854_v32, %v4836_v24 }
 0x191   : > { %1572 = vrot.lane.b32.xlu0 %v4783_v42, %s3994_s11 }
 0x192   : > { %v860_v54 = vpop.f32.mrb[14].mxu0  ;;  %v985_v37 = vpop.f32.mrb[14].mxu1  ;;  %1605 = vrot.lane.b32.xlu1 %v4786_v27, %s3995_s13  ;;  %7134 = vst [vmem:[#allocation14_spill] sm:$0xff] %v4885_v19 }
 0x193   : > { %v4795_v43 = vpop.f32.mrb[15].mxu0  ;;  %v4797_v63 = vpop.f32.mrb[15].mxu1  ;;  %v4861_v20 = vadd.f32 %v985_v37, %v4741_v31 }
 0x195   : > { %1634 = vrot.lane.b32.xlu0 %v4793_v3, %s3996_s14 }
 0x196   : > { %v4804_v21 = vpop.f32.mrb[16].mxu0  ;;  %v4806_v33 = vpop.f32.mrb[16].mxu1  ;;  %1697 = vrot.lane.b32.xlu1 %v4800_v14, %s3996_s14 }
 0x197   : > { %7128 = vst [vmem:[#allocation8_spill] sm:$0xff] %v4804_v21  ;;  %v4813_v53 = vpop.f32.mrb[17].mxu0  ;;  %v4815_v11 = vpop.f32.mrb[17].mxu1 }
 0x198   : > { %7130 = vst [vmem:[#allocation10_spill] sm:$0xff] %v4813_v53 }
 0x199   : > { %1665 = vrot.lane.b32.xlu0 %v4811_v59, %s3995_s13 }
 0x19a   : > { %v4822_v18 = vpop.f32.mrb[18].mxu0  ;;  %v997_v46 = vpop.f32.mrb[18].mxu1  ;;  %1636 = vrot.lane.b32.xlu1 %v4818_v55, %s3996_s14 }
 0x19b   : > { %v4829_v25 = vpop.f32.mrb[19].mxu0  ;;  %v4831_v13 = vpop.f32.mrb[19].mxu1  ;;  %v998_v7 = vadd.f32 %v997_v46, %v4863_v0 }
 0x19d   : > { %1603 = vrot.lane.b32.xlu0 %v4827_v5, %s3995_s13 }
 0x19e   : > { %v4840_v26 = vpop.f32.mrb[20].mxu1  ;;  %v1092_v9 = vpop.f32.mrb[20].mxu0  ;;  %1671 = vrot.lane.b32.xlu1 %v4834_v6, %s3995_s13 }
 0x19f   : > { %v4847_v4 = vpop.f32.mrb[21].mxu1  ;;  %v1094_v51 = vpop.f32.mrb[21].mxu0  ;;  %v4890_v37 = vadd.f32 %v1092_v9, %v4719_v22 }
 0x1a0   : > { %v1095_v36 = vadd.f32 %v1094_v51, %v4719_v22 }
 0x1a1   : > { %1699 = vrot.lane.b32.xlu0 %v4845_v17, %s3996_s14  ;;  %7136 = vst [vmem:[#allocation16_spill] sm:$0xff] %v4890_v37 }
 0x1a2   : > { %v4852_v23 = vpop.f32.mrb[22].mxu1  ;;  %v1098_v15 = vpop.f32.mrb[22].mxu0  ;;  %1731 = vrot.lane.b32.xlu1 %v857_v10, %s3993_s10 }
 0x1a3   : > { %v4858_v16 = vpop.f32.mrb[23].mxu1  ;;  %v1100_v44 = vpop.f32.mrb[23].mxu0 }
 0x1a4   : > { %v4927_v38 = vadd.f32 %v1100_v44, %v4721_v50 }
 0x1a5   : > { %1638 = vrot.lane.b32.xlu0 %v4856_v57, %s3996_s14 }
 0x1a6   : > { %v4867_v45 = vpop.f32.mrb[24].mxu1  ;;  %v4869_v39 = vpop.f32.mrb[24].mxu0  ;;  %1701 = vrot.lane.b32.xlu1 %v4861_v20, %s3996_s14  ;;  %7137 = vst [vmem:[#allocation17_spill] sm:$0xff] %v4927_v38 }
 0x1a7   : > { %v4876_v49 = vpop.f32.mrb[25].mxu1  ;;  %v1106_v34 = vpop.f32.mrb[25].mxu0 }
 0x1a8   : > { %v4944_v44 = vadd.f32 %v1106_v34, %v4743_v35 }
 0x1a9   : > { %1669 = vrot.lane.b32.xlu0 %v4874_v48, %s3995_s13 }
 0x1aa   : > { %v4881_v2 = vpop.f32.mrb[26].mxu1  ;;  %v1110_v60 = vpop.f32.mrb[26].mxu0  ;;  %1765 = vrot.lane.b32.xlu1 %v998_v7, %s3994_s11  ;;  %v861_v7 = vadd.f32 %v860_v54, %v4863_v0  ;;  %v1099_v54 = vadd.f32 %v1098_v15, %v4721_v50  ;;  %7138 = vst [vmem:[#allocation18_spill] sm:$0xff] %v4944_v44 }
 0x1ab   : > { %7133 = vst [vmem:[#allocation13_spill] sm:$0xff] %v4881_v2  ;;  %v4887_v40 = vpop.f32.mrb[27].mxu1  ;;  %v1112_v29 = vpop.f32.mrb[27].mxu0  ;;  %v4959_v28 = vadd.f32 %v1110_v60, %v4760_v47 }
 0x1ac   : > { %7135 = vst [vmem:[#allocation15_spill] sm:$0xff] %v4887_v40 }
 0x1ad   : > { %1729 = vrot.lane.b32.xlu0 %v4885_v19, %s3993_s10  ;;  %v4908_v19 = vadd.f32 %v4797_v63, %v4741_v31  ;;  %7141 = vst [vmem:[#allocation21_spill] sm:$0xff] %v4959_v28 }
 0x1ae   : > { %v1116_v46 = vpop.f32.mrb[28].mxu0  ;;  %v4894_v10 = vpop.f32.mrb[28].mxu1  ;;  %1541 = vrot.lane.b32.xlu1 %v4890_v37, %s3993_s10 }
 0x1af   : > { %v4899_v12 = vpop.f32.mrb[29].mxu0  ;;  %v1231_v32 = vpop.f32.mrb[29].mxu1  ;;  %v4977_v60 = vadd.f32 %v1116_v46, %v4723_v52 }
 0x1b0   : > { %v1232_v46 = vadd.f32 %v1231_v32, %v4719_v22 }
 0x1b1   : > { %1761 = vrot.lane.b32.xlu0 %v861_v7, %s3994_s11 }
 0x1b2   : > { %v1122_v9 = vpop.f32.mrb[30].mxu0  ;;  %v4903_v59 = vpop.f32.mrb[30].mxu1  ;;  %1543 = vrot.lane.b32.xlu1 %v1095_v36, %s3993_s10  ;;  %v4920_v36 = vadd.f32 %v4795_v43, %v4863_v0  ;;  %v4939_v43 = vadd.f32 %v4806_v33, %v4836_v24 }
 0x1b3   : > { %v1124_v30 = vpop.f32.mrb[31].mxu0  ;;  %v1237_v57 = vpop.f32.mrb[31].mxu1 }
 0x1b5   : > { %1703 = vrot.lane.b32.xlu0 %v4908_v19, %s3996_s14 }
 0x1b6   : > { %v4913_v55 = vpop.f32.mrb[32].mxu0  ;;  %v4915_v51 = vpop.f32.mrb[32].mxu1  ;;  %1574 = vrot.lane.b32.xlu1 %v1099_v54, %s3994_s11 }
 0x1b7   : > { %v4922_v7 = vpop.f32.mrb[33].mxu0  ;;  %v4924_v63 = vpop.f32.mrb[33].mxu1 }
 0x1b9   : > { %1763 = vrot.lane.b32.xlu0 %v4920_v36, %s3994_s11 }
 0x1ba   : > { %v4931_v15 = vpop.f32.mrb[34].mxu0  ;;  %v4933_v61 = vpop.f32.mrb[34].mxu1  ;;  %1576 = vrot.lane.b32.xlu1 %v4927_v38, %s3994_s11  ;;  %v994_v38 = vadd.f32 %v4815_v11, %v4836_v24 }
 0x1bb   : > { %v4941_v54 = vpop.f32.mrb[35].mxu0  ;;  %v1249_v40 = vpop.f32.mrb[35].mxu1 }
 0x1bd   : > { %1733 = vrot.lane.b32.xlu0 %v4939_v43, %s3993_s10 }
 0x1be   : > { %v4948_v2 = vpop.f32.mrb[36].mxu0  ;;  %v1253_v53 = vpop.f32.mrb[36].mxu1  ;;  %1609 = vrot.lane.b32.xlu1 %v4944_v44, %s3995_s13  ;;  %v4970_v44 = vadd.f32 %v4831_v13, %v4863_v0  ;;  %v4989_v13 = vadd.f32 %v4869_v39, %v4743_v35 }
 0x1bf   : > { %7139 = vst [vmem:[#allocation19_spill] sm:$0xff] %v4948_v2  ;;  %v4954_v33 = vpop.f32.mrb[37].mxu0  ;;  %v4956_v21 = vpop.f32.mrb[37].mxu1  ;;  %v5002_v2 = vadd.f32 %v1112_v29, %v4760_v47 }
 0x1c0   : > { %7140 = vst [vmem:[#allocation20_spill] sm:$0xff] %v4954_v33  ;;  %7143 = vst [vmem:[#allocation23_spill] sm:$0xff] %v4970_v44 }
 0x1c1   : > { %1735 = vrot.lane.b32.xlu0 %v994_v38, %s3993_s10  ;;  %7146 = vst [vmem:[#allocation26_spill] sm:$0xff] %v4989_v13  ;;  %7149 = vst [vmem:[#allocation29_spill] sm:$0xff] %v5002_v2 }
 0x1c2   : > { %v4962_v34 = vpop.f32.mrb[38].mxu0  ;;  %v4964_v1 = vpop.f32.mrb[38].mxu1  ;;  %1640 = vrot.lane.b32.xlu1 %v4959_v28, %s3996_s14 }
 0x1c3   : > { %7142 = vst [vmem:[#allocation22_spill] sm:$0xff] %v4962_v34  ;;  %v4972_v11 = vpop.f32.mrb[39].mxu0  ;;  %v4974_v33 = vpop.f32.mrb[39].mxu1 }
 0x1c4   : > { %7144 = vst [vmem:[#allocation24_spill] sm:$0xff] %v4972_v11 }
 0x1c5   : > { %1767 = vrot.lane.b32.xlu0 %v4970_v44, %s3994_s11 }
 0x1c6   : > { %v4981_v38 = vpop.f32.mrb[40].mxu0  ;;  %v4983_v34 = vpop.f32.mrb[40].mxu1  ;;  %1673 = vrot.lane.b32.xlu1 %v4977_v60, %s3995_s13 }
 0x1c7   : > { %7145 = vst [vmem:[#allocation25_spill] sm:$0xff] %v4981_v38  ;;  %v4991_v28 = vpop.f32.mrb[41].mxu0  ;;  %v4993_v11 = vpop.f32.mrb[41].mxu1 }
 0x1c8   : > { %7147 = vst [vmem:[#allocation27_spill] sm:$0xff] %v4991_v28  ;;  %v5007_v28 = vadd.f32 %v1122_v9, %v4741_v31 }
 0x1c9   : > { %1607 = vrot.lane.b32.xlu0 %v4989_v13, %s3995_s13  ;;  %v5022_v13 = vadd.f32 %v1124_v30, %v4741_v31 }
 0x1ca   : > { %v4998_v44 = vpop.f32.mrb[42].mxu0  ;;  %v1271_v38 = vpop.f32.mrb[42].mxu1  ;;  %1547 = vrot.lane.b32.xlu1 %v1232_v46, %s3993_s10  ;;  %7151 = vst [vmem:[#allocation31_spill] sm:$0xff] %v5007_v28  ;;  %v5017_v46 = vadd.f32 %v4894_v10, %v4719_v22  ;;  %v5037_v22 = vadd.f32 %v1237_v57, %v4721_v50  ;;  %v1236_v10 = vadd.f32 %v4903_v59, %v4721_v50 }
 0x1cb   : > { %7148 = vst [vmem:[#allocation28_spill] sm:$0xff] %v4998_v44  ;;  %v5004_v37 = vpop.f32.mrb[43].mxu0  ;;  %v1273_v39 = vpop.f32.mrb[43].mxu1  ;;  %7155 = vst [vmem:[#allocation35_spill] sm:$0xff] %v5022_v13  ;;  %v5066_v50 = vadd.f32 %v4915_v51, %v4743_v35  ;;  %v5073_v59 = vadd.f32 %v1249_v40, %v4760_v47  ;;  %v1135_v51 = vadd.f32 %v4931_v15, %v4863_v0 }
 0x1cc   : > { %7150 = vst [vmem:[#allocation30_spill] sm:$0xff] %v5004_v37  ;;  %7153 = vst [vmem:[#allocation33_spill] sm:$0xff] %v5017_v46  ;;  %v5089_v40 = vpop.permute.xlu1 %702  ;;  %v5108_v15 = vadd.f32 %v4964_v1, %v4741_v31  ;;  %v5127_v1 = vadd.f32 %v4974_v33, %v4741_v31  ;;  %v5146_v33 = vadd.f32 %v1273_v39, %v4863_v0  ;;  %v1300_v39 = vlaneseq }
 0x1cd   : > { %1642 = vrot.lane.b32.xlu0 %v5002_v2, %s3996_s14  ;;  %v5032_v2 = vadd.f32 %v4899_v12, %v4723_v52  ;;  %7158 = vst [vmem:[#allocation38_spill] sm:$0xff] %v5037_v22  ;;  %v5051_v12 = vadd.f32 %v4913_v55, %v4836_v24  ;;  %7165 = vst [vmem:[#allocation45_spill] sm:$0xff] %v5066_v50  ;;  %v1131_v55 = vadd.f32 %v4922_v7, %v4836_v24 }
 0x1ce   : > { %v5011_v32 = vpop.f32.mrb[44].mxu1  ;;  %1705 = vrot.lane.b32.xlu1 %v5007_v28, %s3996_s14  ;;  %7166 = vst [vmem:[#allocation46_spill] sm:$0xff] %v5073_v59  ;;  %7170 = vst [vmem:[#allocation50_spill] sm:$0xff] %v5108_v15 }
 0x1cf   : > { %7152 = vst [vmem:[#allocation32_spill] sm:$0xff] %v5011_v32  ;;  %v5019_v29 = vpop.f32.mrb[45].mxu1  ;;  %7161 = vst [vmem:[#allocation41_spill] sm:$0xff] %v5051_v12 }
 0x1d0   : > { %7154 = vst [vmem:[#allocation34_spill] sm:$0xff] %v5019_v29  ;;  %7174 = vst [vmem:[#allocation54_spill] sm:$0xff] %v5127_v1 }
 0x1d1   : > { %1545 = vrot.lane.b32.xlu0 %v5017_v46, %s3993_s10  ;;  %v5060_v46 = vadd.f32 %v4924_v63, %v4743_v35  ;;  %v5077_v63 = vpop.permute.xlu0 %697  ;;  %v5083_v35 = vadd.f32 %v1253_v53, %v4723_v52  ;;  %v5100_v53 = vadd.f32 %v4933_v61, %v4760_v47  ;;  %v1272_v47 = vadd.f32 %v1271_v38, %v4863_v0 }
 0x1d2   : > { %v5026_v9 = vpop.f32.mrb[46].mxu1  ;;  %1707 = vrot.lane.b32.xlu1 %v5022_v13, %s3996_s14  ;;  %v1268_v38 = vadd.f32 %v4993_v11, %v4836_v24  ;;  %7177 = vst [vmem:[#allocation57_spill] sm:$0xff] %v5146_v33 }
 0x1d3   : > { %7156 = vst [vmem:[#allocation36_spill] sm:$0xff] %v5026_v9  ;;  %v5034_v28 = vpop.f32.mrb[47].mxu1  ;;  %7163 = vst [vmem:[#allocation43_spill] sm:$0xff] %v5060_v46 }
 0x1d4   : > { %7157 = vst [vmem:[#allocation37_spill] sm:$0xff] %v5034_v28  ;;  %7167 = vst [vmem:[#allocation47_spill] sm:$0xff] %v5083_v35 }
 0x1d5   : > { %1675 = vrot.lane.b32.xlu0 %v5032_v2, %s3995_s13  ;;  %v5092_v7 = vpop.permute.xlu0 %707  ;;  %7169 = vst [vmem:[#allocation49_spill] sm:$0xff] %v5100_v53 }
 0x1d6   : > { %v5041_v30 = vpop.f32.mrb[48].mxu1  ;;  %1580 = vrot.lane.b32.xlu1 %v5037_v22, %s3994_s11 }
 0x1d7   : > { %7159 = vst [vmem:[#allocation39_spill] sm:$0xff] %v5041_v30  ;;  %v5047_v13 = vpop.f32.mrb[49].mxu1 }
 0x1d8   : > { %7160 = vst [vmem:[#allocation40_spill] sm:$0xff] %v5047_v13 }
 0x1d9   : > { %1578 = vrot.lane.b32.xlu0 %v1236_v10, %s3994_s11  ;;  %v5096_v10 = vadd.f32 %v4956_v21, %v4723_v52  ;;  %v5116_v52 = vadd.f32 %v4941_v54, %v4863_v0  ;;  %v5136_v54 = vadd.f32 %v4983_v34, %v4836_v24 }
 0x1da   : > { %v5054_v57 = vpop.f32.mrb[50].mxu1  ;;  %1737 = vrot.lane.b32.xlu1 %v5051_v12, %s3993_s10 }
 0x1db   : > { %7162 = vst [vmem:[#allocation42_spill] sm:$0xff] %v5054_v57  ;;  %v5062_v22 = vpop.f32.mrb[51].mxu1  ;;  %7168 = vst [vmem:[#allocation48_spill] sm:$0xff] %v5096_v10 }
 0x1dc   : > { %7164 = vst [vmem:[#allocation44_spill] sm:$0xff] %v5062_v22  ;;  %7172 = vst [vmem:[#allocation52_spill] sm:$0xff] %v5116_v52 }
 0x1dd   : > { %1613 = vrot.lane.b32.xlu0 %v5060_v46, %s3995_s13  ;;  %7176 = vst [vmem:[#allocation56_spill] sm:$0xff] %v5136_v54 }
 0x1de   : > { %1611 = vrot.lane.b32.xlu1 %v5066_v50, %s3995_s13 }
 0x1e1   : > { %1646 = vrot.lane.b32.xlu0 %v5073_v59, %s3996_s14 }
 0x1e2   : > { %1739 = vrot.lane.b32.xlu1 %v1131_v55, %s3993_s10 }
 0x1e5   : > { %1677 = vrot.lane.b32.xlu0 %v5083_v35, %s3995_s13 }
 0x1e6   : > { %1769 = vrot.lane.b32.xlu1 %v1135_v51, %s3994_s11  ;;  %v5112_v51 = vpop.permute.xlu1 %712 }
 0x1e9   : > { %1679 = vrot.lane.b32.xlu0 %v5096_v10, %s3995_s13 }
 0x1ea   : > { %1644 = vrot.lane.b32.xlu1 %v5100_v53, %s3996_s14 }
 0x1eb   : > { %v5110_v55 = vpop.permute.xlu0 %1533 }
 0x1ec   : > { %7171 = vst [vmem:[#allocation51_spill] sm:$0xff] %v5110_v55  ;;  %v5129_v21 = vpop.permute.xlu1 %1535 }
 0x1ed   : > { %1709 = vrot.lane.b32.xlu0 %v5108_v15, %s3996_s14  ;;  %7175 = vst [vmem:[#allocation55_spill] sm:$0xff] %v5129_v21 }
 0x1ee   : > { %1771 = vrot.lane.b32.xlu1 %v5116_v52, %s3994_s11 }
 0x1ef   : > { %v5123_v61 = vpop.permute.xlu0 %1566 }
 0x1f0   : > { %7173 = vst [vmem:[#allocation53_spill] sm:$0xff] %v5123_v61 }
 0x1f1   : > { %1773 = vrot.lane.b32.xlu0 %v1272_v47, %s3994_s11 }
 0x1f2   : > { %1711 = vrot.lane.b32.xlu1 %v5127_v1, %s3996_s14  ;;  %v5172_v1 = vand.u32 127, %v1300_v39 }
 0x1f3   : > { %v1569_v59 = vpop.permute.xlu0 %1568 }
 0x1f4   : > { %v5140_v53 = vpop.permute.xlu1 %1601  ;;  %v5175_v15 = vadd.s32 128, %v5172_v1  ;;  %v5180_v10 = vadd.s32 256, %v5172_v1  ;;  %v7037_v57 = vand.u32 15, %v5172_v1  ;;  %vm1648_vm1 = vcmp.lt.s32.totalorder %v5172_v1, 127 }
 0x1f5   : > { %1741 = vrot.lane.b32.xlu0 %v5136_v54, %s3993_s10  ;;  %v5188_v39 = vadd.s32 384, %v5172_v1  ;;  %vm1582_vm2 = vcmp.lt.s32.totalorder %v5172_v1, 112  ;;  %vm1549_vm5 = vcmp.lt.s32.totalorder %v5172_v1, 16  ;;  %vm1615_vm8 = vcmp.lt.s32.totalorder %v5172_v1, 1 }
 0x1f6   : > { %1743 = vrot.lane.b32.xlu1 %v1268_v38, %s3993_s10  ;;  %v1320_v13 = vand.u32 255, %v5175_v15  ;;  %v1327_v30 = vand.u32 255, %v5180_v10  ;;  %vm5199_vm3 = vcmp.lt.s32.totalorder %v7037_v57, 15  ;;  %v7040_v57 = vand.u32 15, %v5175_v15  ;;  %s6817_s10 = scalar_lea.vmem %s6995_s3, %s3680_s23 }
 0x1f7   : > { %v1538_v31 = vpop.permute.xlu0 %1537 }
 0x1f8   : > { %v5148_v47 = vpop.permute.xlu1 %1570  ;;  %vm5209_vm4 = vcmp.lt.s32.totalorder %v1320_v13, 240  ;;  %vm5226_vm6 = vcmp.ge.s32.totalorder %v1327_v30, 16  ;;  %v1555_v12 = vsel %vm1549_vm5, %v5129_v21, %v1538_v31  ;;  %vm5237_vm7 = vcmp.lt.s32.totalorder %v7040_v57, 15 }
 0x1f9   : > { %v5425_v57 = vadd.f32 %v4876_v49, %v5092_v7 }
 0x1fa   : > { %1775 = vrot.lane.b32.xlu1 %v5146_v33, %s3994_s11 }
 0x1fb   : > { %v5152_v34 = vpop.permute.xlu0 %1599  ;;  %7220 = vst [vmem:[#allocation86_spill] sm:$0xff] %v5425_v57 }
 0x1fc   : > { %7178 = vst [vmem:[#allocation58_spill] sm:$0xff] %v5152_v34  ;;  %v5154_v22 = vpop.permute.xlu1 %1632 }
 0x1fd   : > { %7179 = vst [vmem:[#allocation59_spill] sm:$0xff] %v5154_v22 }
 0x1ff   : > { %v5156_v24 = vpop.permute.xlu0 %1539 }
 0x200   : > { %v5158_v11 = vpop.permute.xlu1 %1667 }
 0x203   : > { %v5160_v54 = vpop.permute.xlu0 %1572 }
 0x204   : > { %v5162_v38 = vpop.permute.xlu1 %1605 }
 0x207   : > { %v5164_v46 = vpop.permute.xlu0 %1634 }
 0x208   : > { %v5166_v0 = vpop.permute.xlu1 %1697 }
 0x209   : > { %7180 = vst [vmem:[#allocation60_spill] sm:$0xff] %v5166_v0 }
 0x20b   : > { %v5168_v50 = vpop.permute.xlu0 %1665 }
 0x20c   : > { %v5170_v33 = vpop.permute.xlu1 %1636 }
 0x20f   : > { %v5177_v52 = vpop.permute.xlu0 %1603 }
 0x210   : > { %v5182_v35 = vpop.permute.xlu1 %1671 }
 0x213   : > { %v1700_v34 = vpop.permute.xlu0 %1699 }
 0x214   : > { %v1719_v28 = vsel %vm1648_vm1, %v5166_v0, %v1700_v34  ;;  %v5194_v55 = vpop.permute.xlu1 %1731  ;;  %v1588_v0 = vsel %vm1582_vm2, %v1569_v59, %v5148_v47 }
 0x215   : > { %v5207_v29 = vsel %vm5199_vm3, %v1719_v28, %v4800_v14  ;;  %v5224_v28 = vsel %vm1582_vm2, %v5123_v61, %v1569_v59  ;;  %v5249_v61 = vsel %vm5209_vm4, %v1588_v0, %v4747_v8  ;;  %v5269_v8 = vadd.f32 %v4829_v25, %v5089_v40 }
 0x216   : > { %7183 = vst [vmem:[#allocation61_spill] sm:$0xff] %v5207_v29  ;;  %7187 = vst [vmem:[#allocation63_spill] sm:$0xff] %v5224_v28  ;;  %v1801_v30 = vadd.f32 %v5207_v29, %v5224_v28  ;;  %v5265_v28 = vadd.f32 %v4822_v18, %v5089_v40  ;;  %v7199_v0 = vand.u32 15, %v5188_v39  ;;  %v5287_v18 = vsel %vm1549_vm5, %v1538_v31, %v5156_v24 }
 0x217   : > { %v5217_v37 = vpop.permute.xlu0 %1638  ;;  %7192 = vst [vmem:[#allocation64_spill] sm:$0xff] %v5249_v61  ;;  %7198 = vst [vmem:[#allocation67_spill] sm:$0xff] %v5269_v8 }
 0x218   : > { %7186 = vst [vmem:[#allocation62_spill] sm:$0xff] %v5217_v37  ;;  %v5230_v13 = vpop.permute.xlu1 %1701  ;;  %v7193_v37 = vand.u32 15, %v5180_v10  ;;  %7197 = vst [vmem:[#allocation66_spill] sm:$0xff] %v5265_v28  ;;  %vm5273_vm10 = vcmp.ge.s32.totalorder %v7199_v0, 1  ;;  %v1833_v31 = vadd.f32 %v1801_v30, %v5265_v28 }
 0x219   : > { %v1718_v59 = vsel %vm1648_vm1, %v1700_v34, %v5230_v13  ;;  %7203 = vst [vmem:[#allocation69_spill] sm:$0xff] %v5287_v18 }
 0x21a   : > { %vm5254_vm9 = vcmp.ge.s32.totalorder %v7193_v37, 1  ;;  %v5261_v34 = vsel %vm5237_vm7, %v1718_v59, %v4845_v17  ;;  %v5282_v17 = vsel %vm5226_vm6, %v1555_v12, %v4757_v41 }
 0x21b   : > { %7196 = vst [vmem:[#allocation65_spill] sm:$0xff] %v5261_v34  ;;  %v1670_v29 = vpop.permute.xlu0 %1669  ;;  %v1802_v21 = vadd.f32 %v5261_v34, %v5249_v61  ;;  %7202 = vst [vmem:[#allocation68_spill] sm:$0xff] %v5282_v17  ;;  %v5311_v34 = vadd.f32 %v4840_v26, %v5077_v63 }
 0x21c   : > { %v1685_v25 = vsel %vm1615_vm8, %v1670_v29, %v5182_v35  ;;  %v1686_v59 = vsel %vm1615_vm8, %v5158_v11, %v1670_v29  ;;  %v5295_v0 = vpop.permute.xlu1 %1765  ;;  %v5315_v29 = vadd.f32 %v4847_v4, %v5077_v63 }
 0x21d   : > { %v5300_v41 = vsel %vm5254_vm9, %v1686_v59, %v4874_v48  ;;  %v5305_v12 = vsel %vm5273_vm10, %v1685_v25, %v4834_v6  ;;  %v1834_v61 = vadd.f32 %v1802_v21, %v5269_v8  ;;  %7206 = vst [vmem:[#allocation72_spill] sm:$0xff] %v5311_v34 }
 0x21e   : > { %7204 = vst [vmem:[#allocation70_spill] sm:$0xff] %v5300_v41  ;;  %7205 = vst [vmem:[#allocation71_spill] sm:$0xff] %v5305_v12  ;;  %v1795_v48 = vadd.f32 %v5300_v41, %v5282_v17  ;;  %v1796_v59 = vadd.f32 %v5305_v12, %v5287_v18  ;;  %v7260_v18 = vld [vmem:[#allocation10_spill] sm:$0xff] }
 0x21f   : > { %7207 = vst [vmem:[#allocation73_spill] sm:$0xff] %v5315_v29  ;;  %v5321_v6 = vpop.permute.xlu0 %1729  ;;  %v1860_v25 = vadd.f32 %v1834_v61, %v1833_v31  ;;  %v1655_v61 = vsel %vm1648_vm1, %v5154_v22, %v5164_v46  ;;  %v1654_v31 = vsel %vm1648_vm1, %v5164_v46, %v5170_v33  ;;  %v5358_v46 = vadd.f32 %v4735_v56, %v5112_v51 }
 0x220   : > { %v5323_v30 = vpop.permute.xlu1 %1541  ;;  %v1827_v21 = vadd.f32 %v1795_v48, %v5311_v34  ;;  %v1828_v26 = vadd.f32 %v1796_v59, %v5315_v29  ;;  %v5344_v59 = vsel %vm5199_vm3, %v1655_v61, %v4769_v62  ;;  %v5363_v62 = vsel %vm5237_vm7, %v1654_v31, %v4793_v3 }
 0x221   : > { %1861 = vadd.xlane.f32.xlu1 %v1860_v25  ;;  %7209 = vst [vmem:[#allocation75_spill] sm:$0xff] %v5344_v59  ;;  %7211 = vst [vmem:[#allocation77_spill] sm:$0xff] %v5358_v46  ;;  %v5374_v61 = vadd.f32 %v4739_v58, %v5112_v51  ;;  %v1621_v3 = vsel %vm1615_vm8, %v5140_v53, %v5177_v52  ;;  %v5605_v12 = vadd.f32 %v7260_v18, %v5077_v63 }
 0x222   : > { %v1869_v8 = vadd.f32 %v1828_v26, %v1827_v21  ;;  %7212 = vst [vmem:[#allocation78_spill] sm:$0xff] %v5363_v62  ;;  %v1313_v18 = vand.u32 255, %v5172_v1 }
 0x223   : > { %v5327_v28 = vpop.permute.xlu0 %1761  ;;  %7214 = vst [vmem:[#allocation80_spill] sm:$0xff] %v5374_v61 }
 0x224   : > { %7208 = vst [vmem:[#allocation74_spill] sm:$0xff] %v5327_v28  ;;  %v5329_v4 = vpop.permute.xlu1 %1543  ;;  %1870 = vadd.xlane.f32.xlu0 %v1869_v8  ;;  %vm5699_vm7 = vcmp.ge.s32.totalorder %v1313_v18, 16 }
 0x227   : > { %v1704_v17 = vpop.permute.xlu0 %1703 }
 0x228   : > { %v5331_v41 = vpop.permute.xlu1 %1574 }
 0x22b   : > { %v1764_v48 = vpop.permute.xlu0 %1763 }
 0x22c   : > { %v1782_v8 = vsel %vm1582_vm2, %v1764_v48, %v5295_v0  ;;  %v5352_v25 = vsel %vm1582_vm2, %v5327_v28, %v1764_v48  ;;  %v5354_v21 = vpop.permute.xlu1 %1576  ;;  %v1620_v48 = vsel %vm1615_vm8, %v5177_v52, %v5162_v38 }
 0x22d   : > { %7210 = vst [vmem:[#allocation76_spill] sm:$0xff] %v5352_v25  ;;  %v5368_v9 = vsel %vm5209_vm4, %v1782_v8, %v4920_v36  ;;  %v1817_v26 = vadd.f32 %v5352_v25, %v5344_v59  ;;  %v5410_v52 = vsel %vm5273_vm10, %v1620_v48, %v4786_v27 }
 0x22e   : > { %7213 = vst [vmem:[#allocation79_spill] sm:$0xff] %v5368_v9  ;;  %v1818_v56 = vadd.f32 %v5368_v9, %v5363_v62  ;;  %7217 = vst [vmem:[#allocation83_spill] sm:$0xff] %v5410_v52  ;;  %v7254_v9 = vld [vmem:[#allocation4_spill] sm:$0xff] }
 0x22f   : > { %v1734_v44 = vpop.permute.xlu0 %1733  ;;  %v1849_v32 = vadd.f32 %v1817_v26, %v5358_v46  ;;  %v5401_v26 = vsel %vm5254_vm9, %v1621_v3, %v4827_v5  ;;  %v5421_v5 = vadd.f32 %v4867_v45, %v5092_v7  ;;  %v1717_v45 = vsel %vm1648_vm1, %v5230_v13, %v1704_v17 }
 0x230   : > { %v1750_v36 = vsel %vm1549_vm5, %v5194_v55, %v1734_v44  ;;  %v5386_v31 = vpop.permute.xlu1 %1609  ;;  %v1850_v58 = vadd.f32 %v1818_v56, %v5374_v61  ;;  %7216 = vst [vmem:[#allocation82_spill] sm:$0xff] %v5401_v26 }
 0x231   : > { %v5396_v8 = vsel %vm5226_vm6, %v1750_v36, %v4939_v43  ;;  %7219 = vst [vmem:[#allocation85_spill] sm:$0xff] %v5421_v5 }
 0x232   : > { %7215 = vst [vmem:[#allocation81_spill] sm:$0xff] %v5396_v8  ;;  %v1866_v34 = vadd.f32 %v1850_v58, %v1849_v32  ;;  %v1811_v56 = vadd.f32 %v5396_v8, %v5401_v26  ;;  %v5440_v58 = vadd.s32 512, %v5172_v1  ;;  %v5510_v26 = vadd.f32 %v4852_v23, %v5089_v40  ;;  %v7241_v8 = vld [vmem:[#allocation16_spill] sm:$0xff] }
 0x233   : > { %v5403_v46 = vpop.permute.xlu0 %1735 }
 0x234   : > { %v5415_v43 = vsel %vm1549_vm5, %v1734_v44, %v5403_v46  ;;  %v5417_v14 = vpop.permute.xlu1 %1640  ;;  %1867 = vadd.xlane.f32.xlu0 %v1866_v34  ;;  %v1843_v3 = vadd.f32 %v1811_v56, %v5421_v5  ;;  %v1334_v34 = vand.u32 255, %v5188_v39  ;;  %v7221_v56 = vand.u32 15, %v5180_v10  ;;  %7236 = vst [vmem:[#allocation91_spill] sm:$0xff] %v5510_v26 }
 0x235   : > { %7218 = vst [vmem:[#allocation84_spill] sm:$0xff] %v5415_v43  ;;  %v1812_v27 = vadd.f32 %v5415_v43, %v5410_v52  ;;  %v1586_v10 = vsel %vm1582_vm2, %v5160_v54, %v5331_v41  ;;  %v7232_v52 = vand.u32 15, %v5440_v58 }
 0x236   : > { %vm5446_vm11 = vcmp.lt.s32.totalorder %v7221_v56, 15  ;;  %vm5456_vm12 = vcmp.lt.s32.totalorder %v1334_v34, 240  ;;  %v5470_v56 = vsel %vm1582_vm2, %v5148_v47, %v5160_v54  ;;  %v5476_v34 = vadd.s32 640, %v5172_v1 }
 0x237   : > { %v5429_v37 = vpop.permute.xlu0 %1767  ;;  %v1844_v44 = vadd.f32 %v1812_v27, %v5425_v57  ;;  %v5453_v13 = vsel %vm5446_vm11, %v1717_v45, %v4861_v20  ;;  %7227 = vst [vmem:[#allocation88_spill] sm:$0xff] %v5470_v56  ;;  %v1341_v20 = vand.u32 255, %v5440_v58  ;;  %v5492_v47 = vsel %vm5456_vm12, %v1586_v10, %v4783_v42 }
 0x238   : > { %v1674_v32 = vpop.permute.xlu1 %1673  ;;  %7224 = vst [vmem:[#allocation87_spill] sm:$0xff] %v5453_v13  ;;  %v1803_v54 = vadd.f32 %v5453_v13, %v5470_v56  ;;  %7231 = vst [vmem:[#allocation89_spill] sm:$0xff] %v5492_v47  ;;  %vm5496_vm14 = vcmp.ge.s32.totalorder %v7232_v52, 1  ;;  %v5514_v42 = vadd.f32 %v4858_v16, %v5089_v40  ;;  %v7243_v59 = vand.u32 15, %v5476_v34 }
 0x239   : > { %v1875_v36 = vadd.f32 %v1844_v44, %v1843_v3  ;;  %v7228_v3 = vand.u32 15, %v5188_v39  ;;  %vm5520_vm15 = vcmp.ge.s32.totalorder %v1341_v20, 16 }
 0x23a   : > { %7237 = vst [vmem:[#allocation92_spill] sm:$0xff] %v5514_v42  ;;  %v1835_v43 = vadd.f32 %v1803_v54, %v5510_v26  ;;  %vm5550_vm3 = vcmp.ge.s32.totalorder %v7243_v59, 1  ;;  %v7270_v26 = vld [vmem:[#allocation27_spill] sm:$0xff] }
 0x23b   : > { %1876 = vadd.xlane.f32.xlu1 %v1875_v36  ;;  %v5437_v49 = vpop.permute.xlu0 %1607  ;;  %vm5480_vm13 = vcmp.lt.s32.totalorder %v7228_v3, 15  ;;  %v1684_v3 = vsel %vm1615_vm8, %v5182_v35, %v1674_v32  ;;  %v5642_v56 = vadd.f32 %v7270_v26, %v5092_v7  ;;  %v7278_v26 = vld [vmem:[#allocation7_spill] sm:$0xff] }
 0x23c   : > { %v5442_v48 = vpop.permute.xlu1 %1547  ;;  %v5534_v16 = vsel %vm5496_vm14, %v1684_v3, %v4977_v60  ;;  %v1619_v28 = vsel %vm1615_vm8, %v5162_v38, %v5437_v49  ;;  %v7285_v38 = vld [vmem:[#allocation36_spill] sm:$0xff] }
 0x23d   : > { %7240 = vst [vmem:[#allocation93_spill] sm:$0xff] %v5534_v16  ;;  %v5687_v22 = vadd.f32 %v7285_v38, %v5089_v40  ;;  %v7294_v38 = vld [vmem:[#allocation26_spill] sm:$0xff] }
 0x23f   : > { %v5464_v36 = vpop.permute.xlu0 %1642  ;;  %7286 = vst [vmem:[#allocation7_spill] sm:$0xff] %v5687_v22  ;;  %v7296_v22 = vand.u32 15, %v5440_v58 }
 0x240   : > { %v5473_v45 = vpop.permute.xlu1 %1705 }
 0x241   : > { %v1716_v5 = vsel %vm1648_vm1, %v1704_v17, %v5473_v45  ;;  %vm5715_vm9 = vcmp.lt.s32.totalorder %v7296_v22, 15  ;;  %v7305_v22 = vld [vmem:[#allocation58_spill] sm:$0xff] }
 0x242   : > { %v5506_v17 = vsel %vm5480_vm13, %v1716_v5, %v4908_v19  ;;  %v1553_v19 = vsel %vm1549_vm5, %v5156_v24, %v5323_v30  ;;  %v5544_v24 = vadd.s32 768, %v5172_v1  ;;  %v1622_v58 = vsel %vm1615_vm8, %v7305_v22, %v5140_v53 }
 0x243   : > { %7235 = vst [vmem:[#allocation90_spill] sm:$0xff] %v5506_v17  ;;  %v5516_v52 = vpop.permute.xlu0 %1545  ;;  %v1804_v10 = vadd.f32 %v5506_v17, %v5492_v47  ;;  %v5541_v61 = vsel %vm5520_vm15, %v1553_v19, %v7241_v8  ;;  %v7250_v19 = vld [vmem:[#allocation19_spill] sm:$0xff]  ;;  %v5623_v17 = vadd.s32 896, %v5172_v1  ;;  %v5759_v53 = vsel %vm1582_vm2, %v5295_v0, %v5429_v37 }
 0x244   : > { %v5528_v23 = vpop.permute.xlu1 %1707  ;;  %7242 = vst [vmem:[#allocation16_spill] sm:$0xff] %v5541_v61  ;;  %v1797_v8 = vadd.f32 %v5534_v16, %v5541_v61 }
 0x245   : > { %v1836_v20 = vadd.f32 %v1804_v10, %v5514_v42  ;;  %v7248_v10 = vld [vmem:[#allocation2_spill] sm:$0xff]  ;;  %v7252_v42 = vld [vmem:[#allocation20_spill] sm:$0xff]  ;;  %v1458_v35 = vand.u32 15, %v5623_v17 }
 0x246   : > { %v5582_v29 = vadd.f32 %v7252_v42, %v5077_v63  ;;  %v1355_v42 = vand.u32 255, %v5544_v24 }
 0x247   : > { %v5546_v62 = vpop.permute.xlu0 %1675  ;;  %v1872_v5 = vadd.f32 %v1836_v20, %v1835_v43  ;;  %v5565_v43 = vsel %vm1549_vm5, %v5323_v30, %v5329_v4  ;;  %v5578_v20 = vadd.f32 %v7250_v19, %v5077_v63 }
 0x248   : > { %v1683_v54 = vsel %vm1615_vm8, %v1674_v32, %v5546_v62  ;;  %v5557_v3 = vpop.permute.xlu1 %1580  ;;  %7246 = vst [vmem:[#allocation94_spill] sm:$0xff] %v5565_v43  ;;  %v5574_v32 = vadd.f32 %v7248_v10, %v5092_v7  ;;  %7253 = vst [vmem:[#allocation20_spill] sm:$0xff] %v5582_v29  ;;  %v7257_v10 = vand.u32 15, %v5175_v15  ;;  %vm5644_vm6 = vcmp.ge.s32.totalorder %v1355_v42, 16 }
 0x249   : > { %v5570_v59 = vsel %vm5550_vm3, %v1683_v54, %v5032_v2  ;;  %1873 = vadd.xlane.f32.xlu0 %v1872_v5  ;;  %7251 = vst [vmem:[#allocation19_spill] sm:$0xff] %v5578_v20  ;;  %v5588_v2 = vadd.f32 %v7254_v9, %v5092_v7  ;;  %v7256_v5 = vld [vmem:[#allocation8_spill] sm:$0xff]  ;;  %v7261_v9 = vld [vmem:[#allocation13_spill] sm:$0xff]  ;;  %v1829_v61 = vadd.f32 %v1797_v8, %v5578_v20 }
 0x24a   : > { %7247 = vst [vmem:[#allocation95_spill] sm:$0xff] %v5570_v59  ;;  %7249 = vst [vmem:[#allocation2_spill] sm:$0xff] %v5574_v32  ;;  %v1798_v30 = vadd.f32 %v5570_v59, %v5565_v43  ;;  %v5592_v54 = vadd.f32 %v7256_v5, %v5077_v63  ;;  %vm5596_vm4 = vcmp.ge.s32.totalorder %v7257_v10, 1  ;;  %v5609_v43 = vadd.f32 %v7261_v9, %v5112_v51  ;;  %v7263_v10 = vld [vmem:[#allocation15_spill] sm:$0xff]  ;;  %v7265_v9 = vld [vmem:[#allocation22_spill] sm:$0xff] }
 0x24b   : > { %7255 = vst [vmem:[#allocation4_spill] sm:$0xff] %v5588_v2  ;;  %v5601_v25 = vpop.permute.xlu0 %1578  ;;  %v5615_v47 = vadd.f32 %v7263_v10, %v5112_v51  ;;  %v1687_v59 = vsel %vm1615_vm8, %v5168_v50, %v5158_v11  ;;  %v5627_v16 = vadd.f32 %v7265_v9, %v5089_v40  ;;  %v7266_v8 = vld [vmem:[#allocation24_spill] sm:$0xff]  ;;  %v7268_v11 = vld [vmem:[#allocation25_spill] sm:$0xff]  ;;  %7271 = vst [vmem:[#allocation22_spill] sm:$0xff] %v5642_v56 }
 0x24c   : > { %7262 = vst [vmem:[#allocation8_spill] sm:$0xff] %v5609_v43  ;;  %v1738_v5 = vpop.permute.xlu1 %1737  ;;  %v1830_v15 = vadd.f32 %v1798_v30, %v5582_v29  ;;  %v5631_v30 = vadd.f32 %v7266_v8, %v5089_v40  ;;  %v5638_v20 = vadd.f32 %v7268_v11, %v5092_v7  ;;  %v1348_v8 = vand.u32 255, %v5476_v34 }
 0x24d   : > { %7264 = vst [vmem:[#allocation10_spill] sm:$0xff] %v5615_v47  ;;  %v1748_v10 = vsel %vm1549_vm5, %v5403_v46, %v1738_v5  ;;  %v7274_v46 = vld [vmem:[#allocation28_spill] sm:$0xff]  ;;  %v5663_v42 = vsel %vm5596_vm4, %v1687_v59, %v7278_v26  ;;  %v7283_v59 = vld [vmem:[#allocation41_spill] sm:$0xff] }
 0x24e   : > { %7267 = vst [vmem:[#allocation13_spill] sm:$0xff] %v5631_v30  ;;  %v1881_v29 = vadd.f32 %v1830_v15, %v1829_v61  ;;  %7269 = vst [vmem:[#allocation15_spill] sm:$0xff] %v5638_v20  ;;  %v5654_v61 = vadd.f32 %v7274_v46, %v5112_v51  ;;  %v7276_v15 = vld [vmem:[#allocation30_spill] sm:$0xff]  ;;  %v7281_v46 = vld [vmem:[#allocation32_spill] sm:$0xff]  ;;  %v5683_v26 = vsel %vm5520_vm15, %v1748_v10, %v7283_v59  ;;  %vm5779_vm15 = vcmp.lt.s32.totalorder %v1348_v8, 240 }
 0x24f   : > { %v5649_v13 = vpop.permute.xlu0 %1613  ;;  %v5658_v11 = vadd.f32 %v7276_v15, %v5112_v51  ;;  %7279 = vst [vmem:[#allocation27_spill] sm:$0xff] %v5663_v42  ;;  %v5673_v32 = vadd.f32 %v7281_v46, %v5077_v63  ;;  %v7282_v15 = vld [vmem:[#allocation34_spill] sm:$0xff]  ;;  %7284 = vst [vmem:[#allocation30_spill] sm:$0xff] %v5683_v26  ;;  %v7288_v30 = vld [vmem:[#allocation51_spill] sm:$0xff]  ;;  %v1551_v8 = vsel %vm1549_vm5, %v5329_v4, %v5516_v52 }
 0x250   : > { %7275 = vst [vmem:[#allocation24_spill] sm:$0xff] %v5654_v61  ;;  %v5669_v2 = vpop.permute.xlu1 %1611  ;;  %1882 = vadd.xlane.f32.xlu1 %v1881_v29  ;;  %v5677_v61 = vadd.f32 %v7282_v15, %v5077_v63  ;;  %v7287_v29 = vld [vmem:[#allocation55_spill] sm:$0xff]  ;;  %v1618_v63 = vsel %vm1615_vm8, %v5437_v49, %v5386_v31  ;;  %v7292_v10 = vld [vmem:[#allocation37_spill] sm:$0xff]  ;;  %v7299_v49 = vand.u32 15, %v5544_v24  ;;  %v1557_v57 = vsel %vm1549_vm5, %v5442_v48, %v7288_v30  ;;  %v7371_v15 = vld [vmem:[#allocation44_spill] sm:$0xff] }
 0x251   : > { %7277 = vst [vmem:[#allocation25_spill] sm:$0xff] %v5658_v11  ;;  %7280 = vst [vmem:[#allocation28_spill] sm:$0xff] %v5669_v2  ;;  %v1362_v11 = vand.u32 255, %v5623_v17  ;;  %v5693_v46 = vsel %vm1549_vm5, %v7288_v30, %v7287_v29  ;;  %v5706_v59 = vadd.f32 %v7292_v10, %v5089_v40  ;;  %v5711_v29 = vsel %vm5496_vm14, %v1619_v28, %v7294_v38  ;;  %v7303_v28 = vld [vmem:[#allocation39_spill] sm:$0xff]  ;;  %v7306_v10 = vld [vmem:[#allocation62_spill] sm:$0xff] }
 0x252   : > { %7289 = vst [vmem:[#allocation32_spill] sm:$0xff] %v5693_v46  ;;  %7295 = vst [vmem:[#allocation41_spill] sm:$0xff] %v5711_v29  ;;  %vm5721_vm10 = vcmp.ge.s32.totalorder %v7299_v49, 1  ;;  %v1794_v40 = vadd.f32 %v5663_v42, %v5693_v46  ;;  %v5731_v39 = vadd.f32 %v7303_v28, %v5092_v7  ;;  %v1653_v38 = vsel %vm1648_vm1, %v5170_v33, %v7306_v10  ;;  %v7310_v46 = vld [vmem:[#allocation40_spill] sm:$0xff]  ;;  %v7312_v33 = vld [vmem:[#allocation18_spill] sm:$0xff] }
 0x253   : > { %7293 = vst [vmem:[#allocation34_spill] sm:$0xff] %v5706_v59  ;;  %v5725_v17 = vpop.permute.xlu0 %1646  ;;  %v7307_v49 = vand.u32 15, %v5172_v1  ;;  %v1813_v28 = vadd.f32 %v5683_v26, %v5711_v29  ;;  %v7315_v29 = vld [vmem:[#allocation42_spill] sm:$0xff]  ;;  %v1652_v0 = vsel %vm1648_vm1, %v7306_v10, %v5417_v14  ;;  %vm5806_vm0 = vcmp.lt.s32.totalorder %v1362_v11, 240  ;;  %v7329_v11 = vld [vmem:[#allocation12_spill] sm:$0xff] }
 0x254   : > { %7302 = vst [vmem:[#allocation36_spill] sm:$0xff] %v5725_v17  ;;  %7304 = vst [vmem:[#allocation55_spill] sm:$0xff] %v5731_v39  ;;  %v5747_v42 = vpop.permute.xlu1 %1739  ;;  %v5753_v39 = vadd.f32 %v7310_v46, %v5092_v7  ;;  %v5773_v7 = vadd.f32 %v7315_v29, %v5112_v51  ;;  %v5865_v30 = vsel %vm1582_vm2, %v5331_v41, %v5354_v21  ;;  %v7356_v46 = vld [vmem:[#allocation54_spill] sm:$0xff] }
 0x255   : > { %vm5743_vm14 = vcmp.ge.s32.totalorder %v7307_v49, 1  ;;  %v5764_v49 = vsel %vm5550_vm3, %v1618_v63, %v7312_v33  ;;  %v5769_v17 = vsel %vm1549_vm5, %v1738_v5, %v5747_v42  ;;  %vm5785_vm3 = vcmp.ge.s32.totalorder %v1458_v35, 1  ;;  %v7321_v5 = vld [vmem:[#allocation5_spill] sm:$0xff]  ;;  %v7322_v33 = vld [vmem:[#allocation11_spill] sm:$0xff] }
 0x256   : > { %7311 = vst [vmem:[#allocation51_spill] sm:$0xff] %v5753_v39  ;;  %7313 = vst [vmem:[#allocation37_spill] sm:$0xff] %v5764_v49  ;;  %v1814_v60 = vadd.f32 %v5769_v17, %v5764_v49  ;;  %v5792_v29 = vsel %vm5596_vm4, %v1622_v58, %v7321_v5  ;;  %v5797_v10 = vsel %vm5446_vm11, %v1653_v38, %v7322_v33  ;;  %v7326_v38 = vand.u32 15, %v5476_v34 }
 0x257   : > { %7314 = vst [vmem:[#allocation26_spill] sm:$0xff] %v5769_v17  ;;  %7316 = vst [vmem:[#allocation39_spill] sm:$0xff] %v5773_v7  ;;  %v1678_v49 = vpop.permute.xlu0 %1677  ;;  %v1826_v17 = vadd.f32 %v1794_v40, %v5605_v12  ;;  %v1819_v26 = vadd.f32 %v5759_v53, %v5797_v10  ;;  %v1845_v40 = vadd.f32 %v1813_v28, %v5638_v20 }
 0x258   : > { %7323 = vst [vmem:[#allocation58_spill] sm:$0xff] %v5797_v10  ;;  %v1682_v27 = vsel %vm1615_vm8, %v5546_v62, %v1678_v49  ;;  %v5813_v58 = vpop.permute.xlu1 %1769  ;;  %vm5817_vm11 = vcmp.lt.s32.totalorder %v7326_v38, 15  ;;  %v1846_v5 = vadd.f32 %v1814_v60, %v5642_v56  ;;  %v5826_v33 = vsel %vm5480_vm13, %v1652_v0, %v7329_v11  ;;  %v7331_v10 = vld [vmem:[#allocation47_spill] sm:$0xff]  ;;  %v7332_v0 = vld [vmem:[#allocation33_spill] sm:$0xff] }
 0x259   : > { %7330 = vst [vmem:[#allocation62_spill] sm:$0xff] %v5826_v33  ;;  %v1715_v62 = vsel %vm1648_vm1, %v5473_v45, %v5528_v23  ;;  %v5835_v34 = vsel %vm5721_vm10, %v1682_v27, %v7331_v10  ;;  %v1780_v28 = vsel %vm1582_vm2, %v5429_v37, %v5813_v58  ;;  %v5848_v60 = vsel %vm5644_vm6, %v1551_v8, %v7332_v0  ;;  %v7333_v45 = vld [vmem:[#allocation23_spill] sm:$0xff] }
 0x25a   : > { %v5853_v10 = vsel %vm5456_vm12, %v1780_v28, %v7333_v45  ;;  %v1887_v27 = vadd.f32 %v1846_v5, %v1845_v40  ;;  %v5859_v37 = vsel %vm1549_vm5, %v5321_v6, %v5194_v55  ;;  %v1799_v8 = vadd.f32 %v5835_v34, %v5848_v60  ;;  %v7335_v40 = vld [vmem:[#allocation31_spill] sm:$0xff] }
 0x25b   : > { %7334 = vst [vmem:[#allocation40_spill] sm:$0xff] %v5853_v10  ;;  %v1820_v44 = vadd.f32 %v5853_v10, %v5826_v33  ;;  %v1680_v38 = vpop.permute.xlu0 %1679  ;;  %v5874_v5 = vsel %vm5715_vm9, %v1715_v62, %v7335_v40  ;;  %v1851_v28 = vadd.f32 %v1819_v26, %v5609_v43  ;;  %v7336_v0 = vld [vmem:[#allocation3_spill] sm:$0xff]  ;;  %v5893_v62 = vsel %vm1549_vm5, %v5516_v52, %v5442_v48  ;;  %v7340_v26 = vld [vmem:[#allocation48_spill] sm:$0xff]  ;;  %v7349_v10 = vld [vmem:[#allocation38_spill] sm:$0xff] }
 0x25c   : > { %v1681_v55 = vsel %vm1615_vm8, %v1678_v49, %v1680_v38  ;;  %v1688_v41 = vsel %vm1615_vm8, %v1680_v38, %v5168_v50  ;;  %v5881_v11 = vpop.permute.xlu1 %1644  ;;  %1888 = vadd.xlane.f32.xlu1 %v1887_v27  ;;  %v5887_v45 = vsel %vm5699_vm7, %v1557_v57, %v7336_v0  ;;  %vm5895_vm12 = vcmp.lt.s32.totalorder %v1458_v35, 15  ;;  %v7339_v50 = vld [vmem:[#allocation9_spill] sm:$0xff]  ;;  %v7343_v43 = vld [vmem:[#allocation35_spill] sm:$0xff] }
 0x25d   : > { %v5902_v27 = vsel %vm5743_vm14, %v1688_v41, %v7339_v50  ;;  %v5907_v57 = vsel %vm5785_vm3, %v1681_v55, %v7340_v26  ;;  %v1584_v48 = vsel %vm1582_vm2, %v5354_v21, %v5601_v25  ;;  %v1852_v38 = vadd.f32 %v1820_v44, %v5615_v47  ;;  %v7341_v55 = vld [vmem:[#allocation53_spill] sm:$0xff] }
 0x25e   : > { %v1793_v52 = vadd.f32 %v5902_v27, %v5887_v45  ;;  %v1800_v35 = vadd.f32 %v5907_v57, %v5893_v62  ;;  %v1651_v40 = vsel %vm1648_vm1, %v5417_v14, %v5464_v36  ;;  %v1590_v41 = vsel %vm1582_vm2, %v5557_v3, %v7341_v55  ;;  %v7342_v55 = vld [vmem:[#allocation17_spill] sm:$0xff] }
 0x25f   : > { %v1710_v0 = vpop.permute.xlu0 %1709  ;;  %v1831_v21 = vadd.f32 %v1799_v8, %v5673_v32  ;;  %v1805_v50 = vadd.f32 %v5874_v5, %v5865_v30  ;;  %v1878_v56 = vadd.f32 %v1852_v38, %v1851_v28  ;;  %v1810_v47 = vadd.f32 %v5859_v37, %v5792_v29  ;;  %v7383_v28 = vld [vmem:[#allocation57_spill] sm:$0xff] }
 0x260   : > { %v1714_v44 = vsel %vm1648_vm1, %v5528_v23, %v1710_v0  ;;  %v1772_v26 = vpop.permute.xlu1 %1771  ;;  %v1832_v20 = vadd.f32 %v1800_v35, %v5677_v61  ;;  %v1825_v14 = vadd.f32 %v1793_v52, %v5592_v54  ;;  %v5939_v8 = vsel %vm5779_vm15, %v1584_v48, %v7342_v55  ;;  %v7347_v35 = vld [vmem:[#allocation21_spill] sm:$0xff] }
 0x261   : > { %v5944_v33 = vsel %vm5817_vm11, %v1714_v44, %v7343_v43  ;;  %v7344_v23 = vand.u32 15, %v5544_v24  ;;  %v5957_v38 = vsel %vm5715_vm9, %v1651_v40, %v7347_v35  ;;  %1879 = vadd.xlane.f32.xlu0 %v1878_v56  ;;  %v5962_v43 = vsel %vm5806_vm0, %v1590_v41, %v7349_v10  ;;  %v7351_v41 = vld [vmem:[#allocation13_spill] sm:$0xff]  ;;  %v7353_v44 = vld [vmem:[#allocation60_spill] sm:$0xff]  ;;  %v7355_v35 = vld [vmem:[#allocation50_spill] sm:$0xff] }
 0x262   : > { %v1806_v52 = vadd.f32 %v5944_v33, %v5939_v8  ;;  %7348 = vst [vmem:[#allocation18_spill] sm:$0xff] %v5957_v38  ;;  %v1893_v48 = vadd.f32 %v1832_v20, %v1831_v21  ;;  %v1857_v55 = vadd.f32 %v1826_v17, %v1825_v14  ;;  %v5968_v24 = vsel %vm1582_vm2, %v5601_v25, %v5557_v3  ;;  %v7350_v20 = vld [vmem:[#allocation28_spill] sm:$0xff] }
 0x263   : > { %vm5948_vm13 = vcmp.lt.s32.totalorder %v7344_v23, 15  ;;  %v1623_v2 = vsel %vm1615_vm8, %v5649_v13, %v7305_v22  ;;  %v1774_v40 = vpop.permute.xlu0 %1773  ;;  %v1837_v56 = vadd.f32 %v1805_v50, %v5627_v16  ;;  %v1616_v17 = vsel %vm1615_vm8, %v7350_v20, %v5649_v13  ;;  %v7352_v50 = vld [vmem:[#allocation52_spill] sm:$0xff]  ;;  %v7354_v23 = vld [vmem:[#allocation6_spill] sm:$0xff] }
 0x264   : > { %v1650_v10 = vsel %vm1648_vm1, %v5464_v36, %v5881_v11  ;;  %v1778_v25 = vsel %vm1582_vm2, %v1772_v26, %v1774_v40  ;;  %v1712_v3 = vpop.permute.xlu1 %1711  ;;  %1894 = vadd.xlane.f32.xlu1 %v1893_v48  ;;  %v1838_v22 = vadd.f32 %v1806_v52, %v7351_v41  ;;  %v1617_v21 = vsel %vm1615_vm8, %v5386_v31, %v7350_v20  ;;  %v7357_v20 = vld [vmem:[#allocation29_spill] sm:$0xff] }
 0x265   : > { %v5993_v13 = vsel %vm5779_vm15, %v1778_v25, %v7352_v50  ;;  %v1713_v36 = vsel %vm1648_vm1, %v1710_v0, %v1712_v3  ;;  %v1720_v14 = vsel %vm1648_vm1, %v1712_v3, %v7353_v44  ;;  %v6003_v52 = vsel %vm5743_vm14, %v1623_v2, %v7354_v23  ;;  %1858 = vadd.xlane.f32.xlu0 %v1857_v55  ;;  %v7367_v23 = vld [vmem:[#allocation36_spill] sm:$0xff] }
 0x266   : > { %v6008_v31 = vsel %vm5948_vm13, %v1713_v36, %v7355_v35  ;;  %v6013_v48 = vsel %vm5895_vm12, %v1720_v14, %v7356_v46  ;;  %v1884_v0 = vadd.f32 %v1838_v22, %v1837_v56  ;;  %v6018_v25 = vsel %vm5817_vm11, %v1650_v10, %v7357_v20  ;;  %v7359_v36 = vld [vmem:[#allocation45_spill] sm:$0xff]  ;;  %v7361_v56 = vld [vmem:[#allocation43_spill] sm:$0xff]  ;;  %v7363_v22 = vld [vmem:[#allocation56_spill] sm:$0xff] }
 0x267   : > { %7358 = vst [vmem:[#allocation42_spill] sm:$0xff] %v6018_v25  ;;  %v6023_v59 = vsel %vm1582_vm2, %v5813_v58, %v1772_v26  ;;  %v1807_v2 = vadd.f32 %v6008_v31, %v5968_v24  ;;  %v1808_v3 = vadd.f32 %v6013_v48, %v5962_v43  ;;  %v1742_v50 = vpop.permute.xlu0 %1741  ;;  %v6032_v55 = vsel %vm5721_vm10, %v1617_v21, %v7359_v36  ;;  %v7369_v46 = vld [vmem:[#allocation34_spill] sm:$0xff] }
 0x268   : > { %7360 = vst [vmem:[#allocation5_spill] sm:$0xff] %v6032_v55  ;;  %v1822_v4 = vadd.f32 %v5993_v13, %v6018_v25  ;;  %v1746_v58 = vsel %vm1549_vm5, %v5747_v42, %v1742_v50  ;;  %v1744_v26 = vpop.permute.xlu1 %1743  ;;  %v6042_v10 = vsel %vm5785_vm3, %v1616_v17, %v7361_v56  ;;  %v7366_v42 = vld [vmem:[#allocation7_spill] sm:$0xff]  ;;  %v1649_v63 = vsel %vm1648_vm1, %v5881_v11, %v7367_v23  ;;  %v7368_v17 = vld [vmem:[#allocation14_spill] sm:$0xff] }
 0x269   : > { %7362 = vst [vmem:[#allocation11_spill] sm:$0xff] %v6042_v10  ;;  %v6047_v44 = vsel %vm5644_vm6, %v1746_v58, %v7363_v22  ;;  %v6051_v18 = vsel %vm1549_vm5, %v1742_v50, %v1744_v26  ;;  %v1752_v21 = vsel %vm1549_vm5, %v1744_v26, %v5321_v6  ;;  %v1839_v14 = vadd.f32 %v1807_v2, %v7366_v42  ;;  %v7370_v50 = vld [vmem:[#allocation59_spill] sm:$0xff]  ;;  %v7373_v26 = vld [vmem:[#allocation4_spill] sm:$0xff]  ;;  %v7374_v22 = vld [vmem:[#allocation25_spill] sm:$0xff] }
 0x26a   : > { %7364 = vst [vmem:[#allocation12_spill] sm:$0xff] %v6047_v44  ;;  %7365 = vst [vmem:[#allocation47_spill] sm:$0xff] %v6051_v18  ;;  %v1821_v9 = vadd.f32 %v6023_v59, %v5957_v38  ;;  %v6066_v35 = vsel %vm5699_vm7, %v1752_v21, %v7368_v17  ;;  %1885 = vadd.xlane.f32.xlu0 %v1884_v0  ;;  %v1840_v20 = vadd.f32 %v1808_v3, %v7369_v46  ;;  %vm1915_vm5 = vcmask 23552  }
 0x26b   : > { %v1656_v6 = vsel %vm1648_vm1, %v7367_v23, %v7370_v50  ;;  %v1815_v2 = vadd.f32 %v6047_v44, %v6032_v55  ;;  %v1809_v11 = vadd.f32 %v6066_v35, %v6003_v52  ;;  %v1816_v36 = vadd.f32 %v6051_v18, %v6042_v10  ;;  %v7375_v23 = vld [vmem:[#allocation49_spill] sm:$0xff]  ;;  %v7378_v10 = vld [vmem:[#allocation74_spill] sm:$0xff] }
 0x26c   : > { %v6081_v58 = vadd.f32 %v7371_v15, %v5112_v51  ;;  %v1776_v0 = vpop.permute.xlu1 %1775  ;;  %v1896_v3 = vadd.f32 %v1840_v20, %v1839_v14  ;;  %v1842_v56 = vadd.f32 %v1810_v47, %v7373_v26  ;;  %v1854_v21 = vadd.f32 %v1822_v4, %v7374_v22  ;;  %v7379_v15 = vld [vmem:[#allocation2_spill] sm:$0xff]  ;;  %v7382_v4 = vld [vmem:[#allocation24_spill] sm:$0xff] }
 0x26d   : > { %v6088_v17 = vsel %vm5948_vm13, %v1649_v63, %v7375_v23  ;;  %v6092_v50 = vsel %vm1582_vm2, %v1774_v40, %v1776_v0  ;;  %v1784_v51 = vsel %vm1582_vm2, %v1776_v0, %v7378_v10  ;;  %v1841_v55 = vadd.f32 %v1809_v11, %v7379_v15  ;;  %v7380_v14 = vld [vmem:[#allocation46_spill] sm:$0xff]  ;;  %v7385_v11 = vld [vmem:[#allocation55_spill] sm:$0xff] }
 0x26e   : > { %7372 = vst [vmem:[#allocation33_spill] sm:$0xff] %v6081_v58  ;;  %7376 = vst [vmem:[#allocation23_spill] sm:$0xff] %v6088_v17  ;;  %v6101_v47 = vsel %vm5895_vm12, %v1656_v6, %v7380_v14  ;;  %v1853_v20 = vadd.f32 %v1821_v9, %v7382_v4  ;;  %v6107_v63 = vsel %vm5806_vm0, %v1784_v51, %v7383_v28  ;;  %1897 = vadd.xlane.f32.xlu0 %v1896_v3  ;;  %v223_v3 = vld [vmem:[%s6994_s2 + $0x60] sm:$0xff]  ;;  %vm7386_vm0 = vcmask 261120  }
 0x26f   : > { %7377 = vst [vmem:[#allocation31_spill] sm:$0xff] %v6092_v50  ;;  %7381 = vst [vmem:[#allocation3_spill] sm:$0xff] %v6101_v47  ;;  %v1823_v40 = vadd.f32 %v6092_v50, %v6088_v17  ;;  %v1824_v1 = vadd.f32 %v6107_v63, %v6101_v47  ;;  %v1863_v10 = vadd.f32 %v1842_v56, %v1841_v55  ;;  %3714 = vmatprep.mubr.msk.f32.mxu0 %vm7386_vm0, %v223_v3  ;;  %vm1905_vm1 = vcmask 7168  }
 0x270   : > { %7384 = vst [vmem:[#allocation9_spill] sm:$0xff] %v6107_v63  ;;  %v1847_v0 = vadd.f32 %v1815_v2, %v7385_v11  ;;  %v1848_v49 = vadd.f32 %v1816_v36, %v5753_v39  ;;  %v1890_v9 = vadd.f32 %v1854_v21, %v1853_v20  ;;  %vm1910_vm2 = vcmask 15360   ;;  %vm7387_vm8 = vmmov %vm7386_vm0 }
 0x271   : > { %v1855_v6 = vadd.f32 %v1823_v40, %v5773_v7  ;;  %1864 = vadd.xlane.f32.xlu1 %v1863_v10  ;;  %v1856_v19 = vadd.f32 %v1824_v1, %v6081_v58  ;;  %vm7388_vm4 = vmmov %vm7386_vm0 }
 0x272   : > { %1891 = vadd.xlane.f32.xlu0 %v1890_v9  ;;  %v1899_v51 = vadd.f32 %v1848_v49, %v1847_v0  ;;  %vm7389_vm6 = vmmov %vm7386_vm0 }
 0x273   : > { %v1902_v23 = vadd.f32 %v1856_v19, %v1855_v6  ;;  %vm7391_vm7 = vmmov %vm7386_vm0 }
 0x274   : > { %vm7392_vm9 = vmmov %vm7386_vm0 }
 0x275   : > { %1900 = vadd.xlane.f32.xlu1 %v1899_v51  ;;  %vm7393_vm10 = vmmov %vm7386_vm0 }
 0x276   : > { %1903 = vadd.xlane.f32.xlu0 %v1902_v23  ;;  %vm7394_vm14 = vmmov %vm7386_vm0 }
 0x277   : > { %vm7395_vm15 = vmmov %vm7386_vm0 }
 0x278   : > { %vm7396_vm3 = vmmov %vm7386_vm0 }
 0x279   : > { %vm7397_vm11 = vmmov %vm7386_vm0 }
 0x27a   : > { %vm7398_vm12 = vmmov %vm7386_vm0 }
 0x27b   : > { %vm7399_vm13 = vmmov %vm7386_vm0 }
 0x2ae   : > { %v1862_v36 = vpop.xlane.xlu1 %1861 }
 0x2b1   : > { %v1871_v55 = vpop.xlane.xlu0 %1870 }
 0x2c1   : > { %v1868_v2 = vpop.xlane.xlu0 %1867 }
 0x2c8   : > { %v1877_v14 = vpop.xlane.xlu1 %1876 }
 0x2d6   : > { %v1874_v56 = vpop.xlane.xlu0 %1873 }
 0x2d7   : > { %v1907_v49 = vsel %vm1905_vm1, %v1862_v36, %v1874_v56 }
 0x2dd   : > { %v1883_v20 = vpop.xlane.xlu1 %1882 }
 0x2e9   : > { %v1889_v40 = vpop.xlane.xlu1 %1888 }
 0x2ee   : > { %v1880_v21 = vpop.xlane.xlu0 %1879 }
 0x2f1   : > { %v1895_v6 = vpop.xlane.xlu1 %1894 }
 0x2f2   : > { %v1859_v28 = vpop.xlane.xlu0 %1858 }
 0x2f3   : > { %v1906_v1 = vsel %vm1905_vm1, %v1859_v28, %v1871_v55 }
 0x2f4   : > { %v1911_v0 = vsel %vm1910_vm2, %v1906_v1, %v1883_v20  ;;  %v1909_v20 = vsel %vm1905_vm1, %v1868_v2, %v1880_v21  ;;  %v225_v2 = vld [vmem:[%s6994_s2 + $0x70] sm:$0xff]  ;;  %v227_v21 = vld [vmem:[%s6994_s2 + $0x80] sm:$0xff] }
 0x2f5   : > { %v1916_v23 = vsel %vm1915_vm5, %v1911_v0, %v1895_v6  ;;  %3728 = vmatprep.mubr.msk.f32.mxu1 %vm7391_vm7, %v227_v21  ;;  %vm7460_vm7 = vmmov %vm7386_vm0 }
 0x2f7   : > { %v1886_v10 = vpop.xlane.xlu0 %1885 }
 0x2f8   : > { %v1912_v9 = vsel %vm1910_vm2, %v1907_v49, %v1886_v10 }
 0x2fb   : > { %v1898_v19 = vpop.xlane.xlu0 %1897 }
 0x2fc   : > { %v1917_v51 = vsel %vm1915_vm5, %v1912_v9, %v1898_v19 }
 0x2fd   : > { %v3778_v3 = vpack.c.bf16 %v1917_v51, %v1916_v23 }
 0x2fe   : > { %v1865_v58 = vpop.xlane.xlu1 %1864 }
 0x2ff   : > { %v1908_v7 = vsel %vm1905_vm1, %v1865_v58, %v1877_v14  ;;  %3779 = vmatprep.subr.bf16.mxu0 %v3778_v3  ;;  %v1892_v55 = vpop.xlane.xlu0 %1891  ;;  %v224_v58 = vld [vmem:[%s6994_s2 + $0x68] sm:$0xff]  ;;  %v7390_v14 = vmov 0.0   ;;  %vm7400_vm1 = vmmov %vm7386_vm0 }
 0x300   : > { %3781 = vmatpush3.bf16.msra.mxu0 %v3778_v3  ;;  %v1913_v28 = vsel %vm1910_vm2, %v1908_v7, %v1889_v40  ;;  %v1914_v56 = vsel %vm1910_vm2, %v1909_v20, %v1892_v55  ;;  %v226_v7 = vld [vmem:[%s6994_s2 + $0x78] sm:$0xff]  ;;  %vm7401_vm2 = vmmov %vm7386_vm0 }
 0x302   : > { %v1901_v36 = vpop.xlane.xlu1 %1900 }
 0x303   : > { %v1918_v1 = vsel %vm1915_vm5, %v1913_v28, %v1901_v36  ;;  %v1904_v10 = vpop.xlane.xlu0 %1903 }
 0x304   : > { %v1919_v0 = vsel %vm1915_vm5, %v1914_v56, %v1904_v10  ;;  %vm7435_vm5 = vmmov %vm7386_vm0 }
 0x305   : > { %v3782_v49 = vpack.c.bf16 %v1919_v0, %v1918_v1 }
 0x307   : > { %3783 = vmatprep.subr.bf16.mxu0 %v3782_v49 }
 0x308   : > { %3785 = vmatpush3.bf16.msra.mxu0 %v3782_v49 }
 0x30b   : > { %3715 = vmatmul.mubr.msk.f32.vlgmr.msra.gmra.mrb[44].mxu0 %vm7387_vm8, %v224_v58  ;;  %vm7436_vm8 = vmmov %vm7386_vm0 }
 0x30c   : > { %3717 = vmatprep.mubr.msk.f32.mxu0 %vm7388_vm4, %v225_v2  ;;  %vm7437_vm4 = vmmov %vm7386_vm0 }
 0x30f   : > { %3718 = vmatmul.mubr.msk.f32.gmra.mrb[46].mxu0 %vm7389_vm6, %v226_v7  ;;  %vm7439_vm6 = vmmov %vm7386_vm0 }
 0x310   : > { %2746 = vmatprep.mubr.f32.mxu0 %v7390_v14 }
 0x3de   : > { %v3716_v40 = vpop.f32.mrb[44].mxu0 }
 0x3df   : > { %v2018_v6 = vmul.f32 %v3716_v40, %v3716_v40  ;;  %v1998_v9 = vpop.f32.mrb[45].mxu0 }
 0x3e0   : > { %v2017_v19 = vmul.f32 %v1998_v9, %v1998_v9 }
 0x3e1   : > { %v2022_v23 = vmul.f32 %v3716_v40, %v2018_v6 }
 0x3e2   : > { %v2021_v51 = vmul.f32 %v2017_v19, %v1998_v9  ;;  %v3719_v3 = vpop.f32.mrb[46].mxu0 }
 0x3e3   : > { %v2026_v55 = vmul.f32 0.044715, %v2022_v23  ;;  %v2020_v20 = vmul.f32 %v3719_v3, %v3719_v3  ;;  %v2008_v28 = vpop.f32.mrb[47].mxu0 }
 0x3e4   : > { %v2025_v36 = vmul.f32 0.044715, %v2021_v51  ;;  %v2019_v56 = vmul.f32 %v2008_v28, %v2008_v28 }
 0x3e5   : > { %v2030_v1 = vadd.f32 %v3716_v40, %v2026_v55  ;;  %v2024_v10 = vmul.f32 %v3719_v3, %v2020_v20 }
 0x3e6   : > { %v2029_v0 = vadd.f32 %v2025_v36, %v1998_v9  ;;  %v2023_v49 = vmul.f32 %v2019_v56, %v2008_v28 }
 0x3e7   : > { %v2034_v58 = vmul.f32 0.7978846, %v2030_v1  ;;  %v2028_v2 = vmul.f32 0.044715, %v2024_v10 }
 0x3e8   : > { %v2033_v7 = vmul.f32 0.7978846, %v2029_v0  ;;  %v2027_v21 = vmul.f32 0.044715, %v2023_v49 }
 0x3e9   : > { %3895 = vtanh.f32 %v2034_v58  ;;  %v2032_v39 = vadd.f32 %v3719_v3, %v2028_v2 }
 0x3ea   : > { %3897 = vtanh.f32 %v2033_v7  ;;  %v2031_v11 = vadd.f32 %v2027_v21, %v2008_v28 }
 0x3eb   : > { %v2036_v6 = vmul.f32 0.7978846, %v2032_v39 }
 0x3ec   : > { %v2035_v19 = vmul.f32 0.7978846, %v2031_v11 }
 0x3ed   : > { %3899 = vtanh.f32 %v2036_v6  ;;  %v234_v6 = vld [vmem:[%s6994_s2 + $0xb8] sm:$0xff] }
 0x3ee   : > { %3901 = vtanh.f32 %v2035_v19  ;;  %v235_v19 = vld [vmem:[%s6994_s2 + $0xc0] sm:$0xff] }
 0x3f3   : > { %v3896_v23 = vpop.eup %3895 }
 0x3f4   : > { %v3898_v63 = vpop.eup %3897  ;;  %v2042_v51 = vadd.f32 1.0, %v3896_v23  ;;  %v236_v23 = vld [vmem:[%s6994_s2 + $0xc8] sm:$0xff] }
 0x3f5   : > { %v2041_v50 = vadd.f32 1.0, %v3898_v63  ;;  %v228_v63 = vld [vmem:[%s6994_s2 + $0x88] sm:$0xff] }
 0x3f6   : > { %v2046_v55 = vmul.f32 0.5, %v2042_v51  ;;  %v237_v51 = vld [vmem:[%s6994_s2 + $0xd0] sm:$0xff] }
 0x3f7   : > { %v3900_v20 = vpop.eup %3899  ;;  %v2045_v36 = vmul.f32 0.5, %v2041_v50  ;;  %v229_v50 = vld [vmem:[%s6994_s2 + $0x90] sm:$0xff] }
 0x3f8   : > { %v3902_v56 = vpop.eup %3901  ;;  %v2050_v1 = vmul.f32 %v3716_v40, %v2046_v55  ;;  %v2044_v10 = vadd.f32 1.0, %v3900_v20  ;;  %v230_v40 = vld [vmem:[%s6994_s2 + $0x98] sm:$0xff] }
 0x3f9   : > { %v2049_v0 = vmul.f32 %v2045_v36, %v1998_v9  ;;  %v2043_v49 = vadd.f32 1.0, %v3902_v56  ;;  %v231_v9 = vld [vmem:[%s6994_s2 + $0xa0] sm:$0xff]  ;;  %v238_v55 = vld [vmem:[%s6994_s2 + $0xd8] sm:$0xff] }
 0x3fa   : > { %v2048_v58 = vmul.f32 0.5, %v2044_v10 }
 0x3fb   : > { %v2047_v2 = vmul.f32 0.5, %v2043_v49  ;;  %v3786_v7 = vpack.c.bf16 %v2050_v1, %v2049_v0 }
 0x3fc   : > { %v2052_v21 = vmul.f32 %v3719_v3, %v2048_v58  ;;  %v232_v3 = vld [vmem:[%s6994_s2 + $0xa8] sm:$0xff] }
 0x3fd   : > { %v2051_v39 = vmul.f32 %v2047_v2, %v2008_v28  ;;  %3787 = vmatprep.subr.bf16.mxu1 %v3786_v7  ;;  %v233_v28 = vld [vmem:[%s6994_s2 + $0xb0] sm:$0xff] }
 0x3fe   : > { %3789 = vmatpush3.bf16.msra.mxu1 %v3786_v7 }
 0x3ff   : > { %v3790_v11 = vpack.c.bf16 %v2052_v21, %v2051_v39 }
 0x401   : > { %3791 = vmatprep.subr.bf16.mxu1 %v3790_v11 }
 0x402   : > { %3793 = vmatpush3.bf16.msra.mxu1 %v3790_v11 }
 0x405   : > { %3729 = vmatmul.mubr.msk.f32.vlgmr.msra.gmra.mrb[52].mxu1 %vm7392_vm9, %v228_v63  ;;  %vm7463_vm9 = vmmov %vm7386_vm0 }
 0x406   : > { %3731 = vmatprep.mubr.msk.f32.mxu1 %vm7393_vm10, %v229_v50  ;;  %vm7472_vm10 = vmmov %vm7386_vm0 }
 0x409   : > { %3732 = vmatmul.mubr.msk.f32.gmra.mrb[54].mxu1 %vm7394_vm14, %v230_v40  ;;  %vm7475_vm14 = vmmov %vm7386_vm0 }
 0x40a   : > { %3734 = vmatprep.mubr.msk.f32.mxu1 %vm7395_vm15, %v231_v9  ;;  %vm7476_vm15 = vmmov %vm7386_vm0 }
 0x40d   : > { %3735 = vmatmul.mubr.msk.f32.gmra.mrb[56].mxu1 %vm7396_vm3, %v232_v3  ;;  %vm7477_vm3 = vmmov %vm7386_vm0 }
 0x40e   : > { %3737 = vmatprep.mubr.msk.f32.mxu1 %vm7397_vm11, %v233_v28  ;;  %vm7478_vm11 = vmmov %vm7386_vm0 }
 0x411   : > { %3738 = vmatmul.mubr.msk.f32.gmra.mrb[58].mxu1 %vm7398_vm12, %v234_v6  ;;  %vm7479_vm12 = vmmov %vm7386_vm0 }
 0x412   : > { %3740 = vmatprep.mubr.msk.f32.mxu1 %vm7399_vm13, %v235_v19  ;;  %vm7480_vm13 = vmmov %vm7386_vm0 }
 0x415   : > { %3741 = vmatmul.mubr.msk.f32.gmra.mrb[60].mxu1 %vm7386_vm0, %v236_v23 }
 0x416   : > { %3743 = vmatprep.mubr.msk.f32.mxu1 %vm7400_vm1, %v237_v51  ;;  %vm7481_vm1 = vmmov %vm7386_vm0 }
 0x419   : > { %3744 = vmatmul.mubr.msk.f32.gmra.mrb[62].mxu1 %vm7401_vm2, %v238_v55  ;;  %vm7482_vm2 = vmmov %vm7386_vm0 }
 0x41a   : > { %2924 = vmatprep.mubr.f32.mxu1 %v7390_v14 }
 0x4d8   : > { %v3730_v20 = vpop.f32.mrb[52].mxu1 }
 0x4d9   : > { %v2155_v36 = vpop.f32.mrb[53].mxu1 }
 0x4dc   : > { %v3733_v56 = vpop.f32.mrb[54].mxu1 }
 0x4dd   : > { %v2165_v1 = vpop.f32.mrb[55].mxu1 }
 0x4e0   : > { %v3736_v10 = vpop.f32.mrb[56].mxu1 }
 0x4e1   : > { %v2215_v0 = vmax.f32 %v3730_v20, %v3736_v10  ;;  %v2175_v49 = vpop.f32.mrb[57].mxu1 }
 0x4e2   : > { %v2214_v58 = vmax.f32 %v2155_v36, %v2175_v49 }
 0x4e4   : > { %v3739_v2 = vpop.f32.mrb[58].mxu1 }
 0x4e5   : > { %v2217_v7 = vmax.f32 %v3733_v56, %v3739_v2  ;;  %v2185_v21 = vpop.f32.mrb[59].mxu1 }
 0x4e6   : > { %v2216_v39 = vmax.f32 %v2165_v1, %v2185_v21 }
 0x4e8   : > { %v3742_v11 = vpop.f32.mrb[60].mxu1 }
 0x4e9   : > { %v2219_v63 = vmax.f32 %v2215_v0, %v3742_v11  ;;  %v2195_v50 = vpop.f32.mrb[61].mxu1 }
 0x4ea   : > { %v2218_v40 = vmax.f32 %v2214_v58, %v2195_v50 }
 0x4eb   : > { %v2223_v9 = vsub.f32 %v3730_v20, %v2219_v63  ;;  %v2235_v3 = vsub.f32 %v3736_v10, %v2219_v63  ;;  %v2247_v28 = vsub.f32 %v3742_v11, %v2219_v63 }
 0x4ec   : > { %v2222_v6 = vsub.f32 %v2155_v36, %v2218_v40  ;;  %v2234_v19 = vsub.f32 %v2175_v49, %v2218_v40  ;;  %v2246_v23 = vsub.f32 %v2195_v50, %v2218_v40  ;;  %v3745_v51 = vpop.f32.mrb[62].mxu1 }
 0x4ed   : > { %v2228_v55 = vmul.f32 1.442695, %v2223_v9  ;;  %v2240_v18 = vmul.f32 1.442695, %v2235_v3  ;;  %v2252_v44 = vmul.f32 1.442695, %v2247_v28  ;;  %v2221_v47 = vmax.f32 %v2217_v7, %v3745_v51 }
 0x4ee   : > { %v2226_v17 = vmul.f32 1.442695, %v2222_v6  ;;  %v2238_v22 = vmul.f32 1.442695, %v2234_v19  ;;  %v2205_v0 = vpop.f32.mrb[63].mxu1 }
 0x4ef   : > { %3903 = vpow2.f32 %v2228_v55  ;;  %v2225_v4 = vsub.f32 %v3733_v56, %v2221_v47  ;;  %v2237_v25 = vsub.f32 %v3739_v2, %v2221_v47  ;;  %v2249_v38 = vsub.f32 %v3745_v51, %v2221_v47 }
 0x4f0   : > { %3905 = vpow2.f32 %v2240_v18  ;;  %v2250_v58 = vmul.f32 1.442695, %v2246_v23  ;;  %v2220_v20 = vmax.f32 %v2216_v39, %v2205_v0 }
 0x4f1   : > { %3907 = vpow2.f32 %v2252_v44  ;;  %v2232_v10 = vmul.f32 1.442695, %v2225_v4  ;;  %v2244_v36 = vmul.f32 1.442695, %v2237_v25  ;;  %v2256_v50 = vmul.f32 1.442695, %v2249_v38 }
 0x4f2   : > { %3909 = vpow2.f32 %v2226_v17  ;;  %v2224_v49 = vsub.f32 %v2165_v1, %v2220_v20  ;;  %v2236_v11 = vsub.f32 %v2185_v21, %v2220_v20  ;;  %v2248_v63 = vsub.f32 %v2205_v0, %v2220_v20 }
 0x4f3   : > { %3911 = vpow2.f32 %v2238_v22 }
 0x4f4   : > { %3913 = vpow2.f32 %v2250_v58  ;;  %v2230_v7 = vmul.f32 1.442695, %v2224_v49  ;;  %v2242_v40 = vmul.f32 1.442695, %v2236_v11  ;;  %v2254_v47 = vmul.f32 1.442695, %v2248_v63 }
 0x4f5   : > { %3915 = vpow2.f32 %v2232_v10 }
 0x4f6   : > { %3917 = vpow2.f32 %v2244_v36 }
 0x4f7   : > { %3919 = vpow2.f32 %v2256_v50 }
 0x4f8   : > { %3921 = vpow2.f32 %v2230_v7  ;;  %v3997_v7 = vmov 1  }
 0x4f9   : > { %v3904_v18 = vpop.eup %3903  ;;  %3923 = vpow2.f32 %v2242_v40 }
 0x4fa   : > { %v3906_v56 = vpop.eup %3905  ;;  %3925 = vpow2.f32 %v2254_v47 }
 0x4fb   : > { %v3908_v44 = vpop.eup %3907  ;;  %v2259_v4 = vadd.f32 %v3906_v56, %v3904_v18 }
 0x4fc   : > { %v3910_v25 = vpop.eup %3909 }
 0x4fd   : > { %v3912_v17 = vpop.eup %3911  ;;  %v2263_v1 = vadd.f32 %v3908_v44, %v2259_v4 }
 0x4fe   : > { %v3914_v2 = vpop.eup %3913  ;;  %v2258_v22 = vadd.f32 %v3912_v17, %v3910_v25 }
 0x4ff   : > { %v3916_v38 = vpop.eup %3915  ;;  %3927 = vrcp.f32 %v2263_v1  ;;  %v3999_v1 = vmov 3  }
 0x500   : > { %v3918_v21 = vpop.eup %3917  ;;  %v2262_v39 = vadd.f32 %v3914_v2, %v2258_v22 }
 0x501   : > { %v3920_v9 = vpop.eup %3919  ;;  %v2261_v3 = vadd.f32 %v3918_v21, %v3916_v38 }
 0x502   : > { %v3922_v28 = vpop.eup %3921  ;;  %3929 = vrcp.f32 %v2262_v39 }
 0x503   : > { %v3924_v6 = vpop.eup %3923  ;;  %v2265_v19 = vadd.f32 %v3920_v9, %v2261_v3 }
 0x504   : > { %v2260_v23 = vadd.f32 %v3924_v6, %v3922_v28  ;;  %v3926_v51 = vpop.eup %3925 }
 0x505   : > { %3931 = vrcp.f32 %v2265_v19  ;;  %v7404_v19 = vld [vmem:[#allocation88_spill] sm:$0xff] }
 0x506   : > { %v2264_v55 = vadd.f32 %v3926_v51, %v2260_v23 }
 0x508   : > { %3933 = vrcp.f32 %v2264_v55  ;;  %v7405_v55 = vld [vmem:[#allocation91_spill] sm:$0xff] }
 0x509   : > { %v3928_v0 = vpop.eup %3927 }
 0x50a   : > { %v2279_v58 = vmul.f32 %v3928_v0, %v3906_v56  ;;  %v2275_v20 = vmul.f32 %v3928_v0, %v3904_v18  ;;  %v6195_v10 = vmul.f32 %v3928_v0, %v3908_v44 }
 0x50c   : > { %v3930_v36 = vpop.eup %3929  ;;  %2321 = vperm.xlu1 %3848, %v2279_v58   ;;  %2293 = vperm.xlu0 %3847, %v2275_v20  }
 0x50d   : > { %v2282_v49 = vmul.f32 %v3930_v36, %v3914_v2  ;;  %v2274_v11 = vmul.f32 %v3930_v36, %v3910_v25  ;;  %v2278_v63 = vmul.f32 %v3930_v36, %v3912_v17  ;;  %v3998_v17 = vmov 2  }
 0x50e   : > { %v7402_v2 = vmov 0  }
 0x50f   : > { %v3932_v50 = vpop.eup %3931 }
 0x510   : > { %2357 = vperm.xlu1 %3848, %v6195_v10   ;;  %3850 = vset.pattern.permute.xlu0 %v3997_v7  ;;  %v6199_v40 = vmul.f32 %v3932_v50, %v3916_v38  ;;  %v6201_v47 = vmul.f32 %v3932_v50, %v3918_v21  ;;  %v6203_v56 = vmul.f32 %v3932_v50, %v3920_v9 }
 0x511   : > { %2415 = vperm.xlu0 %3850, %v2279_v58  }
 0x512   : > { %v3934_v18 = vpop.eup %3933 }
 0x513   : > { %v6205_v44 = vmul.f32 %v3934_v18, %v3922_v28  ;;  %v6207_v4 = vmul.f32 %v3934_v18, %v3924_v6  ;;  %v6209_v25 = vmul.f32 %v3934_v18, %v3926_v51  ;;  %v7403_v28 = vld [vmem:[#allocation87_spill] sm:$0xff] }
 0x514   : > { %3849 = vset.pattern.permute.xlu1 %v3997_v7 }
 0x515   : > { %2391 = vperm.xlu1 %3849, %v2275_v20   ;;  %2447 = vperm.xlu0 %3850, %v6195_v10  }
 0x519   : > { %3852 = vset.pattern.permute.xlu1 %v3998_v17  ;;  %3851 = vset.pattern.permute.xlu0 %v3998_v17 }
 0x51a   : > { %2503 = vperm.xlu1 %3852, %v2279_v58   ;;  %2479 = vperm.xlu0 %3851, %v2275_v20  }
 0x51e   : > { %3853 = vset.pattern.permute.xlu1 %v3999_v1  ;;  %3854 = vset.pattern.permute.xlu0 %v3999_v1 }
 0x51f   : > { %2567 = vperm.xlu1 %3853, %v2275_v20   ;;  %2591 = vperm.xlu0 %3854, %v2279_v58  }
 0x523   : > { %2623 = vperm.xlu1 %3853, %v6195_v10   ;;  %3856 = vset.pattern.permute.xlu0 %v7402_v2 }
 0x524   : > { %2352 = vperm.xlu0 %3856, %v2282_v49  }
 0x527   : > { %3855 = vset.pattern.permute.xlu1 %v7402_v2 }
 0x528   : > { %3857 = vset.pattern.permute.xlu0 %v3997_v7  ;;  %2288 = vperm.xlu1 %3855, %v2274_v11  }
 0x529   : > { %2387 = vperm.xlu0 %3857, %v2274_v11  }
 0x52c   : > { %2316 = vperm.xlu1 %3855, %v2278_v63  }
 0x52d   : > { %3860 = vset.pattern.permute.xlu0 %v3999_v1 }
 0x52e   : > { %2563 = vperm.xlu0 %3860, %v2274_v11  }
 0x530   : > { %3858 = vset.pattern.permute.xlu1 %v3997_v7 }
 0x531   : > { %2411 = vperm.xlu1 %3858, %v2278_v63  }
 0x532   : > { %3865 = vset.pattern.permute.xlu0 %v3997_v7 }
 0x533   : > { %2399 = vperm.xlu0 %3865, %v6199_v40  }
 0x535   : > { %2443 = vperm.xlu1 %3858, %v2282_v49  }
 0x537   : > { %2423 = vperm.xlu0 %3865, %v6201_v47  }
 0x539   : > { %3859 = vset.pattern.permute.xlu1 %v3998_v17 }
 0x53a   : > { %2475 = vperm.xlu1 %3859, %v2274_v11   ;;  %v200_v11 = vld [vmem:[%s6993_s1 + $0xa8] sm:$0xff] }
 0x53b   : > { %2455 = vperm.xlu0 %3865, %v6203_v56  }
 0x53e   : > { %2499 = vperm.xlu1 %3859, %v2278_v63  }
 0x53f   : > { %3868 = vset.pattern.permute.xlu0 %v3999_v1 }
 0x540   : > { %2599 = vperm.xlu0 %3868, %v6201_v47  }
 0x542   : > { %3861 = vset.pattern.permute.xlu1 %v3999_v1 }
 0x543   : > { %2587 = vperm.xlu1 %3861, %v2278_v63   ;;  %v199_v63 = vld [vmem:[%s6993_s1 + $0xa0] sm:$0xff] }
 0x544   : > { %3869 = vset.pattern.permute.xlu0 %v7402_v2 }
 0x545   : > { %2298 = vperm.xlu0 %3869, %v6205_v44  }
 0x547   : > { %3862 = vset.pattern.permute.xlu1 %v3998_v17 }
 0x548   : > { %2531 = vperm.xlu1 %3862, %v2282_v49  }
 0x549   : > { %2326 = vperm.xlu0 %3869, %v6207_v4  }
 0x54c   : > { %3863 = vset.pattern.permute.xlu1 %v3999_v1 }
 0x54d   : > { %2619 = vperm.xlu1 %3863, %v2282_v49   ;;  %2362 = vperm.xlu0 %3869, %v6209_v25  }
 0x551   : > { %3864 = vset.pattern.permute.xlu1 %v7402_v2  ;;  %3870 = vset.pattern.permute.xlu0 %v3998_v17 }
 0x552   : > { %2303 = vperm.xlu1 %3864, %v6199_v40   ;;  %2535 = vperm.xlu0 %3870, %v6195_v10  }
 0x556   : > { %2331 = vperm.xlu1 %3864, %v6201_v47   ;;  %2483 = vperm.xlu0 %3870, %v6205_v44  }
 0x55a   : > { %2367 = vperm.xlu1 %3864, %v6203_v56   ;;  %2507 = vperm.xlu0 %3870, %v6207_v4  }
 0x55e   : > { %3866 = vset.pattern.permute.xlu1 %v3998_v17  ;;  %3872 = vset.pattern.permute.xlu0 %v3999_v1 }
 0x55f   : > { %2487 = vperm.xlu1 %3866, %v6199_v40   ;;  %2571 = vperm.xlu0 %3872, %v6205_v44  }
 0x563   : > { %2511 = vperm.xlu1 %3866, %v6201_v47   ;;  %3873 = vset.pattern.permute.xlu0 %v3998_v17 }
 0x564   : > { %2543 = vperm.xlu0 %3873, %v6203_v56  }
 0x567   : > { %3867 = vset.pattern.permute.xlu1 %v3999_v1 }
 0x568   : > { %2575 = vperm.xlu1 %3867, %v6199_v40   ;;  %3877 = vset.pattern.permute.xlu0 %v7402_v2 }
 0x569   : > { %2652 = vperm.xlu0 %3877, %v199_v63   ;;  %v7410_v63 = vld [vmem:[#allocation66_spill] sm:$0xff] }
 0x56c   : > { %3871 = vset.pattern.permute.xlu1 %v3997_v7 }
 0x56d   : > { %2395 = vperm.xlu1 %3871, %v6205_v44  }
 0x571   : > { %2419 = vperm.xlu1 %3871, %v6207_v4  }
 0x575   : > { %2451 = vperm.xlu1 %3871, %v6209_v25  }
 0x579   : > { %3874 = vset.pattern.permute.xlu1 %v3999_v1 }
 0x57a   : > { %2595 = vperm.xlu1 %3874, %v6207_v4   ;;  %v202_v4 = vld [vmem:[%s6993_s1 + $0xb8] sm:$0xff] }
 0x57b   : > { %2667 = vperm.xlu0 %3877, %v202_v4   ;;  %v7413_v4 = vld [vmem:[#allocation27_spill] sm:$0xff] }
 0x57e   : > { %3875 = vset.pattern.permute.xlu1 %v3998_v17 }
 0x57f   : > { %2539 = vperm.xlu1 %3875, %v6209_v25  }
 0x583   : > { %3876 = vset.pattern.permute.xlu1 %v3999_v1 }
 0x584   : > { %2627 = vperm.xlu1 %3876, %v6209_v25  }
 0x588   : > { %2631 = vperm.xlu1 %3876, %v6203_v56   ;;  %v201_v56 = vld [vmem:[%s6993_s1 + $0xb0] sm:$0xff] }
 0x58b   : > { %v2322_v22 = vpop.permute.xlu1 %2321  ;;  %v2294_v38 = vpop.permute.xlu0 %2293 }
 0x58c   : > { %3878 = vset.pattern.permute.xlu1 %v7402_v2  ;;  %v204_v2 = vld [vmem:[%s6993_s1 + $0xc8] sm:$0xff] }
 0x58d   : > { %2657 = vperm.xlu1 %3878, %v200_v11   ;;  %3349 = vperm.xlu0 %3877, %v204_v2   ;;  %v206_v11 = vld [vmem:[%s6993_s1 + $0xd8] sm:$0xff] }
 0x58f   : > { %v2358_v21 = vpop.permute.xlu1 %2357 }
 0x590   : > { %v6257_v39 = vpop.permute.xlu0 %2415 }
 0x591   : > { %v2428_v6 = vmul.f32 %v6257_v39, %v7403_v28  ;;  %2662 = vperm.xlu1 %3878, %v201_v56   ;;  %3359 = vperm.xlu0 %3877, %v206_v11  }
 0x594   : > { %v6259_v9 = vpop.permute.xlu1 %2391  ;;  %v6261_v3 = vpop.permute.xlu0 %2447 }
 0x595   : > { %v2404_v23 = vmul.f32 %v6259_v9, %v7404_v19  ;;  %v2460_v0 = vmul.f32 %v6261_v3, %v7405_v55  ;;  %v7408_v55 = vld [vmem:[#allocation63_spill] sm:$0xff] }
 0x597   : > { %v2436_v51 = vadd.f32 %v2428_v6, %v2404_v23  ;;  %v7406_v6 = vld [vmem:[#allocation61_spill] sm:$0xff] }
 0x598   : > { %v2336_v19 = vmul.f32 %v2322_v22, %v7406_v6  ;;  %v7407_v23 = vld [vmem:[#allocation65_spill] sm:$0xff] }
 0x599   : > { %v6269_v58 = vadd.f32 %v2460_v0, %v2436_v51  ;;  %v6271_v20 = vpop.permute.xlu1 %2503  ;;  %v6273_v10 = vpop.permute.xlu0 %2479  ;;  %v2337_v51 = vmul.f32 %v2322_v22, %v7407_v23  ;;  %v2308_v0 = vmul.f32 %v2294_v38, %v7408_v55 }
 0x59e   : > { %v2568_v36 = vpop.permute.xlu1 %2567  ;;  %v2592_v49 = vpop.permute.xlu0 %2591 }
 0x59f   : > { %v2580_v50 = vmul.f32 %v2568_v36, %v5968_v24  ;;  %v2581_v7 = vmul.f32 %v2568_v36, %v5962_v43  ;;  %v2604_v40 = vmul.f32 %v2592_v49, %v6008_v31  ;;  %v2605_v47 = vmul.f32 %v2592_v49, %v6013_v48  ;;  %v203_v48 = vld [vmem:[%s6993_s1 + $0xc0] sm:$0xff]  ;;  %v7409_v36 = vld [vmem:[#allocation64_spill] sm:$0xff] }
 0x5a0   : > { %3344 = vperm.xlu1 %3878, %v203_v48   ;;  %v2309_v49 = vmul.f32 %v2294_v38, %v7409_v36  ;;  %v207_v38 = vld [vmem:[%s6993_s1 + $0xe0] sm:$0xff] }
 0x5a1   : > { %v2612_v18 = vadd.f32 %v2604_v40, %v2580_v50  ;;  %v2613_v44 = vadd.f32 %v2605_v47, %v2581_v7  ;;  %v2372_v50 = vmul.f32 %v2358_v21, %v7410_v63  ;;  %v7411_v7 = vld [vmem:[#allocation67_spill] sm:$0xff] }
 0x5a2   : > { %v2624_v25 = vpop.permute.xlu1 %2623  ;;  %v2373_v40 = vmul.f32 %v2358_v21, %v7411_v7  ;;  %v208_v21 = vld [vmem:[%s6993_s1 + $0xe8] sm:$0xff] }
 0x5a3   : > { %v2636_v24 = vmul.f32 %v2624_v25, %v7366_v42  ;;  %v2637_v43 = vmul.f32 %v2624_v25, %v7369_v46  ;;  %v2353_v31 = vpop.permute.xlu0 %2352  ;;  %v205_v46 = vld [vmem:[%s6993_s1 + $0xd0] sm:$0xff]  ;;  %3401 = vperm.xlu0 %3877, %v208_v21  }
 0x5a4   : > { %3354 = vperm.xlu1 %3878, %v205_v46   ;;  %v2371_v2 = vmul.f32 %v2353_v31, %v5605_v12 }
 0x5a5   : > { %v6296_v17 = vadd.f32 %v2636_v24, %v2612_v18  ;;  %v6298_v1 = vadd.f32 %v2637_v43, %v2613_v44  ;;  %v7412_v18 = vld [vmem:[#allocation32_spill] sm:$0xff]  ;;  %v2344_v24 = vadd.f32 %v2336_v19, %v2308_v0  ;;  %v2345_v43 = vadd.f32 %v2337_v51, %v2309_v49 }
 0x5a6   : > { %v209_v19 = vld [vmem:[%s6993_s1 + $0xf0] sm:$0xff] }
 0x5a7   : > { %v2289_v28 = vpop.permute.xlu1 %2288  ;;  %v2380_v46 = vadd.f32 %v2372_v50, %v2344_v24  ;;  %v2381_v6 = vadd.f32 %v2373_v40, %v2345_v43  ;;  %v2492_v24 = vmul.f32 %v6273_v10, %v5865_v30  ;;  %v7416_v30 = vld [vmem:[#allocation95_spill] sm:$0xff] }
 0x5a8   : > { %v6303_v42 = vpop.permute.xlu0 %2387  ;;  %v2306_v56 = vmul.f32 %v2289_v28, %v5887_v45  ;;  %v2307_v44 = vmul.f32 %v2289_v28, %v7412_v18  ;;  %v2370_v45 = vmul.f32 %v2353_v31, %v5592_v54  ;;  %3396 = vperm.xlu1 %3878, %v207_v38   ;;  %v210_v54 = vld [vmem:[%s6993_s1 + $0xf8] sm:$0xff]  ;;  %v2516_v38 = vmul.f32 %v6271_v20, %v5874_v5  ;;  %v7415_v5 = vld [vmem:[#allocation90_spill] sm:$0xff] }
 0x5a9   : > { %3411 = vperm.xlu0 %3877, %v210_v54  }
 0x5ab   : > { %v2317_v47 = vpop.permute.xlu1 %2316 }
 0x5ac   : > { %v2334_v22 = vmul.f32 %v2317_v47, %v5902_v27  ;;  %v2335_v25 = vmul.f32 %v2317_v47, %v7413_v4  ;;  %3406 = vperm.xlu1 %3878, %v209_v19   ;;  %v7418_v19 = vld [vmem:[#allocation16_spill] sm:$0xff] }
 0x5ad   : > { %v2564_v48 = vpop.permute.xlu0 %2563 }
 0x5ae   : > { %v2342_v28 = vadd.f32 %v2334_v22, %v2306_v56  ;;  %v2343_v27 = vadd.f32 %v2335_v25, %v2307_v44  ;;  %v2578_v4 = vmul.f32 %v2564_v48, %v5848_v60  ;;  %v2579_v25 = vmul.f32 %v2564_v48, %v5893_v62  ;;  %v7414_v62 = vld [vmem:[#allocation93_spill] sm:$0xff] }
 0x5af   : > { %v2493_v60 = vmul.f32 %v6273_v10, %v5939_v8  ;;  %v7420_v8 = vld [vmem:[#allocation94_spill] sm:$0xff] }
 0x5b0   : > { %v2378_v23 = vadd.f32 %v2370_v45, %v2342_v28  ;;  %v2379_v55 = vadd.f32 %v2371_v2, %v2343_v27  ;;  %v6329_v36 = vpop.permute.xlu1 %2411  ;;  %v2429_v27 = vmul.f32 %v6257_v39, %v7415_v5 }
 0x5b2   : > { %v6337_v51 = vpop.permute.xlu0 %2399  ;;  %v3794_v12 = vpack.c.bf16 %v2381_v6, %v2379_v55  ;;  %v3796_v31 = vpack.c.bf16 %v2380_v46, %v2378_v23  ;;  %v2524_v55 = vadd.f32 %v2516_v38, %v2492_v24 }
 0x5b4   : > { %3795 = vmatprep.subr.bf16.mxu0 %v3794_v12  ;;  %v6339_v0 = vpop.permute.xlu1 %2443  ;;  %v7421_v12 = vld [vmem:[#allocation20_spill] sm:$0xff] }
 0x5b5   : > { %3797 = vmatpush1.bf16.msra.mxu0 %v3796_v31 }
 0x5b6   : > { %v6341_v49 = vpop.permute.xlu0 %2423 }
 0x5b9   : > { %v2476_v11 = vpop.permute.xlu1 %2475 }
 0x5ba   : > { %v6343_v63 = vpop.permute.xlu0 %2455  ;;  %v2491_v10 = vmul.f32 %v2476_v11, %v7420_v8  ;;  %v7429_v8 = vld [vmem:[#allocation70_spill] sm:$0xff] }
 0x5bd   : > { %v2500_v50 = vpop.permute.xlu1 %2499 }
 0x5be   : > { %v2514_v48 = vmul.f32 %v2500_v50, %v7414_v62  ;;  %v2515_v46 = vmul.f32 %v2500_v50, %v7416_v30  ;;  %v7425_v30 = vld [vmem:[#allocation79_spill] sm:$0xff] }
 0x5bf   : > { %v6345_v7 = vpop.permute.xlu0 %2599 }
 0x5c0   : > { %v2523_v38 = vadd.f32 %v2515_v46, %v2491_v10  ;;  %v7426_v46 = vld [vmem:[#allocation73_spill] sm:$0xff]  ;;  %v2426_v10 = vmul.f32 %v6329_v36, %v7429_v8  ;;  %v7443_v8 = vld [vmem:[#allocation62_spill] sm:$0xff] }
 0x5c2   : > { %v2588_v40 = vpop.permute.xlu1 %2587 }
 0x5c3   : > { %v2602_v44 = vmul.f32 %v2588_v40, %v5835_v34  ;;  %v2603_v22 = vmul.f32 %v2588_v40, %v5907_v57  ;;  %v2517_v57 = vmul.f32 %v6271_v20, %v5944_v33  ;;  %v2490_v33 = vmul.f32 %v2476_v11, %v7418_v19  ;;  %v7419_v20 = vld [vmem:[#allocation19_spill] sm:$0xff] }
 0x5c4   : > { %v2299_v47 = vpop.permute.xlu0 %2298 }
 0x5c5   : > { %v2610_v45 = vadd.f32 %v2602_v44, %v2578_v4  ;;  %v2611_v2 = vadd.f32 %v2603_v22, %v2579_v25  ;;  %v2525_v22 = vadd.f32 %v2517_v57, %v2493_v60  ;;  %v2522_v4 = vadd.f32 %v2514_v48, %v2490_v33  ;;  %v7423_v57 = vld [vmem:[#allocation69_spill] sm:$0xff]  ;;  %v7424_v48 = vld [vmem:[#allocation76_spill] sm:$0xff] }
 0x5c6   : > { %v2403_v60 = vmul.f32 %v6303_v42, %v7423_v57 }
 0x5c7   : > { %v2532_v56 = vpop.permute.xlu1 %2531 }
 0x5c8   : > { %v2327_v18 = vpop.permute.xlu0 %2326  ;;  %v2546_v54 = vmul.f32 %v2532_v56, %v7419_v20  ;;  %v2547_v31 = vmul.f32 %v2532_v56, %v7421_v12  ;;  %v7422_v56 = vld [vmem:[#allocation71_spill] sm:$0xff]  ;;  %v7428_v20 = vld [vmem:[#allocation78_spill] sm:$0xff] }
 0x5c9   : > { %v2339_v62 = vmul.f32 %v2327_v18, %v5859_v37 }
 0x5cc   : > { %v2620_v43 = vpop.permute.xlu1 %2619  ;;  %v2363_v21 = vpop.permute.xlu0 %2362 }
 0x5cd   : > { %v2634_v28 = vmul.f32 %v2620_v43, %v5673_v32  ;;  %v2635_v34 = vmul.f32 %v2620_v43, %v5677_v61  ;;  %v7417_v32 = vld [vmem:[#allocation89_spill] sm:$0xff]  ;;  %v2554_v43 = vadd.f32 %v2546_v54, %v2522_v4  ;;  %v2375_v37 = vmul.f32 %v2363_v21, %v7373_v26  ;;  %v7432_v26 = vld [vmem:[#allocation92_spill] sm:$0xff] }
 0x5ce   : > { %v2405_v61 = vmul.f32 %v6259_v9, %v7417_v32  ;;  %v2459_v32 = vmul.f32 %v6339_v0, %v7426_v46 }
 0x5cf   : > { %v6365_v6 = vadd.f32 %v2634_v28, %v2610_v45  ;;  %v6367_v23 = vadd.f32 %v2635_v34, %v2611_v2  ;;  %v2427_v2 = vmul.f32 %v6329_v36, %v7422_v56  ;;  %v2555_v28 = vadd.f32 %v2547_v31, %v2523_v38  ;;  %v7434_v38 = vld [vmem:[#allocation72_spill] sm:$0xff] }
 0x5d0   : > { %v2437_v24 = vadd.f32 %v2429_v27, %v2405_v61  ;;  %v2338_v34 = vmul.f32 %v2327_v18, %v6066_v35  ;;  %v2310_v61 = vmul.f32 %v2299_v47, %v6003_v52  ;;  %v2374_v35 = vmul.f32 %v2363_v21, %v7379_v15  ;;  %v7427_v18 = vld [vmem:[#allocation75_spill] sm:$0xff] }
 0x5d1   : > { %v3820_v39 = vpack.c.bf16 %v6296_v17, %v6365_v6  ;;  %v2304_v50 = vpop.permute.xlu1 %2303  ;;  %v2536_v40 = vpop.permute.xlu0 %2535  ;;  %v3818_v44 = vpack.c.bf16 %v6298_v1, %v6367_v23  ;;  %v2435_v12 = vadd.f32 %v2427_v2, %v2403_v60  ;;  %v2461_v21 = vmul.f32 %v6261_v3, %v7432_v26  ;;  %v6410_v3 = vld [vmem:[%s6994_s2 + $0xe0] sm:$0xff]  ;;  %v7464_v17 = vld [vmem:[#allocation12_spill] sm:$0xff] }
 0x5d2   : > { %v2548_v9 = vmul.f32 %v2536_v40, %v5627_v16  ;;  %v2549_v25 = vmul.f32 %v2536_v40, %v7351_v41  ;;  %v2312_v33 = vmul.f32 %v2304_v50, %v7427_v18  ;;  %v2313_v54 = vmul.f32 %v2304_v50, %v7428_v20  ;;  %v7441_v18 = vld [vmem:[#allocation84_spill] sm:$0xff]  ;;  %v7442_v20 = vld [vmem:[#allocation58_spill] sm:$0xff] }
 0x5d3   : > { %v2346_v31 = vadd.f32 %v2338_v34, %v2310_v61  ;;  %v2458_v36 = vmul.f32 %v6339_v0, %v7434_v38  ;;  %v2469_v34 = vadd.f32 %v2461_v21, %v2437_v24  ;;  %v6419_v24 = vld [vmem:[%s6994_s2 + $0xe8] sm:$0xff]  ;;  %v7438_v61 = vld [vmem:[#allocation40_spill] sm:$0xff]  ;;  %v7449_v38 = vld [vmem:[#allocation86_spill] sm:$0xff] }
 0x5d4   : > { %v2556_v11 = vadd.f32 %v2548_v9, %v2524_v55  ;;  %v2557_v45 = vadd.f32 %v2549_v25, %v2525_v22  ;;  %v2311_v55 = vmul.f32 %v2299_v47, %v5792_v29  ;;  %v7430_v29 = vld [vmem:[#allocation77_spill] sm:$0xff]  ;;  %v7431_v9 = vld [vmem:[#allocation80_spill] sm:$0xff] }
 0x5d5   : > { %v2332_v5 = vpop.permute.xlu1 %2331  ;;  %v7433_v25 = vld [vmem:[#allocation68_spill] sm:$0xff] }
 0x5d6   : > { %v3812_v16 = vpack.c.bf16 %v2556_v11, %v2554_v43  ;;  %v2340_v41 = vmul.f32 %v2332_v5, %v7424_v48  ;;  %v2341_v27 = vmul.f32 %v2332_v5, %v7425_v30  ;;  %v3810_v19 = vpack.c.bf16 %v2557_v45, %v2555_v28 }
 0x5d7   : > { %v2347_v40 = vadd.f32 %v2339_v62, %v2311_v55  ;;  %v2402_v50 = vmul.f32 %v6303_v42, %v7433_v25  ;;  %v2467_v43 = vadd.f32 %v2459_v32, %v2435_v12  ;;  %v2382_v11 = vadd.f32 %v2374_v35, %v2346_v31  ;;  %v7440_v35 = vld [vmem:[#allocation81_spill] sm:$0xff] }
 0x5d8   : > { %3811 = vmatprep.subr.bf16.mxu1 %v3810_v19  ;;  %v2348_v52 = vadd.f32 %v2340_v41, %v2312_v33  ;;  %v2349_v4 = vadd.f32 %v2341_v27, %v2313_v54  ;;  %v2484_v41 = vpop.permute.xlu0 %2483  ;;  %v6437_v27 = vld [vmem:[%s6994_s2 + $0xf8] sm:$0xff]  ;;  %v2432_v32 = vmul.f32 %v6341_v49, %v5759_v53  ;;  %v2433_v55 = vmul.f32 %v6341_v49, %v7438_v61  ;;  %v7444_v53 = vld [vmem:[#allocation8_spill] sm:$0xff]  ;;  %v7445_v49 = vld [vmem:[#allocation10_spill] sm:$0xff] }
 0x5d9   : > { %v2368_v22 = vpop.permute.xlu1 %2367  ;;  %3813 = vmatpush1.bf16.msra.mxu1 %v3812_v16  ;;  %v2383_v45 = vadd.f32 %v2375_v37, %v2347_v40  ;;  %v2434_v28 = vadd.f32 %v2426_v10, %v2402_v50  ;;  %v3802_v16 = vpack.c.bf16 %v2469_v34, %v2467_v43  ;;  %v2408_v54 = vmul.f32 %v6337_v51, %v7442_v20  ;;  %v7446_v40 = vld [vmem:[#allocation82_spill] sm:$0xff]  ;;  %v7448_v25 = vld [vmem:[#allocation85_spill] sm:$0xff] }
 0x5da   : > { %v2376_v47 = vmul.f32 %v2368_v22, %v7430_v29  ;;  %v2377_v15 = vmul.f32 %v2368_v22, %v7431_v9  ;;  %v2409_v10 = vmul.f32 %v6337_v51, %v7443_v8  ;;  %v2464_v12 = vmul.f32 %v6343_v63, %v7444_v53  ;;  %v7453_v61 = vld [vmem:[#allocation42_spill] sm:$0xff]  ;;  %v7457_v20 = vld [vmem:[#allocation25_spill] sm:$0xff] }
 0x5db   : > { %v2466_v60 = vadd.f32 %v2458_v36, %v2434_v28  ;;  %v2465_v31 = vmul.f32 %v6343_v63, %v7445_v49  ;;  %v2440_v29 = vadd.f32 %v2432_v32, %v2408_v54 }
 0x5dc   : > { %v2384_v56 = vadd.f32 %v2376_v47, %v2348_v52  ;;  %v2385_v2 = vadd.f32 %v2377_v15, %v2349_v4  ;;  %v2508_v46 = vpop.permute.xlu0 %2507  ;;  %v7447_v52 = vld [vmem:[#allocation83_spill] sm:$0xff]  ;;  %v2441_v47 = vadd.f32 %v2433_v55, %v2409_v10 }
 0x5dd   : > { %v3804_v0 = vpack.c.bf16 %v6269_v58, %v2466_v60  ;;  %v6429_v58 = vld [vmem:[%s6994_s2 + $0xf0] sm:$0xff]  ;;  %v2472_v36 = vadd.f32 %v2464_v12, %v2440_v29  ;;  %v7459_v12 = vld [vmem:[#allocation22_spill] sm:$0xff] }
 0x5de   : > { %v3800_v62 = vpack.c.bf16 %v2384_v56, %v2382_v11  ;;  %v2488_v5 = vpop.permute.xlu1 %2487  ;;  %v3798_v57 = vpack.c.bf16 %v2385_v2, %v2383_v45  ;;  %v2473_v43 = vadd.f32 %v2465_v31, %v2441_v47 }
 0x5df   : > { %v2497_v55 = vmul.f32 %v2488_v5, %v7453_v61 }
 0x5e0   : > { %3799 = vmatprep.subr.bf16.mxu0 %v3798_v57  ;;  %v2572_v9 = vpop.permute.xlu0 %2571  ;;  %v7450_v57 = vld [vmem:[#allocation30_spill] sm:$0xff] }
 0x5e1   : > { %3801 = vmatpush1.bf16.msra.mxu0 %v3800_v62  ;;  %v2518_v60 = vmul.f32 %v2508_v46, %v7450_v57  ;;  %v7473_v57 = vld [vmem:[#allocation39_spill] sm:$0xff] }
 0x5e2   : > { %v2512_v42 = vpop.permute.xlu1 %2511  ;;  %3803 = vmatprep.subr.bf16.mxu0 %v3802_v16  ;;  %v7451_v16 = vld [vmem:[#allocation26_spill] sm:$0xff] }
 0x5e3   : > { %v2520_v63 = vmul.f32 %v2512_v42, %v6023_v59  ;;  %v2521_v56 = vmul.f32 %v2512_v42, %v5993_v13  ;;  %v7456_v42 = vld [vmem:[#allocation24_spill] sm:$0xff] }
 0x5e4   : > { %3638 = vmatmul.mubr.msk.f32.vlgmr.msra.gmra.mrb[48].mxu0 %vm7435_vm5, %v6410_v3  ;;  %v2544_v62 = vpop.permute.xlu0 %2543 }
 0x5e5   : > { %3805 = vmatpush1.bf16.msra.mxu0 %v3804_v0  ;;  %2752 = vmatprep.mubr.f32.mxu0 %v7390_v14  ;;  %v2519_v0 = vmul.f32 %v2508_v46, %v7451_v16  ;;  %v2529_v13 = vadd.f32 %v2521_v56, %v2497_v55  ;;  %v2553_v54 = vmul.f32 %v2544_v62, %v7457_v20 }
 0x5e7   : > { %v6421_v48 = vpop.permute.xlu1 %2575  ;;  %v2561_v31 = vadd.f32 %v2553_v54, %v2529_v13 }
 0x5e8   : > { %3639 = vmatmul.mubr.msk.f32.gmra.mrb[50].mxu0 %vm7436_vm8, %v6419_v24 }
 0x5e9   : > { %2758 = vmatprep.mubr.f32.mxu0 %v7390_v14 }
 0x5ec   : > { %v2396_v30 = vpop.permute.xlu1 %2395  ;;  %3640 = vmatmul.mubr.msk.f32.gmra.mrb[52].mxu0 %vm7437_vm4, %v6429_v58 }
 0x5ed   : > { %2764 = vmatprep.mubr.f32.mxu0 %v7390_v14  ;;  %v2406_v22 = vmul.f32 %v2396_v30, %v7446_v40  ;;  %v2407_v4 = vmul.f32 %v2396_v30, %v7447_v52  ;;  %v7452_v30 = vld [vmem:[#allocation18_spill] sm:$0xff] }
 0x5ee   : > { %v2496_v32 = vmul.f32 %v2488_v5, %v7452_v30  ;;  %v7458_v5 = vld [vmem:[#allocation15_spill] sm:$0xff] }
 0x5f0   : > { %v2420_v19 = vpop.permute.xlu1 %2419  ;;  %3641 = vmatmul.mubr.msk.f32.gmra.mrb[54].mxu0 %vm7439_vm6, %v6437_v27  ;;  %v2528_v59 = vadd.f32 %v2520_v63, %v2496_v32 }
 0x5f1   : > { %v2430_v37 = vmul.f32 %v2420_v19, %v7440_v35  ;;  %v2431_v33 = vmul.f32 %v2420_v19, %v7441_v18  ;;  %2835 = vmatprep.mubr.f32.mxu0 %v7390_v14  ;;  %v7454_v19 = vld [vmem:[#allocation41_spill] sm:$0xff] }
 0x5f2   : > { %v2494_v35 = vmul.f32 %v2484_v41, %v7454_v19 }
 0x5f3   : > { %v2438_v26 = vadd.f32 %v2430_v37, %v2406_v22  ;;  %v2439_v21 = vadd.f32 %v2431_v33, %v2407_v4  ;;  %v7455_v37 = vld [vmem:[#allocation37_spill] sm:$0xff]  ;;  %v2552_v33 = vmul.f32 %v2544_v62, %v7456_v42  ;;  %v7462_v22 = vld [vmem:[#allocation3_spill] sm:$0xff] }
 0x5f4   : > { %v2452_v15 = vpop.permute.xlu1 %2451  ;;  %v2495_v18 = vmul.f32 %v2484_v41, %v7455_v37  ;;  %v2526_v8 = vadd.f32 %v2518_v60, %v2494_v35  ;;  %v2585_v52 = vmul.f32 %v6421_v48, %v7462_v22  ;;  %v7474_v60 = vld [vmem:[#allocation33_spill] sm:$0xff]  ;;  %v3956_v22 = vld [vmem:[%s4056_s30 + $0x28] sm:$0xff] }
 0x5f5   : > { %v2462_v50 = vmul.f32 %v2452_v15, %v7448_v25  ;;  %v2463_v51 = vmul.f32 %v2452_v15, %v7449_v38  ;;  %v2560_v41 = vadd.f32 %v2552_v33, %v2528_v59  ;;  %v7467_v25 = vld [vmem:[#allocation9_spill] sm:$0xff]  ;;  %v3952_v33 = vld [vmem:[%s4056_s30 + $0x8] sm:$0xff] }
 0x5f6   : > { %v2527_v10 = vadd.f32 %v2519_v0, %v2495_v18 }
 0x5f7   : > { %v2470_v11 = vadd.f32 %v2462_v50, %v2438_v26  ;;  %v2471_v45 = vadd.f32 %v2463_v51, %v2439_v21  ;;  %v7466_v26 = vld [vmem:[#allocation31_spill] sm:$0xff]  ;;  %v2609_v50 = vmul.f32 %v6345_v7, %v7467_v25 }
 0x5f8   : > { %v2608_v21 = vmul.f32 %v6345_v7, %v7466_v26  ;;  %v7469_v51 = vld [vmem:[#allocation11_spill] sm:$0xff] }
 0x5f9   : > { %v3808_v2 = vpack.c.bf16 %v2472_v36, %v2470_v11  ;;  %v2596_v28 = vpop.permute.xlu1 %2595  ;;  %v3806_v34 = vpack.c.bf16 %v2473_v43, %v2471_v45  ;;  %v2583_v36 = vmul.f32 %v2572_v9, %v7469_v51  ;;  %v7470_v43 = vld [vmem:[#allocation55_spill] sm:$0xff] }
 0x5fa   : > { %v2606_v6 = vmul.f32 %v2596_v28, %v7464_v17  ;;  %v7471_v45 = vld [vmem:[#allocation51_spill] sm:$0xff] }
 0x5fb   : > { %3807 = vmatprep.subr.bf16.mxu0 %v3806_v34 }
 0x5fc   : > { %3809 = vmatpush1.bf16.msra.mxu0 %v3808_v2  ;;  %v2617_v2 = vadd.f32 %v2609_v50, %v2585_v52 }
 0x5fd   : > { %3819 = vmatprep.subr.bf16.mxu0 %v3818_v44  ;;  %v7461_v44 = vld [vmem:[#allocation23_spill] sm:$0xff] }
 0x5fe   : > { %v2540_v46 = vpop.permute.xlu1 %2539  ;;  %v2584_v40 = vmul.f32 %v6421_v48, %v7461_v44  ;;  %v7468_v48 = vld [vmem:[#allocation5_spill] sm:$0xff]  ;;  %v3955_v44 = vld [vmem:[%s4056_s30 + $0x20] sm:$0xff] }
 0x5ff   : > { %v2550_v53 = vmul.f32 %v2540_v46, %v7458_v5  ;;  %v2551_v49 = vmul.f32 %v2540_v46, %v7459_v12  ;;  %3642 = vmatmul.mubr.msk.f32.vlgmr.msra.gmra.mrb[56].mxu0 %vm7460_vm7, %v6410_v3  ;;  %v2582_v38 = vmul.f32 %v2572_v9, %v7468_v48  ;;  %v3953_v46 = vld [vmem:[%s4056_s30 + $0x10] sm:$0xff] }
 0x600   : > { %3821 = vmatpush1.bf16.msra.mxu0 %v3820_v39  ;;  %2841 = vmatprep.mubr.f32.mxu0 %v7390_v14  ;;  %v7465_v39 = vld [vmem:[#allocation47_spill] sm:$0xff]  ;;  %v2616_v56 = vadd.f32 %v2608_v21, %v2584_v40  ;;  %v3958_v21 = vld [vmem:[%s4056_s30 + $0x38] sm:$0xff] }
 0x601   : > { %v2558_v1 = vadd.f32 %v2550_v53, %v2526_v8  ;;  %v2559_v23 = vadd.f32 %v2551_v49, %v2527_v10  ;;  %v2607_v15 = vmul.f32 %v2596_v28, %v7465_v39  ;;  %v2614_v34 = vadd.f32 %v2606_v6, %v2582_v38  ;;  %v3954_v10 = vld [vmem:[%s4056_s30 + $0x18] sm:$0xff] }
 0x603   : > { %v3816_v4 = vpack.c.bf16 %v2560_v41, %v2558_v1  ;;  %v2628_v29 = vpop.permute.xlu1 %2627  ;;  %3643 = vmatmul.mubr.msk.f32.gmra.mrb[58].mxu0 %vm7463_vm9, %v6419_v24  ;;  %v3814_v47 = vpack.c.bf16 %v2561_v31, %v2559_v23  ;;  %v2615_v62 = vadd.f32 %v2607_v15, %v2583_v36  ;;  %v3957_v15 = vld [vmem:[%s4056_s30 + $0x30] sm:$0xff] }
 0x604   : > { %2847 = vmatprep.mubr.f32.mxu0 %v7390_v14  ;;  %v2638_v11 = vmul.f32 %v2628_v29, %v7470_v43  ;;  %v2639_v63 = vmul.f32 %v2628_v29, %v7471_v45 }
 0x605   : > { %3815 = vmatprep.subr.bf16.mxu1 %v3814_v47 }
 0x606   : > { %3817 = vmatpush1.bf16.msra.mxu1 %v3816_v4  ;;  %v2646_v9 = vadd.f32 %v2638_v11, %v2614_v34  ;;  %v2647_v0 = vadd.f32 %v2639_v63, %v2615_v62 }
 0x607   : > { %v2632_v28 = vpop.permute.xlu1 %2631  ;;  %3644 = vmatmul.mubr.msk.f32.gmra.mrb[60].mxu0 %vm7472_vm10, %v6429_v58 }
 0x608   : > { %v2640_v7 = vmul.f32 %v2632_v28, %v7473_v57  ;;  %v2641_v16 = vmul.f32 %v2632_v28, %v7474_v60  ;;  %2853 = vmatprep.mubr.f32.mxu0 %v7390_v14 }
 0x609   : > { %3646 = vmatmul.mubr.msk.f32.vlgmr.msra.gmra.mrb[64].mxu1 %vm7475_vm14, %v6410_v3 }
 0x60a   : > { %v2648_v30 = vadd.f32 %v2640_v7, %v2616_v56  ;;  %v2649_v32 = vadd.f32 %v2641_v16, %v2617_v2  ;;  %2930 = vmatprep.mubr.f32.mxu1 %v7390_v14 }
 0x60b   : > { %3645 = vmatmul.mubr.msk.f32.gmra.mrb[62].mxu0 %vm7476_vm15, %v6437_v27 }
 0x60c   : > { %v3824_v61 = vpack.c.bf16 %v2648_v30, %v2646_v9  ;;  %v3822_v55 = vpack.c.bf16 %v2649_v32, %v2647_v0  ;;  %3013 = vmatprep.mubr.f32.mxu0 %v7390_v14  ;;  %v6530_v19 = vpop.permute.xlu1 %2657  ;;  %v3959_v32 = vld [vmem:[%s4056_s30 + $0x40] sm:$0xff] }
 0x60d   : > { %3647 = vmatmul.mubr.msk.f32.gmra.mrb[66].mxu1 %vm7477_vm3, %v6419_v24 }
 0x60e   : > { %3823 = vmatprep.subr.bf16.mxu0 %v3822_v55  ;;  %2936 = vmatprep.mubr.f32.mxu1 %v7390_v14 }
 0x60f   : > { %3825 = vmatpush1.bf16.msra.mxu0 %v3824_v61 }
 0x610   : > { %v6540_v54 = vpop.permute.xlu1 %2662 }
 0x611   : > { %3648 = vmatmul.mubr.msk.f32.gmra.mrb[68].mxu1 %vm7478_vm11, %v6429_v58 }
 0x612   : > { %3650 = vmatmul.mubr.msk.f32.vlgmr.msra.gmra.mrb[64].mxu0 %vm7479_vm12, %v6410_v3  ;;  %2942 = vmatprep.mubr.f32.mxu1 %v7390_v14  ;;  %v6528_v3 = vpop.permute.xlu0 %2652 }
 0x613   : > { %3019 = vmatprep.mubr.f32.mxu0 %v7390_v14 }
 0x615   : > { %3649 = vmatmul.mubr.msk.f32.gmra.mrb[70].mxu1 %vm7480_vm13, %v6437_v27 }
 0x616   : > { %3651 = vmatmul.mubr.msk.f32.gmra.mrb[66].mxu0 %vm7386_vm0, %v6419_v24  ;;  %v6547_v23 = vpop.permute.xlu0 %2667 }
 0x617   : > { %3025 = vmatprep.mubr.f32.mxu0 %v7390_v14 }
 0x61a   : > { %3652 = vmatmul.mubr.msk.f32.gmra.mrb[68].mxu0 %vm7481_vm1, %v6429_v58 }
 0x61b   : > { %3031 = vmatprep.mubr.f32.mxu0 %v7390_v14  ;;  %v3951_v14 = vld [vmem:[%s4056_s30] sm:$0xff] }
 0x61e   : > { %3653 = vmatmul.mubr.msk.f32.gmra.mrb[70].mxu0 %vm7482_vm2, %v6437_v27 }
 0x6b7   : > { %v2748_v35 = vpop.f32.mrb[48].mxu0 }
 0x6b8   : > { %v2750_v37 = vpop.f32.mrb[49].mxu0  ;;  %v2749_v24 = vadd.f32 %v2748_v35, %v6528_v3 }
 0x6b9   : > { %v2751_v18 = vadd.f32 %v2750_v37, %v6528_v3 }
 0x6ba   : > { %v6536_v42 = vadd.f32 %v3951_v14, %v2749_v24 }
 0x6bb   : > { %v2754_v59 = vpop.f32.mrb[50].mxu0  ;;  %v3039_v20 = vadd.f32 %v3952_v33, %v2751_v18  ;;  %v3960_v33 = vld [vmem:[%s4056_s30 + $0x48] sm:$0xff] }
 0x6bc   : > { %v2755_v58 = vadd.f32 %v2754_v59, %v6530_v19  ;;  %v2756_v13 = vpop.f32.mrb[51].mxu0 }
 0x6bd   : > { %v2757_v27 = vadd.f32 %v2756_v13, %v6530_v19 }
 0x6be   : > { %v3046_v8 = vadd.f32 %v3953_v46, %v2755_v58 }
 0x6bf   : > { %v3047_v5 = vadd.f32 %v3954_v10, %v2757_v27  ;;  %v2760_v53 = vpop.f32.mrb[52].mxu0  ;;  %v3961_v10 = vld [vmem:[%s4056_s30 + $0x50] sm:$0xff] }
 0x6c0   : > { %v2761_v12 = vadd.f32 %v2760_v53, %v6540_v54  ;;  %v3070_v49 = vadd.f32 %v3046_v8, %v6536_v42  ;;  %v2762_v41 = vpop.f32.mrb[53].mxu0  ;;  %v3962_v53 = vld [vmem:[%s4056_s30 + $0x58] sm:$0xff] }
 0x6c1   : > { %v3079_v31 = vadd.f32 %v3047_v5, %v3039_v20  ;;  %v2763_v1 = vadd.f32 %v2762_v41, %v6540_v54 }
 0x6c2   : > { %v3054_v40 = vadd.f32 %v3955_v44, %v2761_v12 }
 0x6c3   : > { %v3055_v52 = vadd.f32 %v3956_v22, %v2763_v1  ;;  %v2766_v4 = vpop.f32.mrb[54].mxu0 }
 0x6c4   : > { %v3071_v29 = vadd.f32 %v3070_v49, %v3054_v40  ;;  %v2767_v47 = vadd.f32 %v2766_v4, %v6547_v23  ;;  %v2768_v17 = vpop.f32.mrb[55].mxu0 }
 0x6c5   : > { %v3080_v6 = vadd.f32 %v3079_v31, %v3055_v52  ;;  %v2769_v39 = vadd.f32 %v2768_v17, %v6547_v23 }
 0x6c6   : > { %v3062_v26 = vadd.f32 %v3957_v15, %v2767_v47 }
 0x6c7   : > { %v3063_v25 = vadd.f32 %v3958_v21, %v2769_v39 }
 0x6c8   : > { %v3072_v50 = vadd.f32 %v3071_v29, %v3062_v26 }
 0x6c9   : > { %v3081_v48 = vadd.f32 %v3080_v6, %v3063_v25 }
 0x6ca   : > { %v3073_v38 = vrot.slane %v3072_v50, 4 }
 0x6cb   : > { %v3082_v51 = vrot.slane %v3081_v48, 4 }
 0x6cc   : > { %v3074_v36 = vadd.f32 %v3073_v38, %v3072_v50 }
 0x6cd   : > { %v3083_v43 = vadd.f32 %v3082_v51, %v3081_v48 }
 0x6ce   : > { %v3075_v11 = vrot.slane %v3074_v36, 2 }
 0x6cf   : > { %v3084_v45 = vrot.slane %v3083_v43, 2 }
 0x6d0   : > { %v3076_v63 = vadd.f32 %v3075_v11, %v3074_v36 }
 0x6d1   : > { %v3085_v56 = vadd.f32 %v3084_v45, %v3083_v43 }
 0x6d2   : > { %v3077_v2 = vrot.slane %v3076_v63, 1  ;;  %v2837_v28 = vpop.f32.mrb[56].mxu0 }
 0x6d3   : > { %v3086_v34 = vrot.slane %v3085_v56, 1  ;;  %v2838_v62 = vadd.f32 %v2837_v28, %v6528_v3  ;;  %v2839_v57 = vpop.f32.mrb[57].mxu0  ;;  %v3965_v28 = vld [vmem:[%s4056_s30 + $0x80] sm:$0xff] }
 0x6d4   : > { %v3078_v7 = vadd.f32 %v3077_v2, %v3076_v63  ;;  %v2840_v9 = vadd.f32 %v2839_v57, %v6528_v3 }
 0x6d5   : > { %v3087_v60 = vadd.f32 %v3086_v34, %v3085_v56  ;;  %v6558_v61 = vadd.f32 %v3959_v32, %v2838_v62 }
 0x6d6   : > { %v3142_v16 = vmul.f32 0.03125, %v3078_v7  ;;  %v2843_v0 = vpop.f32.mrb[58].mxu0  ;;  %v6577_v46 = vadd.f32 %v3960_v33, %v2840_v9  ;;  %v3966_v7 = vld [vmem:[%s4056_s30 + $0x70] sm:$0xff] }
 0x6d7   : > { %v3143_v30 = vmul.f32 0.03125, %v3087_v60  ;;  %v2844_v55 = vadd.f32 %v2843_v0, %v6530_v19  ;;  %v2845_v35 = vpop.f32.mrb[59].mxu0 }
 0x6d8   : > { %v6561_v37 = vsub.f32 %v3046_v8, %v3142_v16  ;;  %v6563_v24 = vsub.f32 %v3054_v40, %v3142_v16  ;;  %v6565_v18 = vsub.f32 %v3062_v26, %v3142_v16  ;;  %v2846_v59 = vadd.f32 %v2845_v35, %v6530_v19  ;;  %v3963_v26 = vld [vmem:[%s4056_s30 + $0x60] sm:$0xff] }
 0x6d9   : > { %v6568_v58 = vsub.f32 %v3039_v20, %v3143_v30  ;;  %v6570_v13 = vsub.f32 %v3047_v5, %v3143_v30  ;;  %v6572_v14 = vsub.f32 %v3055_v52, %v3143_v30  ;;  %v6574_v27 = vsub.f32 %v3063_v25, %v3143_v30  ;;  %v3964_v25 = vld [vmem:[%s4056_s30 + $0x68] sm:$0xff]  ;;  %v3967_v30 = vld [vmem:[%s4056_s30 + $0x78] sm:$0xff] }
 0x6da   : > { %v6580_v8 = vadd.f32 %v3961_v10, %v2844_v55  ;;  %v6583_v12 = vadd.f32 %v3962_v53, %v2846_v59  ;;  %v2849_v49 = vpop.f32.mrb[60].mxu0  ;;  %v6586_v41 = vsub.f32 %v6536_v42, %v3142_v16  ;;  %v3206_v20 = vmul.f32 %v6565_v18, %v6565_v18  ;;  %v3968_v55 = vld [vmem:[%s4056_s30 + $0x88] sm:$0xff]  ;;  %v3969_v53 = vld [vmem:[%s4056_s30 + $0x90] sm:$0xff] }
 0x6db   : > { %v3183_v5 = vmul.f32 %v6568_v58, %v6568_v58  ;;  %v3191_v31 = vmul.f32 %v6570_v13, %v6570_v13  ;;  %v3199_v1 = vmul.f32 %v6572_v14, %v6572_v14  ;;  %v2851_v44 = vpop.f32.mrb[61].mxu0  ;;  %v2850_v22 = vadd.f32 %v2849_v49, %v6540_v54 }
 0x6dc   : > { %v3088_v40 = vadd.f32 %v6580_v8, %v6558_v61  ;;  %v3097_v42 = vadd.f32 %v6583_v12, %v6577_v46  ;;  %v2852_v52 = vadd.f32 %v2851_v44, %v6540_v54  ;;  %v2926_v4 = vpop.f32.mrb[64].mxu1  ;;  %v3182_v6 = vmul.f32 %v6586_v41, %v6586_v41 }
 0x6dd   : > { %v3223_v29 = vadd.f32 %v3191_v31, %v3183_v5  ;;  %v2927_v47 = vadd.f32 %v2926_v4, %v6528_v3  ;;  %v2928_v17 = vpop.f32.mrb[65].mxu1  ;;  %v3190_v39 = vmul.f32 %v6561_v37, %v6561_v37  ;;  %v3207_v15 = vmul.f32 %v6574_v27, %v6574_v27 }
 0x6de   : > { %v6610_v21 = vadd.f32 %v3963_v26, %v2850_v22  ;;  %v6613_v50 = vadd.f32 %v3964_v25, %v2852_v52  ;;  %v2855_v48 = vpop.f32.mrb[62].mxu0  ;;  %v2929_v38 = vadd.f32 %v2928_v17, %v6528_v3  ;;  %v3198_v11 = vmul.f32 %v6563_v24, %v6563_v24 }
 0x6df   : > { %v3224_v51 = vadd.f32 %v3223_v29, %v3199_v1  ;;  %v2856_v36 = vadd.f32 %v2855_v48, %v6547_v23  ;;  %v2857_v43 = vpop.f32.mrb[63].mxu0  ;;  %v3214_v45 = vadd.f32 %v3190_v39, %v3182_v6  ;;  %v6623_v34 = vadd.f32 %v3965_v28, %v2927_v47  ;;  %v3970_v1 = vld [vmem:[%s4056_s30 + $0x98] sm:$0xff]  ;;  %v3971_v48 = vld [vmem:[%s4056_s30 + $0xa0] sm:$0xff] }
 0x6e0   : > { %v3089_v63 = vadd.f32 %v3088_v40, %v6610_v21  ;;  %v3098_v56 = vadd.f32 %v3097_v42, %v6613_v50  ;;  %v2858_v2 = vadd.f32 %v2857_v43, %v6547_v23  ;;  %v2932_v62 = vpop.f32.mrb[66].mxu1  ;;  %v6633_v35 = vadd.f32 %v3968_v55, %v2929_v38  ;;  %v3972_v43 = vld [vmem:[%s4056_s30 + $0xa8] sm:$0xff] }
 0x6e1   : > { %v3225_v57 = vadd.f32 %v3224_v51, %v3207_v15  ;;  %v6626_v60 = vadd.f32 %v3966_v7, %v2856_v36  ;;  %v2933_v16 = vadd.f32 %v2932_v62, %v6530_v19  ;;  %v2934_v9 = vpop.f32.mrb[67].mxu1  ;;  %v3215_v0 = vadd.f32 %v3214_v45, %v3198_v11  ;;  %v3974_v55 = vld [vmem:[%s4056_s30 + $0xc8] sm:$0xff] }
 0x6e2   : > { %v6630_v32 = vadd.f32 %v3967_v30, %v2858_v2  ;;  %v2935_v59 = vadd.f32 %v2934_v9, %v6530_v19 }
 0x6e3   : > { %v3226_v33 = vrot.slane %v3225_v57, 4  ;;  %v3090_v10 = vadd.f32 %v3089_v63, %v6626_v60  ;;  %v6638_v49 = vadd.f32 %v3969_v53, %v2933_v16  ;;  %v3216_v5 = vadd.f32 %v3215_v0, %v3206_v20  ;;  %v3973_v63 = vld [vmem:[%s4056_s30 + $0xc0] sm:$0xff] }
 0x6e4   : > { %v3099_v31 = vadd.f32 %v3098_v56, %v6630_v32  ;;  %v6642_v44 = vadd.f32 %v3970_v1, %v2935_v59  ;;  %v2938_v40 = vpop.f32.mrb[68].mxu1 }
 0x6e5   : > { %v3227_v42 = vadd.f32 %v3226_v33, %v3225_v57  ;;  %v3091_v22 = vrot.slane %v3090_v10, 4  ;;  %v3106_v52 = vadd.f32 %v6638_v49, %v6623_v34  ;;  %v2939_v4 = vadd.f32 %v2938_v40, %v6540_v54  ;;  %v2940_v29 = vpop.f32.mrb[69].mxu1  ;;  %v3015_v47 = vpop.f32.mrb[64].mxu0 }
 0x6e6   : > { %v3100_v17 = vrot.slane %v3099_v31, 4  ;;  %v3115_v20 = vadd.f32 %v6642_v44, %v6633_v35  ;;  %v2941_v6 = vadd.f32 %v2940_v29, %v6540_v54  ;;  %v3016_v39 = vadd.f32 %v3015_v47, %v6528_v3  ;;  %v3017_v15 = vpop.f32.mrb[65].mxu0 }
 0x6e7   : > { %v3228_v26 = vrot.slane %v3227_v42, 2  ;;  %v3092_v25 = vadd.f32 %v3091_v22, %v3090_v10  ;;  %v6652_v38 = vadd.f32 %v3971_v48, %v2939_v4  ;;  %v3018_v51 = vadd.f32 %v3017_v15, %v6528_v3  ;;  %v3976_v22 = vld [vmem:[%s4056_s30 + $0xb8] sm:$0xff] }
 0x6e8   : > { %v3101_v36 = vadd.f32 %v3100_v17, %v3099_v31  ;;  %v6656_v11 = vadd.f32 %v3972_v43, %v2941_v6  ;;  %v2944_v45 = vpop.f32.mrb[70].mxu1  ;;  %v6659_v56 = vadd.f32 %v3973_v63, %v3016_v39  ;;  %v3217_v2 = vrot.slane %v3216_v5, 4  ;;  %v3975_v31 = vld [vmem:[%s4056_s30 + $0xb0] sm:$0xff]  ;;  %v3978_v48 = vld [vmem:[%s4056_s30 + $0xd8] sm:$0xff] }
 0x6e9   : > { %v3229_v28 = vadd.f32 %v3228_v26, %v3227_v42  ;;  %v3093_v62 = vrot.slane %v3092_v25, 2  ;;  %v3107_v57 = vadd.f32 %v3106_v52, %v6652_v38  ;;  %v2945_v7 = vadd.f32 %v2944_v45, %v6547_v23  ;;  %v2946_v16 = vpop.f32.mrb[71].mxu1  ;;  %v3021_v3 = vpop.f32.mrb[66].mxu0  ;;  %v3977_v6 = vld [vmem:[%s4056_s30 + $0xd0] sm:$0xff] }
 0x6ea   : > { %v3102_v9 = vrot.slane %v3101_v36, 2  ;;  %v3116_v0 = vadd.f32 %v3115_v20, %v6656_v11  ;;  %v2947_v30 = vadd.f32 %v2946_v16, %v6547_v23  ;;  %v6666_v59 = vadd.f32 %v3974_v55, %v3018_v51  ;;  %v3023_v33 = vpop.f32.mrb[67].mxu0 }
 0x6eb   : > { %v3230_v10 = vrot.slane %v3229_v28, 1  ;;  %v3094_v53 = vadd.f32 %v3093_v62, %v3092_v25  ;;  %v6669_v1 = vadd.f32 %v3975_v31, %v2945_v7  ;;  %v3022_v40 = vadd.f32 %v3021_v3, %v6530_v19 }
 0x6ec   : > { %v3103_v42 = vadd.f32 %v3102_v9, %v3101_v36  ;;  %v6673_v52 = vadd.f32 %v3976_v22, %v2947_v30  ;;  %v3024_v4 = vadd.f32 %v3023_v33, %v6530_v19  ;;  %v6676_v29 = vadd.f32 %v3217_v2, %v3216_v5 }
 0x6ed   : > { %v3231_v47 = vadd.f32 %v3230_v10, %v3229_v28  ;;  %v3095_v17 = vrot.slane %v3094_v53, 1  ;;  %v3108_v20 = vadd.f32 %v3107_v57, %v6669_v1  ;;  %v6680_v39 = vadd.f32 %v3977_v6, %v3022_v40  ;;  %v3027_v15 = vpop.f32.mrb[68].mxu0  ;;  %v3979_v57 = vld [vmem:[%s4056_s30 + $0xe0] sm:$0xff] }
 0x6ee   : > { %v3104_v26 = vrot.slane %v3103_v42, 1  ;;  %v3117_v25 = vadd.f32 %v3116_v0, %v6673_v52  ;;  %v6684_v51 = vadd.f32 %v3978_v48, %v3024_v4  ;;  %v3028_v36 = vadd.f32 %v3027_v15, %v6540_v54  ;;  %v3029_v19 = vpop.f32.mrb[69].mxu0  ;;  %v3980_v48 = vld [vmem:[%s4056_s30 + $0xe8] sm:$0xff] }
 0x6ef   : > { %v3287_v5 = vmul.f32 0.03125, %v3231_v47  ;;  %v3096_v43 = vadd.f32 %v3095_v17, %v3094_v53  ;;  %v3109_v45 = vrot.slane %v3108_v20, 4  ;;  %v3124_v63 = vadd.f32 %v6680_v39, %v6659_v56 }
 0x6f0   : > { %v3105_v2 = vadd.f32 %v3104_v26, %v3103_v42  ;;  %v3118_v28 = vrot.slane %v3117_v25, 4  ;;  %v3133_v62 = vadd.f32 %v6684_v51, %v6666_v59  ;;  %v6692_v7 = vadd.f32 %v3979_v57, %v3028_v36 }
 0x6f1   : > { %v3295_v16 = vadd.f32 1e-05, %v3287_v5  ;;  %v3144_v3 = vmul.f32 0.03125, %v3096_v43  ;;  %v3110_v9 = vadd.f32 %v3109_v45, %v3108_v20  ;;  %v3030_v0 = vadd.f32 %v3029_v19, %v6540_v54  ;;  %v3033_v30 = vpop.f32.mrb[70].mxu0  ;;  %v3981_v19 = vld [vmem:[%s4056_s30 + $0xf0] sm:$0xff] }
 0x6f2   : > { %v3145_v55 = vmul.f32 0.03125, %v3105_v2  ;;  %v3119_v33 = vadd.f32 %v3118_v28, %v3117_v25  ;;  %v3125_v10 = vadd.f32 %v3124_v63, %v6692_v7  ;;  %v3034_v53 = vadd.f32 %v3033_v30, %v6547_v23  ;;  %v3035_v31 = vpop.f32.mrb[71].mxu0  ;;  %v3982_v30 = vld [vmem:[%s4056_s30 + $0xf8] sm:$0xff] }
 0x6f3   : > { %3935 = vrsqrt.f32 %v3295_v16  ;;  %v6698_v40 = vsub.f32 %v6558_v61, %v3144_v3  ;;  %v6701_v42 = vsub.f32 %v6580_v8, %v3144_v3  ;;  %v6704_v22 = vsub.f32 %v6610_v21, %v3144_v3 }
 0x6f4   : > { %v6707_v54 = vsub.f32 %v6626_v60, %v3144_v3  ;;  %v6710_v4 = vsub.f32 %v6577_v46, %v3145_v55  ;;  %v6713_v47 = vsub.f32 %v6583_v12, %v3145_v55  ;;  %v6716_v17 = vsub.f32 %v6613_v50, %v3145_v55 }
 0x6f5   : > { %v3184_v61 = vmul.f32 %v6698_v40, %v6698_v40  ;;  %v3192_v8 = vmul.f32 %v6701_v42, %v6701_v42  ;;  %v3200_v21 = vmul.f32 %v6704_v22, %v6704_v22  ;;  %v6725_v46 = vsub.f32 %v6630_v32, %v3145_v55 }
 0x6f6   : > { %v3208_v12 = vmul.f32 %v6707_v54, %v6707_v54  ;;  %v3185_v50 = vmul.f32 %v6710_v4, %v6710_v4  ;;  %v3193_v60 = vmul.f32 %v6713_v47, %v6713_v47  ;;  %v3201_v20 = vmul.f32 %v6716_v17, %v6716_v17 }
 0x6f7   : > { %v3232_v6 = vadd.f32 %v3192_v8, %v3184_v61  ;;  %v3209_v15 = vmul.f32 %v6725_v46, %v6725_v46  ;;  %v3111_v26 = vrot.slane %v3110_v9, 2  ;;  %v3120_v32 = vrot.slane %v3119_v33, 2 }
 0x6f8   : > { %v3241_v25 = vadd.f32 %v3193_v60, %v3185_v50  ;;  %v6738_v36 = vadd.f32 %v3980_v48, %v3030_v0  ;;  %v6741_v5 = vadd.f32 %v3981_v19, %v3034_v53  ;;  %v3036_v43 = vadd.f32 %v3035_v31, %v6547_v23  ;;  %v6750_v53 = vpop.permute.xlu1 %3344 }
 0x6f9   : > { %v3233_v45 = vadd.f32 %v3232_v6, %v3200_v21  ;;  %v3112_v63 = vadd.f32 %v3111_v26, %v3110_v9  ;;  %v3121_v2 = vadd.f32 %v3120_v32, %v3119_v33  ;;  %v3219_v28 = vrot.slane %v6676_v29, 2 }
 0x6fa   : > { %v3242_v57 = vadd.f32 %v3241_v25, %v3201_v20  ;;  %v3134_v16 = vadd.f32 %v3133_v62, %v6738_v36  ;;  %v3126_v3 = vadd.f32 %v3125_v10, %v6741_v5  ;;  %v6748_v55 = vadd.f32 %v3982_v30, %v3036_v43 }
 0x6fb   : > { %v3234_v0 = vadd.f32 %v3233_v45, %v3208_v12  ;;  %v3113_v61 = vrot.slane %v3112_v63, 1  ;;  %v3122_v8 = vrot.slane %v3121_v2, 1  ;;  %v3220_v23 = vadd.f32 %v3219_v28, %v6676_v29  ;;  %v6762_v29 = vpop.permute.xlu0 %3349 }
 0x6fc   : > { %v3243_v31 = vadd.f32 %v3242_v57, %v3209_v15  ;;  %v3127_v9 = vrot.slane %v3126_v3, 4  ;;  %v3135_v33 = vadd.f32 %v3134_v16, %v6748_v55 }
 0x6fd   : > { %v3936_v21 = vpop.eup %3935  ;;  %v3235_v50 = vrot.slane %v3234_v0, 4  ;;  %v3114_v60 = vadd.f32 %v3113_v61, %v3112_v63  ;;  %v3123_v62 = vadd.f32 %v3122_v8, %v3121_v2  ;;  %v3221_v20 = vrot.slane %v3220_v23, 1 }
 0x6fe   : > { %v3311_v10 = vmul.f32 %v3936_v21, %v6568_v58  ;;  %v3319_v6 = vmul.f32 %v3936_v21, %v6570_v13  ;;  %v6757_v12 = vmul.f32 %v3936_v21, %v6572_v14  ;;  %v6760_v26 = vmul.f32 %v3936_v21, %v6574_v27  ;;  %v6771_v27 = vpop.permute.xlu1 %3354 }
 0x6ff   : > { %v3236_v15 = vadd.f32 %v3235_v50, %v3234_v0  ;;  %v3244_v32 = vrot.slane %v3243_v31, 4  ;;  %v3146_v25 = vmul.f32 0.03125, %v3114_v60  ;;  %v3147_v48 = vmul.f32 0.03125, %v3123_v62  ;;  %v6799_v61 = vpop.permute.xlu0 %3359 }
 0x700   : > { %v3128_v19 = vadd.f32 %v3127_v9, %v3126_v3  ;;  %v3136_v43 = vrot.slane %v3135_v33, 4  ;;  %v3222_v45 = vadd.f32 %v3221_v20, %v3220_v23  ;;  %v3363_v63 = vmul.f32 %v6750_v53, %v3311_v10 }
 0x701   : > { %v3237_v58 = vrot.slane %v3236_v15, 2  ;;  %v3245_v2 = vadd.f32 %v3244_v32, %v3243_v31  ;;  %v6766_v13 = vsub.f32 %v6623_v34, %v3146_v25  ;;  %v6769_v14 = vsub.f32 %v6638_v49, %v3146_v25 }
 0x702   : > { %v6774_v28 = vsub.f32 %v6652_v38, %v3146_v25  ;;  %v6777_v57 = vsub.f32 %v6669_v1, %v3146_v25  ;;  %v6780_v16 = vsub.f32 %v6633_v35, %v3147_v48  ;;  %v6783_v3 = vsub.f32 %v6642_v44, %v3147_v48 }
 0x703   : > { %v3238_v30 = vadd.f32 %v3237_v58, %v3236_v15  ;;  %v3246_v34 = vrot.slane %v3245_v2, 2  ;;  %v3186_v49 = vmul.f32 %v6766_v13, %v6766_v13  ;;  %v3194_v0 = vmul.f32 %v6769_v14, %v6769_v14  ;;  %v6809_v15 = vpop.permute.xlu1 %3396 }
 0x704   : > { %v3202_v38 = vmul.f32 %v6774_v28, %v6774_v28  ;;  %v3210_v1 = vmul.f32 %v6777_v57, %v6777_v57  ;;  %v6794_v35 = vsub.f32 %v6656_v11, %v3147_v48  ;;  %v6797_v44 = vsub.f32 %v6673_v52, %v3147_v48 }
 0x705   : > { %v3239_v8 = vrot.slane %v3238_v30, 1  ;;  %v3247_v23 = vadd.f32 %v3246_v34, %v3245_v2  ;;  %v3250_v31 = vadd.f32 %v3194_v0, %v3186_v49  ;;  %v3187_v9 = vmul.f32 %v6780_v16, %v6780_v16 }
 0x706   : > { %v3195_v21 = vmul.f32 %v6783_v3, %v6783_v3  ;;  %v3203_v50 = vmul.f32 %v6794_v35, %v6794_v35  ;;  %v3211_v11 = vmul.f32 %v6797_v44, %v6797_v44  ;;  %v3129_v52 = vrot.slane %v3128_v19, 2 }
 0x707   : > { %v3240_v60 = vadd.f32 %v3239_v8, %v3238_v30  ;;  %v3248_v62 = vrot.slane %v3247_v23, 1  ;;  %v3251_v20 = vadd.f32 %v3250_v31, %v3202_v38  ;;  %v3137_v10 = vadd.f32 %v3136_v43, %v3135_v33 }
 0x708   : > { %v3259_v32 = vadd.f32 %v3195_v21, %v3187_v9  ;;  %v3130_v25 = vadd.f32 %v3129_v52, %v3128_v19  ;;  %v3286_v48 = vmul.f32 0.03125, %v3222_v45  ;;  %v3371_v58 = vmul.f32 %v6762_v29, %v3319_v6  ;;  %v6820_v19 = vpop.permute.xlu0 %3401 }
 0x709   : > { %v3288_v2 = vmul.f32 0.03125, %v3240_v60  ;;  %v3249_v34 = vadd.f32 %v3248_v62, %v3247_v23  ;;  %v3252_v30 = vadd.f32 %v3251_v20, %v3210_v1  ;;  %v3138_v49 = vrot.slane %v3137_v10, 2 }
 0x70a   : > { %v3260_v0 = vadd.f32 %v3259_v32, %v3203_v50  ;;  %v3131_v33 = vrot.slane %v3130_v25, 1  ;;  %v3294_v43 = vadd.f32 1e-05, %v3286_v48  ;;  %v3415_v38 = vadd.f32 %v6809_v15, %v3363_v63  ;;  %v6825_v63 = vpop.permute.xlu1 %3406 }
 0x70b   : > { %v3296_v45 = vadd.f32 1e-05, %v3288_v2  ;;  %v3289_v6 = vmul.f32 0.03125, %v3249_v34  ;;  %v3253_v8 = vrot.slane %v3252_v30, 4  ;;  %v3139_v31 = vadd.f32 %v3138_v49, %v3137_v10 }
 0x70c   : > { %v3261_v9 = vadd.f32 %v3260_v0, %v3211_v11  ;;  %v3132_v21 = vadd.f32 %v3131_v33, %v3130_v25  ;;  %3937 = vrsqrt.f32 %v3294_v43  ;;  %3447 = vst [vmem:[%s6817_s10 + $0x8] sm:$0xff] %v3415_v38  ;;  %v3379_v23 = vmul.f32 %v6771_v27, %v6757_v12 }
 0x70d   : > { %3939 = vrsqrt.f32 %v3296_v45  ;;  %v3297_v1 = vadd.f32 1e-05, %v3289_v6  ;;  %v3254_v50 = vadd.f32 %v3253_v8, %v3252_v30  ;;  %v3140_v52 = vrot.slane %v3139_v31, 1 }
 0x70e   : > { %v3262_v60 = vrot.slane %v3261_v9, 4  ;;  %v3148_v62 = vmul.f32 0.03125, %v3132_v21  ;;  %v3431_v20 = vadd.f32 %v6825_v63, %v3379_v23  ;;  %v3423_v11 = vadd.f32 %v6820_v19, %v3371_v58  ;;  %v6842_v58 = vpop.permute.xlu0 %3411 }
 0x70f   : > { %3941 = vrsqrt.f32 %v3297_v1  ;;  %v3255_v10 = vrot.slane %v3254_v50, 2  ;;  %v3141_v32 = vadd.f32 %v3140_v52, %v3139_v31  ;;  %v3387_v12 = vmul.f32 %v6799_v61, %v6760_v26 }
 0x710   : > { %v3263_v25 = vadd.f32 %v3262_v60, %v3261_v9  ;;  %v6832_v48 = vsub.f32 %v6659_v56, %v3148_v62  ;;  %v6835_v2 = vsub.f32 %v6680_v39, %v3148_v62  ;;  %v6838_v34 = vsub.f32 %v6692_v7, %v3148_v62  ;;  %3451 = vst [vmem:[%s6817_s10 + $0x28] sm:$0xff] %v3431_v20 }
 0x711   : > { %3449 = vst [vmem:[%s6817_s10 + $0x18] sm:$0xff] %v3423_v11  ;;  %v3256_v30 = vadd.f32 %v3255_v10, %v3254_v50  ;;  %v6845_v49 = vsub.f32 %v6741_v5, %v3148_v62  ;;  %v3149_v26 = vmul.f32 0.03125, %v3141_v32  ;;  %v3439_v0 = vadd.f32 %v6842_v58, %v3387_v12 }
 0x712   : > { %v3264_v56 = vrot.slane %v3263_v25, 2  ;;  %v3188_v39 = vmul.f32 %v6832_v48, %v6832_v48  ;;  %v3196_v33 = vmul.f32 %v6835_v2, %v6835_v2  ;;  %v3204_v43 = vmul.f32 %v6838_v34, %v6838_v34 }
 0x713   : > { %v3257_v7 = vrot.slane %v3256_v30, 1  ;;  %v6855_v38 = vsub.f32 %v6666_v59, %v3149_v26  ;;  %v6858_v5 = vsub.f32 %v6684_v51, %v3149_v26  ;;  %3453 = vst [vmem:[%s6817_s10 + $0x38] sm:$0xff] %v3439_v0  ;;  %v6862_v8 = vsub.f32 %v6738_v36, %v3149_v26 }
 0x714   : > { %v3265_v45 = vadd.f32 %v3264_v56, %v3263_v25  ;;  %v3268_v6 = vadd.f32 %v3196_v33, %v3188_v39  ;;  %v6865_v31 = vsub.f32 %v6748_v55, %v3149_v26  ;;  %v3212_v21 = vmul.f32 %v6845_v49, %v6845_v49 }
 0x715   : > { %v3258_v9 = vadd.f32 %v3257_v7, %v3256_v30  ;;  %v3189_v59 = vmul.f32 %v6855_v38, %v6855_v38  ;;  %v3197_v51 = vmul.f32 %v6858_v5, %v6858_v5  ;;  %v3205_v36 = vmul.f32 %v6862_v8, %v6862_v8 }
 0x716   : > { %v3938_v23 = vpop.eup %3937  ;;  %v3266_v1 = vrot.slane %v3265_v45, 1  ;;  %v3269_v50 = vadd.f32 %v3268_v6, %v3204_v43  ;;  %v3213_v55 = vmul.f32 %v6865_v31, %v6865_v31 }
 0x717   : > { %v3940_v52 = vpop.eup %3939  ;;  %v3290_v60 = vmul.f32 0.03125, %v3258_v9  ;;  %v3277_v62 = vadd.f32 %v3197_v51, %v3189_v59  ;;  %v3310_v20 = vmul.f32 %v3938_v23, %v6586_v41  ;;  %v3318_v11 = vmul.f32 %v3938_v23, %v6561_v37 }
 0x718   : > { %v3312_v10 = vmul.f32 %v3940_v52, %v6698_v40  ;;  %v3320_v32 = vmul.f32 %v3940_v52, %v6701_v42  ;;  %v3328_v12 = vmul.f32 %v3940_v52, %v6704_v22  ;;  %v3336_v25 = vmul.f32 %v3940_v52, %v6707_v54 }
 0x719   : > { %v3942_v30 = vpop.eup %3941  ;;  %v3298_v26 = vadd.f32 1e-05, %v3290_v60  ;;  %v3267_v0 = vadd.f32 %v3266_v1, %v3265_v45  ;;  %v3270_v56 = vadd.f32 %v3269_v50, %v3212_v21  ;;  %v3278_v39 = vadd.f32 %v3277_v62, %v3205_v36 }
 0x71a   : > { %v3313_v33 = vmul.f32 %v3942_v30, %v6710_v4  ;;  %v3321_v7 = vmul.f32 %v3942_v30, %v6713_v47  ;;  %v3329_v41 = vmul.f32 %v3942_v30, %v6716_v17  ;;  %v3337_v37 = vmul.f32 %v3942_v30, %v6725_v46 }
 0x71b   : > { %3943 = vrsqrt.f32 %v3298_v26  ;;  %v3291_v40 = vmul.f32 0.03125, %v3267_v0  ;;  %v3271_v42 = vrot.slane %v3270_v56, 4  ;;  %v3279_v43 = vadd.f32 %v3278_v39, %v3213_v55 }
 0x71c   : > { %v3362_v22 = vmul.f32 %v6750_v53, %v3310_v20  ;;  %v3364_v54 = vmul.f32 %v6750_v53, %v3312_v10  ;;  %v3365_v45 = vmul.f32 %v6750_v53, %v3313_v33  ;;  %v3370_v4 = vmul.f32 %v6762_v29, %v3318_v11 }
 0x71d   : > { %v3299_v6 = vadd.f32 1e-05, %v3291_v40  ;;  %v3272_v47 = vadd.f32 %v3271_v42, %v3270_v56  ;;  %v3280_v9 = vrot.slane %v3279_v43, 4  ;;  %v3372_v17 = vmul.f32 %v6762_v29, %v3320_v32 }
 0x71e   : > { %v3373_v46 = vmul.f32 %v6762_v29, %v3321_v7  ;;  %v3414_v21 = vadd.f32 %v6809_v15, %v3362_v22  ;;  %v3416_v59 = vadd.f32 %v6809_v15, %v3364_v54  ;;  %v3417_v51 = vadd.f32 %v6809_v15, %v3365_v45 }
 0x71f   : > { %3945 = vrsqrt.f32 %v3299_v6  ;;  %v3273_v1 = vrot.slane %v3272_v47, 2  ;;  %v3281_v50 = vadd.f32 %v3280_v9, %v3279_v43  ;;  %v3326_v36 = vmul.f32 %v3938_v23, %v6563_v24 }
 0x720   : > { %3446 = vst [vmem:[%s6817_s10] sm:$0xff] %v3414_v21  ;;  %3655 = vst [vmem:[%s6817_s10 + $0x48] sm:$0xff] %v3417_v51  ;;  %v3380_v55 = vmul.f32 %v6771_v27, %v3328_v12  ;;  %v3381_v52 = vmul.f32 %v6771_v27, %v3329_v41  ;;  %v3422_v60 = vadd.f32 %v6820_v19, %v3370_v4 }
 0x721   : > { %v3424_v62 = vadd.f32 %v6820_v19, %v3372_v17  ;;  %v3274_v20 = vadd.f32 %v3273_v1, %v3272_v47  ;;  %v3282_v11 = vrot.slane %v3281_v50, 2  ;;  %3654 = vst [vmem:[%s6817_s10 + $0x40] sm:$0xff] %v3416_v59  ;;  %v3378_v10 = vmul.f32 %v6771_v27, %v3326_v36 }
 0x722   : > { %v3425_v24 = vadd.f32 %v6820_v19, %v3373_v46  ;;  %v3432_v32 = vadd.f32 %v6825_v63, %v3380_v55  ;;  %v3433_v12 = vadd.f32 %v6825_v63, %v3381_v52  ;;  %3448 = vst [vmem:[%s6817_s10 + $0x10] sm:$0xff] %v3422_v60  ;;  %v3334_v30 = vmul.f32 %v3938_v23, %v6565_v18 }
 0x723   : > { %v3388_v26 = vmul.f32 %v6799_v61, %v3336_v25  ;;  %v3275_v0 = vrot.slane %v3274_v20, 1  ;;  %v3283_v56 = vadd.f32 %v3282_v11, %v3281_v50  ;;  %v3430_v39 = vadd.f32 %v6825_v63, %v3378_v10  ;;  %3656 = vst [vmem:[%s6817_s10 + $0x50] sm:$0xff] %v3424_v62 }
 0x724   : > { %3657 = vst [vmem:[%s6817_s10 + $0x58] sm:$0xff] %v3425_v24  ;;  %v3389_v33 = vmul.f32 %v6799_v61, %v3337_v37  ;;  %3659 = vst [vmem:[%s6817_s10 + $0x68] sm:$0xff] %v3433_v12  ;;  %v3386_v7 = vmul.f32 %v6799_v61, %v3334_v30 }
 0x725   : > { %v3944_v41 = vpop.eup %3943  ;;  %v3276_v40 = vadd.f32 %v3275_v0, %v3274_v20  ;;  %v3284_v42 = vrot.slane %v3283_v56, 1  ;;  %3450 = vst [vmem:[%s6817_s10 + $0x20] sm:$0xff] %v3430_v39  ;;  %v3440_v18 = vadd.f32 %v6842_v58, %v3388_v26  ;;  %3658 = vst [vmem:[%s6817_s10 + $0x60] sm:$0xff] %v3432_v32 }
 0x726   : > { %v3441_v23 = vadd.f32 %v6842_v58, %v3389_v33  ;;  %v3314_v25 = vmul.f32 %v3944_v41, %v6766_v13  ;;  %v3322_v43 = vmul.f32 %v3944_v41, %v6769_v14  ;;  %v3330_v22 = vmul.f32 %v3944_v41, %v6774_v28 }
 0x727   : > { %v3338_v37 = vmul.f32 %v3944_v41, %v6777_v57  ;;  %v3292_v54 = vmul.f32 0.03125, %v3276_v40  ;;  %v3285_v45 = vadd.f32 %v3284_v42, %v3283_v56  ;;  %v3438_v4 = vadd.f32 %v6842_v58, %v3386_v7  ;;  %3660 = vst [vmem:[%s6817_s10 + $0x70] sm:$0xff] %v3440_v18 }
 0x728   : > { %3661 = vst [vmem:[%s6817_s10 + $0x78] sm:$0xff] %v3441_v23  ;;  %v3366_v6 = vmul.f32 %v6750_v53, %v3314_v25  ;;  %v3374_v47 = vmul.f32 %v6762_v29, %v3322_v43  ;;  %v3382_v13 = vmul.f32 %v6771_v27, %v3330_v22 }
 0x729   : > { %v3946_v9 = vpop.eup %3945  ;;  %v3300_v17 = vadd.f32 1e-05, %v3292_v54  ;;  %v3293_v14 = vmul.f32 0.03125, %v3285_v45  ;;  %v3390_v28 = vmul.f32 %v6799_v61, %v3338_v37  ;;  %3452 = vst [vmem:[%s6817_s10 + $0x30] sm:$0xff] %v3438_v4 }
 0x72a   : > { %v3315_v57 = vmul.f32 %v3946_v9, %v6780_v16  ;;  %v3323_v46 = vmul.f32 %v3946_v9, %v6783_v3  ;;  %v3331_v21 = vmul.f32 %v3946_v9, %v6794_v35  ;;  %v3339_v59 = vmul.f32 %v3946_v9, %v6797_v44 }
 0x72b   : > { %3947 = vrsqrt.f32 %v3300_v17  ;;  %v3301_v51 = vadd.f32 1e-05, %v3293_v14  ;;  %v3418_v1 = vadd.f32 %v6809_v15, %v3366_v6  ;;  %v3434_v50 = vadd.f32 %v6825_v63, %v3382_v13 }
 0x72c   : > { %v3367_v36 = vmul.f32 %v6750_v53, %v3315_v57  ;;  %v3375_v16 = vmul.f32 %v6762_v29, %v3323_v46  ;;  %v3383_v3 = vmul.f32 %v6771_v27, %v3331_v21  ;;  %v3426_v35 = vadd.f32 %v6820_v19, %v3374_v47 }
 0x72d   : > { %3949 = vrsqrt.f32 %v3301_v51  ;;  %3662 = vst [vmem:[%s6817_s10 + $0x80] sm:$0xff] %v3418_v1  ;;  %3666 = vst [vmem:[%s6817_s10 + $0xa0] sm:$0xff] %v3434_v50  ;;  %v3391_v44 = vmul.f32 %v6799_v61, %v3339_v59  ;;  %v3442_v55 = vadd.f32 %v6842_v58, %v3390_v28 }
 0x72e   : > { %v3419_v52 = vadd.f32 %v6809_v15, %v3367_v36  ;;  %v3435_v60 = vadd.f32 %v6825_v63, %v3383_v3  ;;  %v3427_v62 = vadd.f32 %v6820_v19, %v3375_v16  ;;  %3664 = vst [vmem:[%s6817_s10 + $0x90] sm:$0xff] %v3426_v35 }
 0x72f   : > { %v3443_v20 = vadd.f32 %v6842_v58, %v3391_v44  ;;  %3668 = vst [vmem:[%s6817_s10 + $0xb0] sm:$0xff] %v3442_v55 }
 0x730   : > { %3663 = vst [vmem:[%s6817_s10 + $0x88] sm:$0xff] %v3419_v52  ;;  %3667 = vst [vmem:[%s6817_s10 + $0xa8] sm:$0xff] %v3435_v60 }
 0x731   : > { %3665 = vst [vmem:[%s6817_s10 + $0x98] sm:$0xff] %v3427_v62  ;;  %3669 = vst [vmem:[%s6817_s10 + $0xb8] sm:$0xff] %v3443_v20 }
 0x735   : > { %v3948_v11 = vpop.eup %3947 }
 0x736   : > { %v3316_v10 = vmul.f32 %v3948_v11, %v6832_v48  ;;  %v3324_v24 = vmul.f32 %v3948_v11, %v6835_v2  ;;  %v3332_v32 = vmul.f32 %v3948_v11, %v6838_v34  ;;  %v3340_v12 = vmul.f32 %v3948_v11, %v6845_v49 }
 0x737   : > { %v3950_v30 = vpop.eup %3949 }
 0x738   : > { %v3317_v26 = vmul.f32 %v3950_v30, %v6855_v38  ;;  %v3325_v0 = vmul.f32 %v3950_v30, %v6858_v5  ;;  %v3333_v56 = vmul.f32 %v3950_v30, %v6862_v8  ;;  %v3341_v39 = vmul.f32 %v3950_v30, %v6865_v31 }
 0x739   : > { %v3368_v33 = vmul.f32 %v6750_v53, %v3316_v10  ;;  %v3376_v48 = vmul.f32 %v6762_v29, %v3324_v24  ;;  %v3384_v2 = vmul.f32 %v6771_v27, %v3332_v32  ;;  %v3392_v34 = vmul.f32 %v6799_v61, %v3340_v12 }
 0x73a   : > { %v3369_v49 = vmul.f32 %v6750_v53, %v3317_v26  ;;  %v3377_v38 = vmul.f32 %v6762_v29, %v3325_v0  ;;  %v3385_v5 = vmul.f32 %v6771_v27, %v3333_v56  ;;  %v3393_v8 = vmul.f32 %v6799_v61, %v3341_v39 }
 0x73b   : > { %v3420_v31 = vadd.f32 %v6809_v15, %v3368_v33  ;;  %v3436_v7 = vadd.f32 %v6825_v63, %v3384_v2  ;;  %v3428_v41 = vadd.f32 %v6820_v19, %v3376_v48  ;;  %v3444_v40 = vadd.f32 %v6842_v58, %v3392_v34 }
 0x73c   : > { %v3421_v53 = vadd.f32 %v6809_v15, %v3369_v49  ;;  %v3437_v42 = vadd.f32 %v6825_v63, %v3385_v5  ;;  %v3429_v29 = vadd.f32 %v6820_v19, %v3377_v38  ;;  %v3445_v27 = vadd.f32 %v6842_v58, %v3393_v8 }
 0x73d   : > { %3670 = vst [vmem:[%s6817_s10 + $0xc0] sm:$0xff] %v3420_v31  ;;  %3674 = vst [vmem:[%s6817_s10 + $0xe0] sm:$0xff] %v3436_v7 }
 0x73e   : > { %3672 = vst [vmem:[%s6817_s10 + $0xd0] sm:$0xff] %v3428_v41  ;;  %3676 = vst [vmem:[%s6817_s10 + $0xf0] sm:$0xff] %v3444_v40 }
 0x73f   : > { %3671 = vst [vmem:[%s6817_s10 + $0xc8] sm:$0xff] %v3421_v53  ;;  %3675 = vst [vmem:[%s6817_s10 + $0xe8] sm:$0xff] %v3437_v42 }
 0x740   : > { %3673 = vst [vmem:[%s6817_s10 + $0xd8] sm:$0xff] %v3429_v29  ;;  %3677 = vst [vmem:[%s6817_s10 + $0xf8] sm:$0xff] %v3445_v27 }
 0x741 PF: > { %s13_s12 = sadd.s32 1, %s3989_s12  }
 0x742   : > { %p10_p4 = scmp.ge.s32.totalorder %s13_s12, 4  }
 0x744   :  { %12 = sbr.rel (!%p10_p4) target bundleno = 1 (0x1), region = 68 }

</bundles_post_ra>
